<compile_context>
chip_gen: v5e
topology: v5e:2x2
jax: 0.10.0
libtpu: 0.0.40
codegen_flags: <defaults>
</compile_context>

<pallas_src>
import math
import numpy as np
import jax
import jax.numpy as jnp
from jax.experimental import pallas as pl
from jax.experimental.pallas import tpu as pltpu  # noqa: F401  (imported per convention)

# ----------------------- small, module-consistent config -----------------------
B = 2          # batch
T = 8          # face-frame sequence length
S = 8          # audio hidden-state length (== T so the vocaset enc_dec diagonal mask is valid)
F = 32         # args.feature_dim
VD = 24        # args.vertice_dim (!= 64 -> vertice_out = vertice_out + template path)
NS = 8         # args.num_speakers
NH = 4         # n_head
HD = F // NH   # head dim
AUD = 768      # wav2vec2 hidden size
PERIOD = 25    # args.period
MAX_SEQ = 600
NEG = -1e9     # finite stand-in for -inf (identical after f32 softmax underflow; every row
               # has at least one unmasked entry: causal diag / vocaset diag with T == S)

OUT_W = 128    # lane-dense output slab width
HID_OFF = 64   # column offset of the decoder hidden state inside the output slab


# ----------------------- mask / PE construction (host, hoisted to module level) -----------------------
def _get_slopes(n):
    def pow2(n):
        start = 2 ** (-2 ** (-(math.log2(n) - 3)))
        return [start * start ** i for i in range(n)]
    if math.log2(n).is_integer():
        return pow2(n)
    cp2 = 2 ** math.floor(math.log2(n))
    return pow2(cp2) + _get_slopes(2 * cp2)[0::2][: n - cp2]


def init_biased_mask_np(n_head, max_seq_len, period):
    slopes = np.array(_get_slopes(n_head), dtype=np.float32)
    bias = (np.arange(0, max_seq_len, period).reshape(-1, 1)
            .repeat(period, axis=1).reshape(-1) // period)
    bias = -bias[::-1]
    alibi = np.zeros((max_seq_len, max_seq_len), dtype=np.float32)
    for i in range(max_seq_len):
        alibi[i, : i + 1] = bias[-(i + 1):]
    alibi = slopes[:, None, None] * alibi[None]
    causal = np.triu(np.ones((max_seq_len, max_seq_len), dtype=np.float32)).T
    mask = np.where(causal == 1, 0.0, NEG).astype(np.float32)
    return mask[None] + alibi           # (n_head, max_seq, max_seq), additive float


def enc_dec_mask_additive(t, s):        # dataset == 'vocaset': only the diagonal is attendable
    m = np.full((t, s), NEG, dtype=np.float32)
    for i in range(min(t, s)):
        m[i, i] = 0.0
    return m


def sinusoid_pe(max_len, d_model):      # standard sinusoidal PositionalEncoding table
    pe = np.zeros((max_len, d_model), dtype=np.float32)
    pos = np.arange(max_len, dtype=np.float32)[:, None]
    div = np.exp(np.arange(0, d_model, 2, dtype=np.float32) * (-math.log(10000.0) / d_model))
    pe[:, 0::2] = np.sin(pos * div)
    pe[:, 1::2] = np.cos(pos * div)
    return pe


# built once per process (hoisted out of the forward wrapper)
_PE_T = sinusoid_pe(MAX_SEQ, F)[:T]                                   # (T, F)
_TGT_MASK_T = init_biased_mask_np(NH, MAX_SEQ, PERIOD)[:, :T, :T]     # (NH, T, T)
_MEM_MASK = enc_dec_mask_additive(T, S)                               # (T, S) (reference only)
# batch-folded, block-diagonal causal+ALiBi mask for the folded (B*T, B*T) self-attention
_TGT_MASK_FOLDED = np.full((NH, B * T, B * T), NEG, dtype=np.float32)
for _b in range(B):
    _TGT_MASK_FOLDED[:, _b * T:(_b + 1) * T, _b * T:(_b + 1) * T] = _TGT_MASK_T


# ----------------------- the fused Pallas kernel (whole batch, single invocation) -----------------------
def fused_decoder_kernel(hidden_ref, vin_ref, addin_ref, tmplb_ref, mask_ref,
                         w_vm,
                         w_sa_in, b_sa_in, w_sa_out, b_sa_out, ln1_g, ln1_b,
                         w_cross, b_cross, ln2_g, ln2_b,
                         w_ff1, b_ff1, w_ff2, b_ff2, ln3_g, ln3_b,
                         w_comb,
                         out_ref):
    f32 = jnp.float32
    N = B * T

    def layer_norm(v, g, b):
        mu = jnp.mean(v, axis=-1, keepdims=True)
        var = jnp.mean((v - mu) ** 2, axis=-1, keepdims=True)
        return (v - mu) * jax.lax.rsqrt(var + 1e-5) * g[...] + b[...]

    # 1) vertice_map(vertice_input - template) + [style + PE + b_vm] (pre-folded additive term)
    x = jnp.dot(vin_ref[...], w_vm[...], preferred_element_type=f32) + addin_ref[...]   # (N, F)

    # 2) self-attention, batch folded onto sublanes with a block-diagonal causal+ALiBi mask.
    #    Cross-batch scores get -1e9 -> exp underflows to exactly 0, so the folded result is
    #    bit-identical to per-batch attention.
    q = jnp.dot(x, w_sa_in[:, :F], preferred_element_type=f32) + b_sa_in[:, :F]
    k = jnp.dot(x, w_sa_in[:, F:2 * F], preferred_element_type=f32) + b_sa_in[:, F:2 * F]
    v = jnp.dot(x, w_sa_in[:, 2 * F:], preferred_element_type=f32) + b_sa_in[:, 2 * F:]
    scale = 1.0 / math.sqrt(HD)
    acc = jnp.zeros((N, F), f32)
    for h in range(NH):                         # static 4-way head loop (unrolled)
        sl = slice(h * HD, (h + 1) * HD)
        s = jnp.dot(q[:, sl], k[:, sl].T, preferred_element_type=f32) * scale + mask_ref[h]
        s = s - jnp.max(s, axis=-1, keepdims=True)
        p = jnp.exp(s)
        p = p * pl.reciprocal(jnp.sum(p, axis=-1, keepdims=True))
        ctx_h = jnp.dot(p, v[:, sl], preferred_element_type=f32)
        # per-head accumulation through the matching rows of the output projection
        # (replaces lane-axis head concat + single big matmul)
        acc = acc + jnp.dot(ctx_h, w_sa_out[sl, :], preferred_element_type=f32)
    x = layer_norm(x + acc + b_sa_out[...], ln1_g, ln1_b)

    # 3) cross-attention, collapsed: vocaset memory mask is diagonal-only and T == S, so the
    #    softmax is exactly one-hot and ctx == V.  audio_feature_map + V-projection + output
    #    projection were folded (wrapper side) into one (768, F) weight -> a single matmul.
    cross = jnp.dot(hidden_ref[...], w_cross[...], preferred_element_type=f32) + b_cross[...]
    x = layer_norm(x + cross, ln2_g, ln2_b)

    # 4) feed-forward (relu, dim_feedforward = 2F), post-norm
    ff = jnp.dot(jnp.maximum(jnp.dot(x, w_ff1[...], preferred_element_type=f32) + b_ff1[...], 0.0),
                 w_ff2[...], preferred_element_type=f32) + b_ff2[...]
    x = layer_norm(x + ff, ln3_g, ln3_b)

    # 5) lane-dense (N, 128) output slab through ONE matmul:
    #      cols [0:VD)          = vertice_map_r(x) + b_vr + template   (w_vr columns of w_comb)
    #      cols [HID_OFF:+F)    = decoder hidden state x               (identity columns, exact)
    #    -> single unmasked full-width vector store.
    out_ref[...] = jnp.dot(x, w_comb[...], preferred_element_type=f32) + tmplb_ref[...]


# ----------------------- wrapper -----------------------
@jax.jit
def face_former_forward(one_hot, hidden_raw, vertice, template, params):
    (w_obj, w_af, b_af, w_vm, b_vm,
     w_sa_in, b_sa_in, w_sa_out, b_sa_out, ln1_g, ln1_b,
     w_ca_in, b_ca_in, w_ca_out, b_ca_out, ln2_g, ln2_b,
     w_ff1, b_ff1, w_ff2, b_ff2, ln3_g, ln3_b, w_vr, b_vr) = params

    # The cross-attention collapse below requires the vocaset diagonal memory mask with T == S.
    assert T == S, "diagonal enc_dec-mask collapse requires T == S (vocaset)"

    # --- teacher-forcing input construction (glue, identical to the module) ---
    vin = (jnp.concatenate([template, vertice[:, :-1]], axis=1) - template).reshape(B * T, VD)
    hidden_f = hidden_raw.reshape(B * S, AUD)

    # --- wrapper-side folding (tiny, fused into the jit; removes in-kernel ops / DMAs) ---
    # style embedding (obj_vector) + positional encoding + vertice_map bias -> one additive term
    style = one_hot @ w_obj                                                     # (B, F)
    addin = (style[:, None, :] + jnp.asarray(_PE_T)[None] + b_vm[None]).reshape(B * T, F)

    # audio_feature_map ∘ cross-attn V-projection ∘ cross-attn output projection -> (768, F)
    # (Q/K thirds of w_ca_in are dead under the diagonal one-hot attention.)
    m_vo = w_ca_in[:, 2 * F:] @ w_ca_out                                        # (F, F)
    w_cross = w_af @ m_vo                                                       # (768, F)
    b_cross = (b_af @ w_ca_in[:, 2 * F:] + b_ca_in[:, 2 * F:]) @ w_ca_out + b_ca_out   # (1, F)

    # combined lane-dense output projection: [ w_vr | 0 | I_F | 0 ]  -> (F, 128)
    w_comb = jnp.zeros((F, OUT_W), jnp.float32)
    w_comb = w_comb.at[:, :VD].set(w_vr)
    w_comb = w_comb.at[:, HID_OFF:HID_OFF + F].set(jnp.eye(F, dtype=jnp.float32))
    # template + b_vr, broadcast over T and zero-padded to the 128-lane slab
    tmplb = jnp.zeros((B, T, OUT_W), jnp.float32)
    tmplb = tmplb.at[:, :, :VD].set(jnp.broadcast_to(template, (B, T, VD)))
    tmplb = (tmplb + jnp.pad(b_vr, ((0, 0), (0, OUT_W - VD)))[None]).reshape(B * T, OUT_W)

    tgt_mask_folded = jnp.asarray(_TGT_MASK_FOLDED)                             # (NH, B*T, B*T)

    # single kernel invocation, no grid: every operand is staged into VMEM exactly once.
    slab = pl.pallas_call(
        fused_decoder_kernel,
        out_shape=jax.ShapeDtypeStruct((B * T, OUT_W), jnp.float32),
    )(hidden_f, vin, addin, tmplb, tgt_mask_folded,
      w_vm,
      w_sa_in, b_sa_in, w_sa_out, b_sa_out, ln1_g, ln1_b,
      w_cross, b_cross, ln2_g, ln2_b,
      w_ff1, b_ff1, w_ff2, b_ff2, ln3_g, ln3_b,
      w_comb)

    vert_out = slab[:, :VD].reshape(B, T, VD)
    dec_hid = slab[:, HID_OFF:HID_OFF + F].reshape(B, T, F)
    return vert_out, dec_hid


# ----------------------- pure-JAX reference (module math, for correctness check) -----------------------
def reference_forward(one_hot, hidden_raw, vertice, template, params, pe, tgt_mask, mem_mask):
    (w_obj, w_af, b_af, w_vm, b_vm,
     w_sa_in, b_sa_in, w_sa_out, b_sa_out, ln1_g, ln1_b,
     w_ca_in, b_ca_in, w_ca_out, b_ca_out, ln2_g, ln2_b,
     w_ff1, b_ff1, w_ff2, b_ff2, ln3_g, ln3_b, w_vr, b_vr) = params

    style = one_hot @ w_obj
    hs = hidden_raw @ w_af + b_af
    vin = jnp.concatenate([template, vertice[:, :-1]], axis=1) - template
    x = vin @ w_vm + b_vm + style[:, None, :] + pe[None]

    def ln(v, g, b):
        mu = jnp.mean(v, -1, keepdims=True)
        var = jnp.mean((v - mu) ** 2, -1, keepdims=True)
        return (v - mu) / jnp.sqrt(var + 1e-5) * g + b

    def mha(q_in, kv_in, w_in, b_in, w_out, b_out, mask):
        q = (q_in @ w_in[:, :F] + b_in[:, :F]).reshape(B, q_in.shape[1], NH, HD)
        k = (kv_in @ w_in[:, F:2 * F] + b_in[:, F:2 * F]).reshape(B, kv_in.shape[1], NH, HD)
        v = (kv_in @ w_in[:, 2 * F:] + b_in[:, 2 * F:]).reshape(B, kv_in.shape[1], NH, HD)
        s = jnp.einsum('bqhd,bkhd->bhqk', q, k) / math.sqrt(HD) + mask
        p = jax.nn.softmax(s, axis=-1)
        ctx = jnp.einsum('bhqk,bkhd->bqhd', p, v).reshape(B, q_in.shape[1], F)
        return ctx @ w_out + b_out

    x = ln(x + mha(x, x, w_sa_in, b_sa_in, w_sa_out, b_sa_out, tgt_mask[None]), ln1_g, ln1_b)
    x = ln(x + mha(x, hs, w_ca_in, b_ca_in, w_ca_out, b_ca_out, mem_mask[None, None]), ln2_g, ln2_b)
    x = ln(x + (jnp.maximum(x @ w_ff1 + b_ff1, 0.0) @ w_ff2 + b_ff2), ln3_g, ln3_b)
    vout = x @ w_vr + b_vr + template
    return vout, x


# ----------------------- deterministic parameter init -----------------------
def init_params(key):
    ks = jax.random.split(key, 16)

    def rnd(k, shape, scale=0.05):
        return jax.random.normal(k, shape, jnp.float32) * scale

    w_obj = rnd(ks[0], (NS, F))
    w_af = rnd(ks[1], (AUD, F)); b_af = rnd(ks[2], (1, F))
    w_vm = rnd(ks[3], (VD, F)); b_vm = rnd(ks[4], (1, F))
    w_sa_in = rnd(ks[5], (F, 3 * F)); b_sa_in = rnd(ks[6], (1, 3 * F))
    w_sa_out = rnd(ks[7], (F, F)); b_sa_out = rnd(ks[8], (1, F))
    ln1_g = jnp.ones((1, F)); ln1_b = jnp.zeros((1, F))
    w_ca_in = rnd(ks[9], (F, 3 * F)); b_ca_in = rnd(ks[10], (1, 3 * F))
    w_ca_out = rnd(ks[11], (F, F)); b_ca_out = rnd(ks[12], (1, F))
    ln2_g = jnp.ones((1, F)); ln2_b = jnp.zeros((1, F))
    w_ff1 = rnd(ks[13], (F, 2 * F)); b_ff1 = jnp.zeros((1, 2 * F))
    w_ff2 = rnd(ks[14], (2 * F, F)); b_ff2 = jnp.zeros((1, F))
    ln3_g = jnp.ones((1, F)); ln3_b = jnp.zeros((1, F))
    w_vr = jnp.zeros((F, VD)); b_vr = jnp.zeros((1, VD))     # nn.init.constant_(..., 0)
    return (w_obj, w_af, b_af, w_vm, b_vm,
            w_sa_in, b_sa_in, w_sa_out, b_sa_out, ln1_g, ln1_b,
            w_ca_in, b_ca_in, w_ca_out, b_ca_out, ln2_g, ln2_b,
            w_ff1, b_ff1, w_ff2, b_ff2, ln3_g, ln3_b, w_vr, b_vr)


if __name__ == "__main__":
    # use the accurate f32 matmul path everywhere so kernel / reference / wrapper folding agree
    jax.config.update("jax_default_matmul_precision", "highest")

    key = jax.random.PRNGKey(0)
    k1, k2, k3, kp = jax.random.split(key, 4)
    params = init_params(kp)

    # TODO(synk): Wav2Vec2 audio encoder (frozen pretrained) not implemented — its output
    # `last_hidden_state` (B, S, 768) is provided directly as a synthetic input.
    hidden_raw = jax.random.normal(k1, (B, S, AUD), jnp.float32)
    vertice = jax.random.normal(k2, (B, T, VD), jnp.float32) * 0.1    # batch['face_vertex']
    template = jax.random.normal(k3, (B, 1, VD), jnp.float32) * 0.1   # batch['template']
    one_hot = jnp.eye(NS, dtype=jnp.float32)[jnp.arange(B) % NS]      # batch['one_hot']

    vert_out, dec_hid = face_former_forward(one_hot, hidden_raw, vertice, template, params)
    jax.block_until_ready((vert_out, dec_hid))

    # reference check against the un-folded module math
    ref_out, ref_hid = reference_forward(one_hot, hidden_raw, vertice, template, params,
                                         jnp.asarray(_PE_T), jnp.asarray(_TGT_MASK_T),
                                         jnp.asarray(_MEM_MASK))
    np.testing.assert_allclose(np.asarray(vert_out), np.asarray(ref_out), rtol=2e-4, atol=2e-4)
    np.testing.assert_allclose(np.asarray(dec_hid), np.asarray(ref_hid), rtol=2e-4, atol=2e-4)

    # return_loss=True path with a plain MSE criterion (use_mouth_mask=False) — glue in JAX
    loss = jnp.mean((vert_out - vertice) ** 2)
    jax.block_until_ready(loss)
    print("KERNEL_OK")
</pallas_src>

<mosaic_0001>
module attributes {stable_mosaic.version = 11 : i64} {
  func.func @fused_decoder_kernel(%arg0: memref<16x768xf32, #tpu.memory_space<vmem>>, %arg1: memref<16x24xf32, #tpu.memory_space<vmem>>, %arg2: memref<16x32xf32, #tpu.memory_space<vmem>>, %arg3: memref<16x128xf32, #tpu.memory_space<vmem>>, %arg4: memref<4x16x16xf32, #tpu.memory_space<vmem>>, %arg5: memref<24x32xf32, #tpu.memory_space<vmem>>, %arg6: memref<32x96xf32, #tpu.memory_space<vmem>>, %arg7: memref<1x96xf32, #tpu.memory_space<vmem>>, %arg8: memref<32x32xf32, #tpu.memory_space<vmem>>, %arg9: memref<1x32xf32, #tpu.memory_space<vmem>>, %arg10: memref<1x32xf32, #tpu.memory_space<vmem>>, %arg11: memref<1x32xf32, #tpu.memory_space<vmem>>, %arg12: memref<768x32xf32, #tpu.memory_space<vmem>>, %arg13: memref<1x32xf32, #tpu.memory_space<vmem>>, %arg14: memref<1x32xf32, #tpu.memory_space<vmem>>, %arg15: memref<1x32xf32, #tpu.memory_space<vmem>>, %arg16: memref<32x64xf32, #tpu.memory_space<vmem>>, %arg17: memref<1x64xf32, #tpu.memory_space<vmem>>, %arg18: memref<64x32xf32, #tpu.memory_space<vmem>>, %arg19: memref<1x32xf32, #tpu.memory_space<vmem>>, %arg20: memref<1x32xf32, #tpu.memory_space<vmem>>, %arg21: memref<1x32xf32, #tpu.memory_space<vmem>>, %arg22: memref<32x128xf32, #tpu.memory_space<vmem>>, %arg23: memref<16x128xf32, #tpu.memory_space<vmem>>) attributes {dimension_semantics = [], scalar_prefetch = 0 : i64, scratch_operands = 0 : i64, tpu.core_type = #tpu.core_type<tc>} {
    %c0 = arith.constant 0 : index
    %c0_0 = arith.constant 0 : index
    %0 = vector.load %arg1[%c0, %c0_0] : memref<16x24xf32, #tpu.memory_space<vmem>>, vector<16x24xf32>
    %c0_1 = arith.constant 0 : index
    %c0_2 = arith.constant 0 : index
    %1 = vector.load %arg5[%c0_1, %c0_2] : memref<24x32xf32, #tpu.memory_space<vmem>>, vector<24x32xf32>
    %cst = arith.constant dense<0.000000e+00> : vector<16x32xf32>
    %2 = tpu.matmul %0, %1, %cst {dimension_numbers = #tpu.dot_dimension_numbers<[1], [0], [0], [1], [0, 0, 1, 1], [], []>, precision = #tpu.contract_precision<fp32>} : vector<16x24xf32>, vector<24x32xf32>, vector<16x32xf32> -> vector<16x32xf32>
    %c0_3 = arith.constant 0 : index
    %c0_4 = arith.constant 0 : index
    %3 = vector.load %arg2[%c0_3, %c0_4] : memref<16x32xf32, #tpu.memory_space<vmem>>, vector<16x32xf32>
    %4 = arith.addf %2, %3 : vector<16x32xf32>
    %c0_5 = arith.constant 0 : index
    %c0_6 = arith.constant 0 : index
    %5 = vector.load %arg6[%c0_5, %c0_6] : memref<32x96xf32, #tpu.memory_space<vmem>>, vector<32x32xf32>
    %cst_7 = arith.constant dense<0.000000e+00> : vector<16x32xf32>
    %6 = tpu.matmul %4, %5, %cst_7 {dimension_numbers = #tpu.dot_dimension_numbers<[1], [0], [0], [1], [0, 0, 1, 1], [], []>, precision = #tpu.contract_precision<fp32>} : vector<16x32xf32>, vector<32x32xf32>, vector<16x32xf32> -> vector<16x32xf32>
    %c0_8 = arith.constant 0 : index
    %c0_9 = arith.constant 0 : index
    %7 = vector.load %arg7[%c0_8, %c0_9] : memref<1x96xf32, #tpu.memory_space<vmem>>, vector<1x32xf32>
    %8 = vector.broadcast %7 : vector<1x32xf32> to vector<16x32xf32>
    %9 = arith.addf %6, %8 : vector<16x32xf32>
    %c0_10 = arith.constant 0 : index
    %c32 = arith.constant 32 : index
    %10 = vector.load %arg6[%c0_10, %c32] : memref<32x96xf32, #tpu.memory_space<vmem>>, vector<32x32xf32>
    %cst_11 = arith.constant dense<0.000000e+00> : vector<16x32xf32>
    %11 = tpu.matmul %4, %10, %cst_11 {dimension_numbers = #tpu.dot_dimension_numbers<[1], [0], [0], [1], [0, 0, 1, 1], [], []>, precision = #tpu.contract_precision<fp32>} : vector<16x32xf32>, vector<32x32xf32>, vector<16x32xf32> -> vector<16x32xf32>
    %c0_12 = arith.constant 0 : index
    %c32_13 = arith.constant 32 : index
    %12 = vector.load %arg7[%c0_12, %c32_13] : memref<1x96xf32, #tpu.memory_space<vmem>>, vector<1x32xf32>
    %13 = vector.broadcast %12 : vector<1x32xf32> to vector<16x32xf32>
    %14 = arith.addf %11, %13 : vector<16x32xf32>
    %c0_14 = arith.constant 0 : index
    %c64 = arith.constant 64 : index
    %15 = vector.load %arg6[%c0_14, %c64] : memref<32x96xf32, #tpu.memory_space<vmem>>, vector<32x32xf32>
    %cst_15 = arith.constant dense<0.000000e+00> : vector<16x32xf32>
    %16 = tpu.matmul %4, %15, %cst_15 {dimension_numbers = #tpu.dot_dimension_numbers<[1], [0], [0], [1], [0, 0, 1, 1], [], []>, precision = #tpu.contract_precision<fp32>} : vector<16x32xf32>, vector<32x32xf32>, vector<16x32xf32> -> vector<16x32xf32>
    %c0_16 = arith.constant 0 : index
    %c64_17 = arith.constant 64 : index
    %17 = vector.load %arg7[%c0_16, %c64_17] : memref<1x96xf32, #tpu.memory_space<vmem>>, vector<1x32xf32>
    %18 = vector.broadcast %17 : vector<1x32xf32> to vector<16x32xf32>
    %19 = arith.addf %16, %18 : vector<16x32xf32>
    %cst_18 = arith.constant 0.000000e+00 : f32
    %20 = vector.broadcast %cst_18 : f32 to vector<16x32xf32>
    %21 = vector.extract_strided_slice %9 {offsets = [0, 0], sizes = [16, 8], strides = [1, 1]} : vector<16x32xf32> to vector<16x8xf32>
    %22 = vector.extract_strided_slice %14 {offsets = [0, 0], sizes = [16, 8], strides = [1, 1]} : vector<16x32xf32> to vector<16x8xf32>
    %23 = tpu.transpose %22, [1, 0] : vector<16x8xf32> -> vector<8x16xf32>
    %cst_19 = arith.constant dense<0.000000e+00> : vector<16x16xf32>
    %24 = tpu.matmul %21, %23, %cst_19 {dimension_numbers = #tpu.dot_dimension_numbers<[1], [0], [0], [1], [0, 0, 1, 1], [], []>, precision = #tpu.contract_precision<fp32>} : vector<16x8xf32>, vector<8x16xf32>, vector<16x16xf32> -> vector<16x16xf32>
    %cst_20 = arith.constant 0.353553385 : f32
    %25 = vector.broadcast %cst_20 : f32 to vector<16x16xf32>
    %26 = arith.mulf %24, %25 : vector<16x16xf32>
    %c0_21 = arith.constant 0 : index
    %c0_22 = arith.constant 0 : index
    %c0_23 = arith.constant 0 : index
    %27 = vector.load %arg4[%c0_21, %c0_22, %c0_23] : memref<4x16x16xf32, #tpu.memory_space<vmem>>, vector<1x16x16xf32>
    %28 = vector.shape_cast %27 : vector<1x16x16xf32> to vector<16x16xf32>
    %29 = arith.addf %26, %28 : vector<16x16xf32>
    %cst_24 = arith.constant dense<0xFF800000> : vector<16xf32>
    %30 = vector.multi_reduction <maximumf>, %29, %cst_24 [1] : vector<16x16xf32> to vector<16xf32>
    %31 = vector.shape_cast %30 : vector<16xf32> to vector<16x1xf32>
    %32 = vector.broadcast %31 : vector<16x1xf32> to vector<16x16xf32>
    %33 = arith.subf %29, %32 : vector<16x16xf32>
    %34 = math.exp %33 : vector<16x16xf32>
    %cst_25 = arith.constant dense<0.000000e+00> : vector<16xf32>
    %35 = vector.multi_reduction <add>, %34, %cst_25 [1] : vector<16x16xf32> to vector<16xf32>
    %36 = vector.shape_cast %35 : vector<16xf32> to vector<16x1xf32>
    %37 = tpu.reciprocal %36 : vector<16x1xf32> -> vector<16x1xf32>
    %38 = vector.broadcast %37 : vector<16x1xf32> to vector<16x16xf32>
    %39 = arith.mulf %34, %38 : vector<16x16xf32>
    %40 = vector.extract_strided_slice %19 {offsets = [0, 0], sizes = [16, 8], strides = [1, 1]} : vector<16x32xf32> to vector<16x8xf32>
    %cst_26 = arith.constant dense<0.000000e+00> : vector<16x8xf32>
    %41 = tpu.matmul %39, %40, %cst_26 {dimension_numbers = #tpu.dot_dimension_numbers<[1], [0], [0], [1], [0, 0, 1, 1], [], []>, precision = #tpu.contract_precision<fp32>} : vector<16x16xf32>, vector<16x8xf32>, vector<16x8xf32> -> vector<16x8xf32>
    %c0_27 = arith.constant 0 : index
    %c0_28 = arith.constant 0 : index
    %42 = vector.load %arg8[%c0_27, %c0_28] : memref<32x32xf32, #tpu.memory_space<vmem>>, vector<8x32xf32>
    %cst_29 = arith.constant dense<0.000000e+00> : vector<16x32xf32>
    %43 = tpu.matmul %41, %42, %cst_29 {dimension_numbers = #tpu.dot_dimension_numbers<[1], [0], [0], [1], [0, 0, 1, 1], [], []>, precision = #tpu.contract_precision<fp32>} : vector<16x8xf32>, vector<8x32xf32>, vector<16x32xf32> -> vector<16x32xf32>
    %44 = arith.addf %20, %43 : vector<16x32xf32>
    %45 = vector.extract_strided_slice %9 {offsets = [0, 8], sizes = [16, 8], strides = [1, 1]} : vector<16x32xf32> to vector<16x8xf32>
    %46 = vector.extract_strided_slice %14 {offsets = [0, 8], sizes = [16, 8], strides = [1, 1]} : vector<16x32xf32> to vector<16x8xf32>
    %47 = tpu.transpose %46, [1, 0] : vector<16x8xf32> -> vector<8x16xf32>
    %cst_30 = arith.constant dense<0.000000e+00> : vector<16x16xf32>
    %48 = tpu.matmul %45, %47, %cst_30 {dimension_numbers = #tpu.dot_dimension_numbers<[1], [0], [0], [1], [0, 0, 1, 1], [], []>, precision = #tpu.contract_precision<fp32>} : vector<16x8xf32>, vector<8x16xf32>, vector<16x16xf32> -> vector<16x16xf32>
    %cst_31 = arith.constant 0.353553385 : f32
    %49 = vector.broadcast %cst_31 : f32 to vector<16x16xf32>
    %50 = arith.mulf %48, %49 : vector<16x16xf32>
    %c1 = arith.constant 1 : index
    %c0_32 = arith.constant 0 : index
    %c0_33 = arith.constant 0 : index
    %51 = vector.load %arg4[%c1, %c0_32, %c0_33] : memref<4x16x16xf32, #tpu.memory_space<vmem>>, vector<1x16x16xf32>
    %52 = vector.shape_cast %51 : vector<1x16x16xf32> to vector<16x16xf32>
    %53 = arith.addf %50, %52 : vector<16x16xf32>
    %cst_34 = arith.constant dense<0xFF800000> : vector<16xf32>
    %54 = vector.multi_reduction <maximumf>, %53, %cst_34 [1] : vector<16x16xf32> to vector<16xf32>
    %55 = vector.shape_cast %54 : vector<16xf32> to vector<16x1xf32>
    %56 = vector.broadcast %55 : vector<16x1xf32> to vector<16x16xf32>
    %57 = arith.subf %53, %56 : vector<16x16xf32>
    %58 = math.exp %57 : vector<16x16xf32>
    %cst_35 = arith.constant dense<0.000000e+00> : vector<16xf32>
    %59 = vector.multi_reduction <add>, %58, %cst_35 [1] : vector<16x16xf32> to vector<16xf32>
    %60 = vector.shape_cast %59 : vector<16xf32> to vector<16x1xf32>
    %61 = tpu.reciprocal %60 : vector<16x1xf32> -> vector<16x1xf32>
    %62 = vector.broadcast %61 : vector<16x1xf32> to vector<16x16xf32>
    %63 = arith.mulf %58, %62 : vector<16x16xf32>
    %64 = vector.extract_strided_slice %19 {offsets = [0, 8], sizes = [16, 8], strides = [1, 1]} : vector<16x32xf32> to vector<16x8xf32>
    %cst_36 = arith.constant dense<0.000000e+00> : vector<16x8xf32>
    %65 = tpu.matmul %63, %64, %cst_36 {dimension_numbers = #tpu.dot_dimension_numbers<[1], [0], [0], [1], [0, 0, 1, 1], [], []>, precision = #tpu.contract_precision<fp32>} : vector<16x16xf32>, vector<16x8xf32>, vector<16x8xf32> -> vector<16x8xf32>
    %c8 = arith.constant 8 : index
    %c0_37 = arith.constant 0 : index
    %66 = vector.load %arg8[%c8, %c0_37] : memref<32x32xf32, #tpu.memory_space<vmem>>, vector<8x32xf32>
    %cst_38 = arith.constant dense<0.000000e+00> : vector<16x32xf32>
    %67 = tpu.matmul %65, %66, %cst_38 {dimension_numbers = #tpu.dot_dimension_numbers<[1], [0], [0], [1], [0, 0, 1, 1], [], []>, precision = #tpu.contract_precision<fp32>} : vector<16x8xf32>, vector<8x32xf32>, vector<16x32xf32> -> vector<16x32xf32>
    %68 = arith.addf %44, %67 : vector<16x32xf32>
    %69 = vector.extract_strided_slice %9 {offsets = [0, 16], sizes = [16, 8], strides = [1, 1]} : vector<16x32xf32> to vector<16x8xf32>
    %70 = vector.extract_strided_slice %14 {offsets = [0, 16], sizes = [16, 8], strides = [1, 1]} : vector<16x32xf32> to vector<16x8xf32>
    %71 = tpu.transpose %70, [1, 0] : vector<16x8xf32> -> vector<8x16xf32>
    %cst_39 = arith.constant dense<0.000000e+00> : vector<16x16xf32>
    %72 = tpu.matmul %69, %71, %cst_39 {dimension_numbers = #tpu.dot_dimension_numbers<[1], [0], [0], [1], [0, 0, 1, 1], [], []>, precision = #tpu.contract_precision<fp32>} : vector<16x8xf32>, vector<8x16xf32>, vector<16x16xf32> -> vector<16x16xf32>
    %cst_40 = arith.constant 0.353553385 : f32
    %73 = vector.broadcast %cst_40 : f32 to vector<16x16xf32>
    %74 = arith.mulf %72, %73 : vector<16x16xf32>
    %c2 = arith.constant 2 : index
    %c0_41 = arith.constant 0 : index
    %c0_42 = arith.constant 0 : index
    %75 = vector.load %arg4[%c2, %c0_41, %c0_42] : memref<4x16x16xf32, #tpu.memory_space<vmem>>, vector<1x16x16xf32>
    %76 = vector.shape_cast %75 : vector<1x16x16xf32> to vector<16x16xf32>
    %77 = arith.addf %74, %76 : vector<16x16xf32>
    %cst_43 = arith.constant dense<0xFF800000> : vector<16xf32>
    %78 = vector.multi_reduction <maximumf>, %77, %cst_43 [1] : vector<16x16xf32> to vector<16xf32>
    %79 = vector.shape_cast %78 : vector<16xf32> to vector<16x1xf32>
    %80 = vector.broadcast %79 : vector<16x1xf32> to vector<16x16xf32>
    %81 = arith.subf %77, %80 : vector<16x16xf32>
    %82 = math.exp %81 : vector<16x16xf32>
    %cst_44 = arith.constant dense<0.000000e+00> : vector<16xf32>
    %83 = vector.multi_reduction <add>, %82, %cst_44 [1] : vector<16x16xf32> to vector<16xf32>
    %84 = vector.shape_cast %83 : vector<16xf32> to vector<16x1xf32>
    %85 = tpu.reciprocal %84 : vector<16x1xf32> -> vector<16x1xf32>
    %86 = vector.broadcast %85 : vector<16x1xf32> to vector<16x16xf32>
    %87 = arith.mulf %82, %86 : vector<16x16xf32>
    %88 = vector.extract_strided_slice %19 {offsets = [0, 16], sizes = [16, 8], strides = [1, 1]} : vector<16x32xf32> to vector<16x8xf32>
    %cst_45 = arith.constant dense<0.000000e+00> : vector<16x8xf32>
    %89 = tpu.matmul %87, %88, %cst_45 {dimension_numbers = #tpu.dot_dimension_numbers<[1], [0], [0], [1], [0, 0, 1, 1], [], []>, precision = #tpu.contract_precision<fp32>} : vector<16x16xf32>, vector<16x8xf32>, vector<16x8xf32> -> vector<16x8xf32>
    %c16 = arith.constant 16 : index
    %c0_46 = arith.constant 0 : index
    %90 = vector.load %arg8[%c16, %c0_46] : memref<32x32xf32, #tpu.memory_space<vmem>>, vector<8x32xf32>
    %cst_47 = arith.constant dense<0.000000e+00> : vector<16x32xf32>
    %91 = tpu.matmul %89, %90, %cst_47 {dimension_numbers = #tpu.dot_dimension_numbers<[1], [0], [0], [1], [0, 0, 1, 1], [], []>, precision = #tpu.contract_precision<fp32>} : vector<16x8xf32>, vector<8x32xf32>, vector<16x32xf32> -> vector<16x32xf32>
    %92 = arith.addf %68, %91 : vector<16x32xf32>
    %93 = vector.extract_strided_slice %9 {offsets = [0, 24], sizes = [16, 8], strides = [1, 1]} : vector<16x32xf32> to vector<16x8xf32>
    %94 = vector.extract_strided_slice %14 {offsets = [0, 24], sizes = [16, 8], strides = [1, 1]} : vector<16x32xf32> to vector<16x8xf32>
    %95 = tpu.transpose %94, [1, 0] : vector<16x8xf32> -> vector<8x16xf32>
    %cst_48 = arith.constant dense<0.000000e+00> : vector<16x16xf32>
    %96 = tpu.matmul %93, %95, %cst_48 {dimension_numbers = #tpu.dot_dimension_numbers<[1], [0], [0], [1], [0, 0, 1, 1], [], []>, precision = #tpu.contract_precision<fp32>} : vector<16x8xf32>, vector<8x16xf32>, vector<16x16xf32> -> vector<16x16xf32>
    %cst_49 = arith.constant 0.353553385 : f32
    %97 = vector.broadcast %cst_49 : f32 to vector<16x16xf32>
    %98 = arith.mulf %96, %97 : vector<16x16xf32>
    %c3 = arith.constant 3 : index
    %c0_50 = arith.constant 0 : index
    %c0_51 = arith.constant 0 : index
    %99 = vector.load %arg4[%c3, %c0_50, %c0_51] : memref<4x16x16xf32, #tpu.memory_space<vmem>>, vector<1x16x16xf32>
    %100 = vector.shape_cast %99 : vector<1x16x16xf32> to vector<16x16xf32>
    %101 = arith.addf %98, %100 : vector<16x16xf32>
    %cst_52 = arith.constant dense<0xFF800000> : vector<16xf32>
    %102 = vector.multi_reduction <maximumf>, %101, %cst_52 [1] : vector<16x16xf32> to vector<16xf32>
    %103 = vector.shape_cast %102 : vector<16xf32> to vector<16x1xf32>
    %104 = vector.broadcast %103 : vector<16x1xf32> to vector<16x16xf32>
    %105 = arith.subf %101, %104 : vector<16x16xf32>
    %106 = math.exp %105 : vector<16x16xf32>
    %cst_53 = arith.constant dense<0.000000e+00> : vector<16xf32>
    %107 = vector.multi_reduction <add>, %106, %cst_53 [1] : vector<16x16xf32> to vector<16xf32>
    %108 = vector.shape_cast %107 : vector<16xf32> to vector<16x1xf32>
    %109 = tpu.reciprocal %108 : vector<16x1xf32> -> vector<16x1xf32>
    %110 = vector.broadcast %109 : vector<16x1xf32> to vector<16x16xf32>
    %111 = arith.mulf %106, %110 : vector<16x16xf32>
    %112 = vector.extract_strided_slice %19 {offsets = [0, 24], sizes = [16, 8], strides = [1, 1]} : vector<16x32xf32> to vector<16x8xf32>
    %cst_54 = arith.constant dense<0.000000e+00> : vector<16x8xf32>
    %113 = tpu.matmul %111, %112, %cst_54 {dimension_numbers = #tpu.dot_dimension_numbers<[1], [0], [0], [1], [0, 0, 1, 1], [], []>, precision = #tpu.contract_precision<fp32>} : vector<16x16xf32>, vector<16x8xf32>, vector<16x8xf32> -> vector<16x8xf32>
    %c24 = arith.constant 24 : index
    %c0_55 = arith.constant 0 : index
    %114 = vector.load %arg8[%c24, %c0_55] : memref<32x32xf32, #tpu.memory_space<vmem>>, vector<8x32xf32>
    %cst_56 = arith.constant dense<0.000000e+00> : vector<16x32xf32>
    %115 = tpu.matmul %113, %114, %cst_56 {dimension_numbers = #tpu.dot_dimension_numbers<[1], [0], [0], [1], [0, 0, 1, 1], [], []>, precision = #tpu.contract_precision<fp32>} : vector<16x8xf32>, vector<8x32xf32>, vector<16x32xf32> -> vector<16x32xf32>
    %116 = arith.addf %92, %115 : vector<16x32xf32>
    %117 = arith.addf %4, %116 : vector<16x32xf32>
    %c0_57 = arith.constant 0 : index
    %c0_58 = arith.constant 0 : index
    %118 = vector.load %arg9[%c0_57, %c0_58] : memref<1x32xf32, #tpu.memory_space<vmem>>, vector<1x32xf32>
    %119 = vector.broadcast %118 : vector<1x32xf32> to vector<16x32xf32>
    %120 = arith.addf %117, %119 : vector<16x32xf32>
    %cst_59 = arith.constant dense<0.000000e+00> : vector<16xf32>
    %121 = vector.multi_reduction <add>, %120, %cst_59 [1] : vector<16x32xf32> to vector<16xf32>
    %122 = vector.shape_cast %121 : vector<16xf32> to vector<16x1xf32>
    %cst_60 = arith.constant 3.200000e+01 : f32
    %123 = vector.broadcast %cst_60 : f32 to vector<16x1xf32>
    %124 = arith.divf %122, %123 : vector<16x1xf32>
    %125 = vector.broadcast %124 : vector<16x1xf32> to vector<16x32xf32>
    %126 = arith.subf %120, %125 : vector<16x32xf32>
    %127 = arith.mulf %126, %126 : vector<16x32xf32>
    %cst_61 = arith.constant dense<0.000000e+00> : vector<16xf32>
    %128 = vector.multi_reduction <add>, %127, %cst_61 [1] : vector<16x32xf32> to vector<16xf32>
    %129 = vector.shape_cast %128 : vector<16xf32> to vector<16x1xf32>
    %cst_62 = arith.constant 3.200000e+01 : f32
    %130 = vector.broadcast %cst_62 : f32 to vector<16x1xf32>
    %131 = arith.divf %129, %130 : vector<16x1xf32>
    %132 = vector.broadcast %124 : vector<16x1xf32> to vector<16x32xf32>
    %133 = arith.subf %120, %132 : vector<16x32xf32>
    %cst_63 = arith.constant 9.99999974E-6 : f32
    %134 = vector.broadcast %cst_63 : f32 to vector<16x1xf32>
    %135 = arith.addf %131, %134 : vector<16x1xf32>
    %136 = math.rsqrt %135 : vector<16x1xf32>
    %137 = vector.broadcast %136 : vector<16x1xf32> to vector<16x32xf32>
    %138 = arith.mulf %133, %137 : vector<16x32xf32>
    %c0_64 = arith.constant 0 : index
    %c0_65 = arith.constant 0 : index
    %139 = vector.load %arg10[%c0_64, %c0_65] : memref<1x32xf32, #tpu.memory_space<vmem>>, vector<1x32xf32>
    %140 = vector.broadcast %139 : vector<1x32xf32> to vector<16x32xf32>
    %141 = arith.mulf %138, %140 : vector<16x32xf32>
    %c0_66 = arith.constant 0 : index
    %c0_67 = arith.constant 0 : index
    %142 = vector.load %arg11[%c0_66, %c0_67] : memref<1x32xf32, #tpu.memory_space<vmem>>, vector<1x32xf32>
    %143 = vector.broadcast %142 : vector<1x32xf32> to vector<16x32xf32>
    %144 = arith.addf %141, %143 : vector<16x32xf32>
    %c0_68 = arith.constant 0 : index
    %c0_69 = arith.constant 0 : index
    %145 = vector.load %arg0[%c0_68, %c0_69] : memref<16x768xf32, #tpu.memory_space<vmem>>, vector<16x768xf32>
    %c0_70 = arith.constant 0 : index
    %c0_71 = arith.constant 0 : index
    %146 = vector.load %arg12[%c0_70, %c0_71] : memref<768x32xf32, #tpu.memory_space<vmem>>, vector<768x32xf32>
    %cst_72 = arith.constant dense<0.000000e+00> : vector<16x32xf32>
    %147 = tpu.matmul %145, %146, %cst_72 {dimension_numbers = #tpu.dot_dimension_numbers<[1], [0], [0], [1], [0, 0, 1, 1], [], []>, precision = #tpu.contract_precision<fp32>} : vector<16x768xf32>, vector<768x32xf32>, vector<16x32xf32> -> vector<16x32xf32>
    %c0_73 = arith.constant 0 : index
    %c0_74 = arith.constant 0 : index
    %148 = vector.load %arg13[%c0_73, %c0_74] : memref<1x32xf32, #tpu.memory_space<vmem>>, vector<1x32xf32>
    %149 = vector.broadcast %148 : vector<1x32xf32> to vector<16x32xf32>
    %150 = arith.addf %147, %149 : vector<16x32xf32>
    %151 = arith.addf %144, %150 : vector<16x32xf32>
    %cst_75 = arith.constant dense<0.000000e+00> : vector<16xf32>
    %152 = vector.multi_reduction <add>, %151, %cst_75 [1] : vector<16x32xf32> to vector<16xf32>
    %153 = vector.shape_cast %152 : vector<16xf32> to vector<16x1xf32>
    %cst_76 = arith.constant 3.200000e+01 : f32
    %154 = vector.broadcast %cst_76 : f32 to vector<16x1xf32>
    %155 = arith.divf %153, %154 : vector<16x1xf32>
    %156 = vector.broadcast %155 : vector<16x1xf32> to vector<16x32xf32>
    %157 = arith.subf %151, %156 : vector<16x32xf32>
    %158 = arith.mulf %157, %157 : vector<16x32xf32>
    %cst_77 = arith.constant dense<0.000000e+00> : vector<16xf32>
    %159 = vector.multi_reduction <add>, %158, %cst_77 [1] : vector<16x32xf32> to vector<16xf32>
    %160 = vector.shape_cast %159 : vector<16xf32> to vector<16x1xf32>
    %cst_78 = arith.constant 3.200000e+01 : f32
    %161 = vector.broadcast %cst_78 : f32 to vector<16x1xf32>
    %162 = arith.divf %160, %161 : vector<16x1xf32>
    %163 = vector.broadcast %155 : vector<16x1xf32> to vector<16x32xf32>
    %164 = arith.subf %151, %163 : vector<16x32xf32>
    %cst_79 = arith.constant 9.99999974E-6 : f32
    %165 = vector.broadcast %cst_79 : f32 to vector<16x1xf32>
    %166 = arith.addf %162, %165 : vector<16x1xf32>
    %167 = math.rsqrt %166 : vector<16x1xf32>
    %168 = vector.broadcast %167 : vector<16x1xf32> to vector<16x32xf32>
    %169 = arith.mulf %164, %168 : vector<16x32xf32>
    %c0_80 = arith.constant 0 : index
    %c0_81 = arith.constant 0 : index
    %170 = vector.load %arg14[%c0_80, %c0_81] : memref<1x32xf32, #tpu.memory_space<vmem>>, vector<1x32xf32>
    %171 = vector.broadcast %170 : vector<1x32xf32> to vector<16x32xf32>
    %172 = arith.mulf %169, %171 : vector<16x32xf32>
    %c0_82 = arith.constant 0 : index
    %c0_83 = arith.constant 0 : index
    %173 = vector.load %arg15[%c0_82, %c0_83] : memref<1x32xf32, #tpu.memory_space<vmem>>, vector<1x32xf32>
    %174 = vector.broadcast %173 : vector<1x32xf32> to vector<16x32xf32>
    %175 = arith.addf %172, %174 : vector<16x32xf32>
    %c0_84 = arith.constant 0 : index
    %c0_85 = arith.constant 0 : index
    %176 = vector.load %arg16[%c0_84, %c0_85] : memref<32x64xf32, #tpu.memory_space<vmem>>, vector<32x64xf32>
    %cst_86 = arith.constant dense<0.000000e+00> : vector<16x64xf32>
    %177 = tpu.matmul %175, %176, %cst_86 {dimension_numbers = #tpu.dot_dimension_numbers<[1], [0], [0], [1], [0, 0, 1, 1], [], []>, precision = #tpu.contract_precision<fp32>} : vector<16x32xf32>, vector<32x64xf32>, vector<16x64xf32> -> vector<16x64xf32>
    %c0_87 = arith.constant 0 : index
    %c0_88 = arith.constant 0 : index
    %178 = vector.load %arg17[%c0_87, %c0_88] : memref<1x64xf32, #tpu.memory_space<vmem>>, vector<1x64xf32>
    %179 = vector.broadcast %178 : vector<1x64xf32> to vector<16x64xf32>
    %180 = arith.addf %177, %179 : vector<16x64xf32>
    %cst_89 = arith.constant 0.000000e+00 : f32
    %181 = vector.broadcast %cst_89 : f32 to vector<16x64xf32>
    %182 = arith.maximumf %180, %181 : vector<16x64xf32>
    %c0_90 = arith.constant 0 : index
    %c0_91 = arith.constant 0 : index
    %183 = vector.load %arg18[%c0_90, %c0_91] : memref<64x32xf32, #tpu.memory_space<vmem>>, vector<64x32xf32>
    %cst_92 = arith.constant dense<0.000000e+00> : vector<16x32xf32>
    %184 = tpu.matmul %182, %183, %cst_92 {dimension_numbers = #tpu.dot_dimension_numbers<[1], [0], [0], [1], [0, 0, 1, 1], [], []>, precision = #tpu.contract_precision<fp32>} : vector<16x64xf32>, vector<64x32xf32>, vector<16x32xf32> -> vector<16x32xf32>
    %c0_93 = arith.constant 0 : index
    %c0_94 = arith.constant 0 : index
    %185 = vector.load %arg19[%c0_93, %c0_94] : memref<1x32xf32, #tpu.memory_space<vmem>>, vector<1x32xf32>
    %186 = vector.broadcast %185 : vector<1x32xf32> to vector<16x32xf32>
    %187 = arith.addf %184, %186 : vector<16x32xf32>
    %188 = arith.addf %175, %187 : vector<16x32xf32>
    %cst_95 = arith.constant dense<0.000000e+00> : vector<16xf32>
    %189 = vector.multi_reduction <add>, %188, %cst_95 [1] : vector<16x32xf32> to vector<16xf32>
    %190 = vector.shape_cast %189 : vector<16xf32> to vector<16x1xf32>
    %cst_96 = arith.constant 3.200000e+01 : f32
    %191 = vector.broadcast %cst_96 : f32 to vector<16x1xf32>
    %192 = arith.divf %190, %191 : vector<16x1xf32>
    %193 = vector.broadcast %192 : vector<16x1xf32> to vector<16x32xf32>
    %194 = arith.subf %188, %193 : vector<16x32xf32>
    %195 = arith.mulf %194, %194 : vector<16x32xf32>
    %cst_97 = arith.constant dense<0.000000e+00> : vector<16xf32>
    %196 = vector.multi_reduction <add>, %195, %cst_97 [1] : vector<16x32xf32> to vector<16xf32>
    %197 = vector.shape_cast %196 : vector<16xf32> to vector<16x1xf32>
    %cst_98 = arith.constant 3.200000e+01 : f32
    %198 = vector.broadcast %cst_98 : f32 to vector<16x1xf32>
    %199 = arith.divf %197, %198 : vector<16x1xf32>
    %200 = vector.broadcast %192 : vector<16x1xf32> to vector<16x32xf32>
    %201 = arith.subf %188, %200 : vector<16x32xf32>
    %cst_99 = arith.constant 9.99999974E-6 : f32
    %202 = vector.broadcast %cst_99 : f32 to vector<16x1xf32>
    %203 = arith.addf %199, %202 : vector<16x1xf32>
    %204 = math.rsqrt %203 : vector<16x1xf32>
    %205 = vector.broadcast %204 : vector<16x1xf32> to vector<16x32xf32>
    %206 = arith.mulf %201, %205 : vector<16x32xf32>
    %c0_100 = arith.constant 0 : index
    %c0_101 = arith.constant 0 : index
    %207 = vector.load %arg20[%c0_100, %c0_101] : memref<1x32xf32, #tpu.memory_space<vmem>>, vector<1x32xf32>
    %208 = vector.broadcast %207 : vector<1x32xf32> to vector<16x32xf32>
    %209 = arith.mulf %206, %208 : vector<16x32xf32>
    %c0_102 = arith.constant 0 : index
    %c0_103 = arith.constant 0 : index
    %210 = vector.load %arg21[%c0_102, %c0_103] : memref<1x32xf32, #tpu.memory_space<vmem>>, vector<1x32xf32>
    %211 = vector.broadcast %210 : vector<1x32xf32> to vector<16x32xf32>
    %212 = arith.addf %209, %211 : vector<16x32xf32>
    %c0_104 = arith.constant 0 : index
    %c0_105 = arith.constant 0 : index
    %213 = vector.load %arg22[%c0_104, %c0_105] : memref<32x128xf32, #tpu.memory_space<vmem>>, vector<32x128xf32>
    %cst_106 = arith.constant dense<0.000000e+00> : vector<16x128xf32>
    %214 = tpu.matmul %212, %213, %cst_106 {dimension_numbers = #tpu.dot_dimension_numbers<[1], [0], [0], [1], [0, 0, 1, 1], [], []>, precision = #tpu.contract_precision<fp32>} : vector<16x32xf32>, vector<32x128xf32>, vector<16x128xf32> -> vector<16x128xf32>
    %c0_107 = arith.constant 0 : index
    %c0_108 = arith.constant 0 : index
    %215 = vector.load %arg3[%c0_107, %c0_108] : memref<16x128xf32, #tpu.memory_space<vmem>>, vector<16x128xf32>
    %216 = arith.addf %214, %215 : vector<16x128xf32>
    %c0_109 = arith.constant 0 : index
    %c0_110 = arith.constant 0 : index
    %217 = vector.load %arg23[%c0_109, %c0_110] : memref<16x128xf32, #tpu.memory_space<vmem>>, vector<16x128xf32>
    tpu.vector_store %arg23[%c0_109, %c0_110], %216 {strides = array<i32>} : memref<16x128xf32, #tpu.memory_space<vmem>>, vector<16x128xf32>,
    return
  }
}

</mosaic_0001>

<bundles_post_ra>
// kernel: face_former_forward.1
= control target key start
LH: loop header
LB: loop body
LE: loop exit
PB: predicated region body
PF: predicated region fallthrough
CT: control target
= control target key end

     0   :  { %vm81_vm0 = vcmask 195584   ;;  %s6933_s25 = smov 64   ;;  %vm299_vm1 = vcmask 261120   ;;  %vm988_vm2 = vcmask 64512   ;;  %vm1197_vm3 = vcmask 130048   ;;  %s6935_s28 = smov 112   ;;  %s9996_s5 = inlined_call_operand.vmem [shape: f32[24,32], index: 5, kind: input, shape index: {}]   ;;  %s9997_s1 = inlined_call_operand.vmem [shape: f32[16,24], index: 1, kind: input, shape index: {}]   ;;  %s9998_s6 = inlined_call_operand.vmem [shape: f32[32,96], index: 6, kind: input, shape index: {}]   ;;  %s9999_s7 = inlined_call_operand.vmem [shape: f32[1,96], index: 7, kind: input, shape index: {}]   ;;  %s10000_s2 = inlined_call_operand.vmem [shape: f32[16,32], index: 2, kind: input, shape index: {}]   ;;  %s10001_s4 = inlined_call_operand.vmem [shape: f32[4,16,16], index: 4, kind: input, shape index: {}]   ;;  %s10002_s8 = inlined_call_operand.vmem [shape: f32[32,32], index: 8, kind: input, shape index: {}]   ;;  %s10003_s12 = inlined_call_operand.vmem [shape: f32[768,32], index: 12, kind: input, shape index: {}]   ;;  %s10004_s0 = inlined_call_operand.vmem [shape: f32[16,768], index: 0, kind: input, shape index: {}]   ;;  %s10005_s9 = inlined_call_operand.vmem [shape: f32[1,32], index: 9, kind: input, shape index: {}]   ;;  %s10006_s13 = inlined_call_operand.vmem [shape: f32[1,32], index: 13, kind: input, shape index: {}]   ;;  %s10007_s10 = inlined_call_operand.vmem [shape: f32[1,32], index: 10, kind: input, shape index: {}]   ;;  %s10008_s11 = inlined_call_operand.vmem [shape: f32[1,32], index: 11, kind: input, shape index: {}]   ;;  %s10009_s14 = inlined_call_operand.vmem [shape: f32[1,32], index: 14, kind: input, shape index: {}]   ;;  %s10010_s15 = inlined_call_operand.vmem [shape: f32[1,32], index: 15, kind: input, shape index: {}]   ;;  %s10011_s16 = inlined_call_operand.vmem [shape: f32[32,64], index: 16, kind: input, shape index: {}]   ;;  %s10012_s17 = inlined_call_operand.vmem [shape: f32[1,64], index: 17, kind: input, shape index: {}]   ;;  %s10013_s18 = inlined_call_operand.vmem [shape: f32[64,32], index: 18, kind: input, shape index: {}]   ;;  %s10014_s19 = inlined_call_operand.vmem [shape: f32[1,32], index: 19, kind: input, shape index: {}]   ;;  %s10015_s20 = inlined_call_operand.vmem [shape: f32[1,32], index: 20, kind: input, shape index: {}]   ;;  %s10016_s21 = inlined_call_operand.vmem [shape: f32[1,32], index: 21, kind: input, shape index: {}]   ;;  %s10017_s22 = inlined_call_operand.vmem [shape: f32[32,128], index: 22, kind: input, shape index: {}]   ;;  %s10018_s3 = inlined_call_operand.vmem [shape: f32[16,128], index: 3, kind: input, shape index: {}]   ;;  %s10019_s23 = inlined_call_operand.vmem [shape: f32[16,128], index: 23, kind: output, shape index: {}]  }
   0x1   :  { %10079 = sst [smem:[#allocation32_spill]] %s9996_s5 }
   0x2   :  { %10080 = sst [smem:[#allocation33_spill]] %s9997_s1 }
   0x3   :  { %10081 = sst [smem:[#allocation34_spill]] %s9998_s6  ;;  %s6934_s6 = smov 120  }
   0x4   :  { %10082 = sst [smem:[#allocation35_spill]] %s9999_s7 }
   0x5   :  { %10083 = sst [smem:[#allocation36_spill]] %s10000_s2  ;;  %s6932_s2 = smov 96  }
   0x6   :  { %10084 = sst [smem:[#allocation37_spill]] %s10001_s4 }
   0x7   :  { %10085 = sst [smem:[#allocation38_spill]] %s10002_s8 }
   0x8   :  { %10086 = sst [smem:[#allocation39_spill]] %s10003_s12 }
   0x9   :  { %s10087_s24 = sld [smem:[#allocation32_spill]] }
   0xa   :  { %s10088_s27 = sld [smem:[#allocation33_spill]] }
   0xb   :  { %s10089_s5 = sld [smem:[#allocation34_spill]] }
   0xc   :  { %s10090_s12 = sld [smem:[#allocation36_spill]] }
   0xd   :  { %s10093_s30 = sld [smem:[#allocation35_spill]] }
   0xe   :  { %s10094_s4 = sld [smem:[#allocation37_spill]] }
   0xf   :  { %v78_v0 = vld [vmem:[%s10087_s24 + $0x10] sm:$0xff]  ;;  %v77_v1 = vld [vmem:[%s10087_s24 + $0x8] sm:$0xff]  ;;  %v76_v2 = vld [vmem:[%s10087_s24] sm:$0xff] }
  0x10   :  { %v7067_v3 = vand.u32 4294901760, %v78_v0  ;;  %v7069_v4 = vand.u32 4294901760, %v77_v1  ;;  %v7071_v5 = vand.u32 4294901760, %v76_v2  ;;  %v75_v6 = vld [vmem:[%s10088_s27 + $0x8] sm:$0xff]  ;;  %v74_v7 = vld [vmem:[%s10088_s27] sm:$0xff] }
  0x11   :  { %v294_v8 = vld [vmem:[%s10089_s5 + $0x18] sm:$0xff]  ;;  %v86_v9 = vsel %vm81_vm0, %v75_v6, 0  ;;  %v83_v10 = vsel %vm81_vm0, %v74_v7, 0  ;;  %v7086_v11 = vld [vmem:[%s10089_s5 + $0x8] sm:$0xff]  ;;  %v293_v34 = vld [vmem:[%s10089_s5 + $0x10] sm:$0xff] }
  0x12   :  { %532 = vrot.lane.b32.xlu0 %v294_v8, %s6932_s2  ;;  %6863 = vmatpush.msra.mxu2 %v7067_v3  ;;  %v138_v12 = vsub.f32 %v78_v0, %v7067_v3  ;;  %v7090_v13 = vand.u32 4294901760, %v86_v9  ;;  %v144_v14 = vsub.f32 %v77_v1, %v7069_v4  ;;  %v150_v15 = vsub.f32 %v76_v2, %v7071_v5  ;;  %v291_v36 = vld [vmem:[%s10089_s5] sm:$0xff]  ;;  %s10097_s5 = sld [smem:[#allocation38_spill]] }
  0x13   :  { %102 = vmatpush.msra.mxu0 %v7067_v3  ;;  %v7095_v16 = vand.u32 4294901760, %v83_v10  ;;  %528 = vrot.lane.b32.xlu1 %v7086_v11, %s6932_s2  ;;  %v7115_v35 = vand.u32 4294901760, %v294_v8  ;;  %v7124_v37 = vand.u32 4294901760, %v293_v34  ;;  %v7131_v39 = vand.u32 4294901760, %v7086_v11 }
  0x14   :  { %763 = vrot.lane.b32.xlu2 %v294_v8, %s6933_s25  ;;  %6864 = vmatpush.msra.mxu2 %v7069_v4  ;;  %v139_v17 = vand.u32 4294901760, %v138_v12  ;;  %v7102_v18 = vsub.f32 %v86_v9, %v7090_v13  ;;  %v145_v19 = vand.u32 4294901760, %v144_v14  ;;  %v151_v20 = vand.u32 4294901760, %v150_v15 }
  0x15   :  { %104 = vmatpush.msra.mxu0 %v7069_v4  ;;  %v108_v21 = vsub.f32 %v83_v10, %v7095_v16  ;;  %v356_v38 = vsub.f32 %v294_v8, %v7115_v35  ;;  %v362_v40 = vsub.f32 %v293_v34, %v7124_v37  ;;  %v7137_v41 = vand.u32 4294901760, %v291_v36  ;;  %v79_v10 = vld [vmem:[%s10090_s12] sm:$0xff] }
  0x16   :  { %6865 = vmatpush.msra.mxu2 %v7071_v5  ;;  %v140_v22 = vsub.f32 %v138_v12, %v139_v17  ;;  %v117_v23 = vand.u32 4294901760, %v7102_v18  ;;  %v146_v24 = vsub.f32 %v144_v14, %v145_v19  ;;  %v152_v25 = vsub.f32 %v150_v15, %v151_v20 }
  0x17   :  { %106 = vmatpush.msra.mxu0 %v7071_v5  ;;  %v109_v26 = vand.u32 4294901760, %v108_v21  ;;  %v368_v42 = vsub.f32 %v7086_v11, %v7131_v39  ;;  %v374_v43 = vsub.f32 %v291_v36, %v7137_v41  ;;  %v357_v44 = vand.u32 4294901760, %v356_v38 }
  0x18   :  { %179 = vmatpush.msrb.mxu2 %v138_v12  ;;  %v141_v27 = vand.u32 4294901760, %v140_v22  ;;  %v118_v28 = vsub.f32 %v7102_v18, %v117_v23  ;;  %v147_v29 = vand.u32 4294901760, %v146_v24  ;;  %v153_v32 = vand.u32 4294901760, %v152_v25  ;;  %v80_v24 = vld [vmem:[%s10090_s12 + $0x8] sm:$0xff] }
  0x19   :  { %245 = vmatpush.msrb.mxu0 %v139_v17  ;;  %v110_v30 = vsub.f32 %v108_v21, %v109_v26  ;;  %v358_v45 = vsub.f32 %v356_v38, %v357_v44  ;;  %v363_v46 = vand.u32 4294901760, %v362_v40  ;;  %v369_v51 = vand.u32 4294901760, %v368_v42 }
  0x1a   :  { %182 = vmatpush.msrb.mxu2 %v144_v14  ;;  %6866 = vmatpush.msra.mxu3 %v141_v27  ;;  %v119_v31 = vand.u32 4294901760, %v118_v28  ;;  %v375_v55 = vand.u32 4294901760, %v374_v43 }
  0x1b   :  { %249 = vmatpush.msrb.mxu0 %v145_v19  ;;  %142 = vmatpush.msra.mxu1 %v141_v27  ;;  %v111_v33 = vand.u32 4294901760, %v110_v30  ;;  %v359_v49 = vand.u32 4294901760, %v358_v45  ;;  %v364_v50 = vsub.f32 %v362_v40, %v363_v46  ;;  %v370_v54 = vsub.f32 %v368_v42, %v369_v51 }
  0x1c   :  { %185 = vmatpush.msrb.mxu2 %v150_v15  ;;  %6867 = vmatpush.msra.mxu3 %v147_v29  ;;  %v376_v59 = vsub.f32 %v374_v43, %v375_v55 }
  0x1d   :  { %253 = vmatpush.msrb.mxu0 %v151_v20  ;;  %120 = vmatmul.f32.vlgmr.msra.gmra.mxu2 %v119_v31  ;;  %v365_v53 = vand.u32 4294901760, %v364_v50  ;;  %v371_v58 = vand.u32 4294901760, %v370_v54 }
  0x1e   :  { %148 = vmatpush.msra.mxu1 %v147_v29  ;;  %112 = vmatmul.f32.vlgmr.msra.gmra.mxu0 %v111_v33  ;;  %v377_v61 = vand.u32 4294901760, %v376_v59 }
  0x1f   :  { %6868 = vmatpush.msra.mxu3 %v153_v32  ;;  %530 = vrot.lane.b32.xlu0 %v293_v34, %s6932_s2 }
  0x20   :  { %160 = vmatmul.f32.vlgmr.msra.gmra.mxu3 %v7090_v13  ;;  %154 = vmatpush.msra.mxu1 %v153_v32 }
  0x21   :  { %211 = vmatpush.msrb.mxu3 %v7067_v3  ;;  %156 = vmatmul.f32.vlgmr.msra.gmra.mxu1 %v7095_v16 }
  0x22   :  { %277 = vmatpush.msrb.mxu1 %v7067_v3  ;;  %526 = vrot.lane.b32.xlu1 %v291_v36, %s6932_s2 }
  0x23   :  { %213 = vmatpush.msrb.mxu3 %v7069_v4  ;;  %761 = vrot.lane.b32.xlu2 %v293_v34, %s6933_s25 }
  0x24   :  { %279 = vmatpush.msrb.mxu1 %v7069_v4  ;;  %402 = vmatpush.msra.mxu0 %v356_v38 }
  0x25   :  { %188 = vmatmul.f32.vlgmr.msrb.gmra.mxu2 %v108_v21  ;;  %215 = vmatpush.msrb.mxu3 %v7071_v5 }
  0x26   :  { %255 = vmatmul.f32.vlgmr.msrb.gmra.mxu0 %v7095_v16  ;;  %281 = vmatpush.msrb.mxu1 %v7071_v5 }
  0x27   :  { %759 = vrot.lane.b32.xlu0 %v7086_v11, %s6933_s25  ;;  %405 = vmatpush.msra.mxu0 %v362_v40 }
  0x28   :  { %219 = vmatmul.f32.vlgmr.msrb.gmra.mxu3 %v109_v26  ;;  %436 = vmatpush.msra.mxu1 %v7115_v35 }
  0x29   :  { %283 = vmatmul.f32.vlgmr.msrb.gmra.mxu1 %v7095_v16  ;;  %408 = vmatpush.msra.mxu0 %v368_v42 }
  0x2a   :  { %757 = vrot.lane.b32.xlu1 %v291_v36, %s6933_s25  ;;  %438 = vmatpush.msra.mxu1 %v7124_v37 }
  0x2b   :  { %319 = vmatpush.msra.mxu2 %v7115_v35  ;;  %411 = vmatpush.msra.mxu0 %v374_v43 }
  0x2c   :  { %440 = vmatpush.msra.mxu1 %v7131_v39  ;;  %360 = vmatpush.msra.mxu3 %v359_v49 }
  0x2d   :  { %193 = vmatmul.f32.gmra.mxu2 %v7102_v18 }
  0x2e   :  { %259 = vmatmul.f32.gmra.mxu0 %v7090_v13  ;;  %321 = vmatpush.msra.mxu2 %v7124_v37 }
  0x2f   :  { %442 = vmatpush.msra.mxu1 %v7137_v41  ;;  %366 = vmatpush.msra.mxu3 %v365_v53 }
  0x30   :  { %225 = vmatmul.f32.gmra.mxu3 %v117_v23  ;;  %323 = vmatpush.msra.mxu2 %v7131_v39 }
  0x31   :  { %287 = vmatmul.f32.gmra.mxu1 %v7090_v13  ;;  %372 = vmatpush.msra.mxu3 %v371_v58 }
  0x32   :  { %325 = vmatpush.msra.mxu2 %v7137_v41 }
  0x33   :  { %378 = vmatpush.msra.mxu3 %v377_v61 }
  0x34   :  { %471 = vmatpush.msrb.mxu2 %v357_v44 }
  0x35   :  { %506 = vmatpush.msrb.mxu3 %v7115_v35 }
  0x36   :  { %475 = vmatpush.msrb.mxu2 %v363_v46 }
  0x37   :  { %508 = vmatpush.msrb.mxu3 %v7124_v37 }
  0x38   :  { %479 = vmatpush.msrb.mxu2 %v369_v51 }
  0x39   :  { %510 = vmatpush.msrb.mxu3 %v7131_v39 }
  0x3a   :  { %483 = vmatpush.msrb.mxu2 %v375_v55 }
  0x3b   :  { %512 = vmatpush.msrb.mxu3 %v7137_v41 }
  0x6e   :  { %v764_v27 = vpop.permute.xlu2 %763 }
  0x6f   :  { %v7215_v39 = vand.u32 4294901760, %v764_v27 }
  0x71   :  { %v7227_v50 = vsub.f32 %v764_v27, %v7215_v39 }
  0x73   :  { %v823_v61 = vand.u32 4294901760, %v7227_v50 }
  0x7d   :  { %v762_v36 = vpop.permute.xlu2 %761 }
  0x7e   :  { %v7219_v44 = vand.u32 4294901760, %v762_v36 }
  0x84   :  { %v533_v47 = vpop.permute.xlu0 %532 }
  0x85   :  { %v7161_v48 = vand.u32 4294901760, %v533_v47  ;;  %v529_v57 = vpop.permute.xlu1 %528 }
  0x86   :  { %v7171_v63 = vand.u32 4294901760, %v529_v57 }
  0x87   :  { %v7164_v52 = vsub.f32 %v533_v47, %v7161_v48  ;;  %554 = vmatpush.msrb.mxu0 %v7161_v48 }
  0x88   :  { %v7177_v2 = vsub.f32 %v529_v57, %v7171_v63  ;;  %v7241_v57 = vsub.f32 %v762_v36, %v7219_v44 }
  0x89   :  { %v592_v56 = vand.u32 4294901760, %v7164_v52 }
  0x8a   :  { %v604_v5 = vand.u32 4294901760, %v7177_v2 }
  0x8b   :  { %v593_v60 = vsub.f32 %v7164_v52, %v592_v56 }
  0x8c   :  { %v605_v14 = vsub.f32 %v7177_v2, %v604_v5 }
  0x8d   :  { %v594_v62 = vand.u32 4294901760, %v593_v60 }
  0x8e   :  { %v606_v16 = vand.u32 4294901760, %v605_v14 }
  0x8f   :  { %595 = vmatpush.msrb.mxu1 %v594_v62 }
  0x91   :  { %v531_v0 = vpop.permute.xlu0 %530 }
  0x92   :  { %v7173_v1 = vand.u32 4294901760, %v531_v0 }
  0x94   :  { %v7180_v3 = vsub.f32 %v531_v0, %v7173_v1  ;;  %556 = vmatpush.msrb.mxu0 %v7173_v1  ;;  %v527_v4 = vpop.permute.xlu1 %526 }
  0x95   :  { %v7186_v7 = vand.u32 4294901760, %v527_v4 }
  0x96   :  { %v598_v6 = vand.u32 4294901760, %v7180_v3  ;;  %558 = vmatpush.msrb.mxu0 %v7171_v63 }
  0x97   :  { %v7191_v8 = vsub.f32 %v527_v4, %v7186_v7 }
  0x98   :  { %v599_v9 = vsub.f32 %v7180_v3, %v598_v6  ;;  %560 = vmatpush.msrb.mxu0 %v7186_v7 }
  0x99   :  { %v610_v12 = vand.u32 4294901760, %v7191_v8  ;;  %v760_v47 = vpop.permute.xlu0 %759 }
  0x9a   :  { %v600_v13 = vand.u32 4294901760, %v599_v9  ;;  %v7229_v51 = vand.u32 4294901760, %v760_v47 }
  0x9b   :  { %v113_v11 = vpop.f32.mrf.mxu0  ;;  %v611_v17 = vsub.f32 %v7191_v8, %v610_v12 }
  0x9c   :  { %601 = vmatpush.msrb.mxu1 %v600_v13  ;;  %v114_v18 = vadd.f32 %v113_v11, %v79_v10  ;;  %v758_v54 = vpop.permute.xlu1 %757 }
  0x9d   :  { %v612_v20 = vand.u32 4294901760, %v611_v17  ;;  %v7243_v58 = vand.u32 4294901760, %v758_v54 }
  0x9e   :  { %v157_v19 = vpop.f32.mrf.mxu1  ;;  %607 = vmatpush.msrb.mxu1 %v606_v16 }
  0x9f   :  { %v158_v22 = vadd.f32 %v157_v19, %v114_v18  ;;  %v7266_v4 = vsub.f32 %v758_v54, %v7243_v58 }
  0xa0   :  { %v121_v15 = vpop.f32.mrf.mxu2  ;;  %613 = vmatpush.msrb.mxu1 %v612_v20 }
  0xa1   :  { %v122_v30 = vadd.f32 %v121_v15, %v80_v24 }
  0xa3   :  { %v161_v21 = vpop.f32.mrf.mxu3  ;;  %v256_v26 = vpop.f32.mrf.mxu0 }
  0xa4   :  { %v162_v33 = vadd.f32 %v161_v21, %v122_v30 }
  0xa6   :  { %v284_v29 = vpop.f32.mrf.mxu1 }
  0xa8   :  { %v189_v23 = vpop.f32.mrf.mxu2 }
  0xa9   :  { %v190_v25 = vadd.f32 %v189_v23, %v158_v22 }
  0xab   :  { %v220_v28 = vpop.f32.mrf.mxu3  ;;  %v260_v42 = vpop.f32.mrf.mxu0 }
  0xac   :  { %v221_v31 = vadd.f32 %v220_v28, %v190_v25 }
  0xae   :  { %v257_v32 = vadd.f32 %v256_v26, %v221_v31  ;;  %v288_v46 = vpop.f32.mrf.mxu1 }
  0xb0   :  { %v194_v34 = vpop.f32.mrf.mxu2  ;;  %v7211_v35 = vadd.f32 %v284_v29, %v257_v32 }
  0xb1   :  { %v195_v37 = vadd.f32 %v194_v34, %v162_v33 }
  0xb2   :  { %10091 = vst [vmem:[#allocation2_spill] sm:$0xff] %v7211_v35  ;;  %v301_v38 = vsel %vm299_vm1, %v7211_v35, 0 }
  0xb3   :  { %v7217_v40 = vand.u32 4294901760, %v301_v38  ;;  %v226_v41 = vpop.f32.mrf.mxu3 }
  0xb4   :  { %v227_v43 = vadd.f32 %v226_v41, %v195_v37 }
  0xb5   :  { %v7222_v45 = vsub.f32 %v301_v38, %v7217_v40  ;;  %380 = vmatmul.f32.vlgmr.msra.gmra.mxu3 %v7217_v40 }
  0xb6   :  { %v261_v49 = vadd.f32 %v260_v42, %v227_v43  ;;  %671 = vmatpush.msra.mxu3 %v7161_v48 }
  0xb7   :  { %414 = vmatmul.f32.vlgmr.msra.gmra.mxu0 %v7222_v45  ;;  %v7233_v53 = vand.u32 4294901760, %v7222_v45 }
  0xb8   :  { %v7235_v55 = vadd.f32 %v288_v46, %v261_v49  ;;  %673 = vmatpush.msra.mxu3 %v7173_v1  ;;  %706 = vmatpush.msra.mxu0 %v592_v56  ;;  %v7254_v56 = vsub.f32 %v760_v47, %v7229_v51 }
  0xb9   :  { %446 = vmatmul.f32.vlgmr.msra.gmra.mxu1 %v7233_v53  ;;  %v329_v59 = vsub.f32 %v7222_v45, %v7233_v53 }
  0xba   :  { %10092 = vst [vmem:[#allocation3_spill] sm:$0xff] %v7235_v55  ;;  %v304_v60 = vsel %vm299_vm1, %v7235_v55, 0  ;;  %741 = vmatpush.msra.mxu1 %v7161_v48  ;;  %675 = vmatpush.msra.mxu3 %v7171_v63  ;;  %v829_v48 = vand.u32 4294901760, %v7241_v57 }
  0xbb   :  { %v7256_v62 = vand.u32 4294901760, %v304_v60  ;;  %v7258_v0 = vand.u32 4294901760, %v329_v59  ;;  %710 = vmatpush.msra.mxu0 %v598_v6  ;;  %v835_v6 = vand.u32 4294901760, %v7254_v56 }
  0xbc   :  { %743 = vmatpush.msra.mxu1 %v7173_v1  ;;  %677 = vmatpush.msra.mxu3 %v7186_v7  ;;  %v824_v1 = vsub.f32 %v7227_v50, %v823_v61 }
  0xbd   :  { %v7269_v9 = vsub.f32 %v304_v60, %v7256_v62  ;;  %331 = vmatmul.f32.vlgmr.msra.gmra.mxu2 %v7258_v0  ;;  %384 = vmatmul.f32.gmra.mxu3 %v7256_v62 }
  0xbe   :  { %637 = vmatpush.msra.mxu2 %v7164_v52  ;;  %745 = vmatpush.msra.mxu1 %v7171_v63  ;;  %v841_v52 = vand.u32 4294901760, %v7266_v4  ;;  %v830_v63 = vsub.f32 %v7241_v57, %v829_v48  ;;  %v825_v13 = vand.u32 4294901760, %v824_v1 }
  0xbf   :  { %419 = vmatmul.f32.gmra.mxu0 %v7269_v9  ;;  %v7281_v10 = vand.u32 4294901760, %v7269_v9 }
  0xc0   :  { %640 = vmatpush.msra.mxu2 %v7180_v3  ;;  %714 = vmatpush.msra.mxu0 %v604_v5  ;;  %v836_v3 = vsub.f32 %v7254_v56, %v835_v6  ;;  %v831_v5 = vand.u32 4294901760, %v830_v63  ;;  %v842_v15 = vsub.f32 %v7266_v4, %v841_v52 }
  0xc1   :  { %452 = vmatmul.f32.gmra.mxu1 %v7281_v10  ;;  %v337_v11 = vsub.f32 %v7269_v9, %v7281_v10 }
  0xc2   :  { %643 = vmatpush.msra.mxu2 %v7177_v2  ;;  %747 = vmatpush.msra.mxu1 %v7186_v7  ;;  %v837_v16 = vand.u32 4294901760, %v836_v3  ;;  %v843_v2 = vand.u32 4294901760, %v842_v15  ;;  %v7307_v7 = vld [vmem:[%s10093_s30] ss:$0 sm:$0xff] }
  0xc3   :  { %v338_v14 = vand.u32 4294901760, %v337_v11  ;;  %718 = vmatpush.msra.mxu0 %v610_v12  ;;  %538 = vrot.lane.b32.xlu2 %v7307_v7, %s6932_s2  ;;  %s10126_s2 = sld [smem:[#allocation39_spill]] }
  0xc4   :  { %646 = vmatpush.msra.mxu2 %v7191_v8 }
  0xc5   :  { %339 = vmatmul.f32.gmra.mxu2 %v338_v14  ;;  %514 = vmatmul.f32.vlgmr.msrb.gmra.mxu3 %v7217_v40 }
  0xc6   :  { %826 = vmatpush.msrb.mxu3 %v825_v13 }
  0xc7   :  { %566 = vmatmul.f32.vlgmr.msrb.gmra.mxu0 %v7258_v0 }
  0xc8   :  { %832 = vmatpush.msrb.mxu3 %v831_v5  ;;  %868 = vmatpush.msrb.mxu0 %v7227_v50 }
  0xc9   :  { %615 = vmatmul.f32.vlgmr.msrb.gmra.mxu1 %v7217_v40 }
  0xca   :  { %838 = vmatpush.msrb.mxu3 %v837_v16  ;;  %871 = vmatpush.msrb.mxu0 %v7241_v57 }
  0xcb   :  { %902 = vmatpush.msrb.mxu1 %v7215_v39 }
  0xcc   :  { %844 = vmatpush.msrb.mxu3 %v843_v2  ;;  %874 = vmatpush.msrb.mxu0 %v7254_v56 }
  0xcd   :  { %485 = vmatmul.f32.vlgmr.msrb.gmra.mxu2 %v7217_v40  ;;  %518 = vmatmul.f32.gmra.mxu3 %v7256_v62 }
  0xce   :  { %904 = vmatpush.msrb.mxu1 %v7219_v44  ;;  %785 = vmatpush.msrb.mxu2 %v7215_v39 }
  0xcf   :  { %574 = vmatmul.f32.gmra.mxu0 %v338_v14 }
  0xd0   :  { %877 = vmatpush.msrb.mxu0 %v7266_v4  ;;  %906 = vmatpush.msrb.mxu1 %v7229_v51 }
  0xd1   :  { %619 = vmatmul.f32.gmra.mxu1 %v7256_v62  ;;  %787 = vmatpush.msrb.mxu2 %v7219_v44 }
  0xd2   :  { %908 = vmatpush.msrb.mxu1 %v7243_v58 }
  0xd3   :  { %789 = vmatpush.msrb.mxu2 %v7229_v51 }
  0xd5   :  { %489 = vmatmul.f32.gmra.mxu2 %v7256_v62  ;;  %681 = vmatmul.f32.vlgmr.msra.gmra.mxu3 %v7233_v53 }
  0xd6   :  { %791 = vmatpush.msrb.mxu2 %v7243_v58  ;;  %972 = vmatpush.msra.mxu3 %v7215_v39 }
  0xd7   :  { %720 = vmatmul.f32.vlgmr.msra.gmra.mxu0 %v7217_v40 }
  0xd8   :  { %974 = vmatpush.msra.mxu3 %v7219_v44 }
  0xd9   :  { %749 = vmatmul.f32.vlgmr.msra.gmra.mxu1 %v7217_v40 }
  0xda   :  { %976 = vmatpush.msra.mxu3 %v7229_v51 }
  0xdc   :  { %978 = vmatpush.msra.mxu3 %v7243_v58 }
  0xdd   :  { %649 = vmatmul.f32.vlgmr.msra.gmra.mxu2 %v7222_v45  ;;  %687 = vmatmul.f32.gmra.mxu3 %v7281_v10 }
  0xde   :  { %937 = vmatpush.msra.mxu2 %v823_v61 }
  0xdf   :  { %724 = vmatmul.f32.gmra.mxu0 %v7256_v62 }
  0xe0   :  { %941 = vmatpush.msra.mxu2 %v829_v48 }
  0xe1   :  { %753 = vmatmul.f32.gmra.mxu1 %v7256_v62 }
  0xe2   :  { %945 = vmatpush.msra.mxu2 %v835_v6 }
  0xe4   :  { %949 = vmatpush.msra.mxu2 %v841_v52 }
  0xe5   :  { %654 = vmatmul.f32.gmra.mxu2 %v7269_v9  ;;  %846 = vmatmul.f32.vlgmr.msrb.gmra.mxu3 %v7217_v40 }
  0xe7   :  { %880 = vmatmul.f32.vlgmr.msrb.gmra.mxu0 %v7222_v45 }
  0xe9   :  { %912 = vmatmul.f32.vlgmr.msrb.gmra.mxu1 %v7233_v53 }
  0xed   :  { %797 = vmatmul.f32.vlgmr.msrb.gmra.mxu2 %v7258_v0  ;;  %850 = vmatmul.f32.gmra.mxu3 %v7256_v62 }
  0xef   :  { %885 = vmatmul.f32.gmra.mxu0 %v7269_v9 }
  0xf1   :  { %918 = vmatmul.f32.gmra.mxu1 %v7281_v10 }
  0xf5   :  { %805 = vmatmul.f32.gmra.mxu2 %v338_v14  ;;  %980 = vmatmul.f32.vlgmr.msra.gmra.mxu3 %v7217_v40 }
  0xfd   :  { %951 = vmatmul.f32.vlgmr.msra.gmra.mxu2 %v7217_v40  ;;  %984 = vmatmul.f32.gmra.mxu3 %v7256_v62 }
 0x105   :  { %955 = vmatmul.f32.gmra.mxu2 %v7256_v62 }
 0x11d   :  { %v539_v30 = vpop.permute.xlu2 %538 }
 0x134   :  { %v415_v12 = vpop.f32.mrf.mxu0 }
 0x136   :  { %v447_v17 = vpop.f32.mrf.mxu1 }
 0x138   :  { %v381_v8 = vpop.f32.mrf.mxu3 }
 0x13c   :  { %v420_v20 = vpop.f32.mrf.mxu0 }
 0x13e   :  { %v453_v21 = vpop.f32.mrf.mxu1 }
 0x140   :  { %v332_v18 = vpop.f32.mrf.mxu2  ;;  %v385_v19 = vpop.f32.mrf.mxu3 }
 0x141   :  { %v333_v25 = vadd.f32 %v7307_v7, %v332_v18 }
 0x143   :  { %v382_v28 = vadd.f32 %v381_v8, %v333_v25 }
 0x144   :  { %v567_v24 = vpop.f32.mrf.mxu0 }
 0x145   :  { %v416_v33 = vadd.f32 %v415_v12, %v382_v28  ;;  %v568_v37 = vadd.f32 %v567_v24, %v539_v30 }
 0x146   :  { %v616_v26 = vpop.f32.mrf.mxu1 }
 0x147   :  { %v448_v39 = vadd.f32 %v447_v17, %v416_v33  ;;  %v617_v41 = vadd.f32 %v616_v26, %v568_v37 }
 0x148   :  { %v340_v22 = vpop.f32.mrf.mxu2  ;;  %v515_v23 = vpop.f32.mrf.mxu3 }
 0x149   :  { %v341_v31 = vadd.f32 %v7307_v7, %v340_v22 }
 0x14b   :  { %v386_v38 = vadd.f32 %v385_v19, %v341_v31 }
 0x14c   :  { %v575_v32 = vpop.f32.mrf.mxu0 }
 0x14d   :  { %v421_v42 = vadd.f32 %v420_v20, %v386_v38  ;;  %v576_v49 = vadd.f32 %v575_v32, %v539_v30 }
 0x14e   :  { %v620_v36 = vpop.f32.mrf.mxu1 }
 0x14f   :  { %v454_v53 = vadd.f32 %v453_v21, %v421_v42  ;;  %v621_v59 = vadd.f32 %v620_v36, %v576_v49 }
 0x150   :  { %v486_v27 = vpop.f32.mrf.mxu2  ;;  %v519_v29 = vpop.f32.mrf.mxu3 }
 0x151   :  { %v487_v40 = vadd.f32 %v486_v27, %v448_v39 }
 0x153   :  { %v7355_v46 = vadd.f32 %v515_v23, %v487_v40 }
 0x154   :  { %v721_v47 = vpop.f32.mrf.mxu0 }
 0x155   :  { %v990_v57 = vsel %vm988_vm2, %v7355_v46, 0 }
 0x156   :  { %v750_v51 = vpop.f32.mrf.mxu1  ;;  %v1019_v56 = vand.u32 4294901760, %v990_v57 }
 0x158   :  { %v490_v34 = vpop.f32.mrf.mxu2  ;;  %v682_v43 = vpop.f32.mrf.mxu3  ;;  %v1020_v10 = vsub.f32 %v990_v57, %v1019_v56 }
 0x159   :  { %v491_v58 = vadd.f32 %v490_v34, %v454_v53 }
 0x15a   :  { %v1021_v14 = vand.u32 4294901760, %v1020_v10 }
 0x15b   :  { %v7361_v0 = vadd.f32 %v519_v29, %v491_v58 }
 0x15c   :  { %v725_v1 = vpop.f32.mrf.mxu0  ;;  %v1022_v8 = vsub.f32 %v1020_v10, %v1021_v14 }
 0x15d   :  { %v993_v11 = vsel %vm988_vm2, %v7361_v0, 0 }
 0x15e   :  { %v754_v52 = vpop.f32.mrf.mxu1  ;;  %v1027_v5 = vand.u32 4294901760, %v993_v11  ;;  %v1023_v20 = vand.u32 4294901760, %v1022_v8 }
 0x160   :  { %v650_v44 = vpop.f32.mrf.mxu2  ;;  %v688_v48 = vpop.f32.mrf.mxu3  ;;  %v1028_v12 = vsub.f32 %v993_v11, %v1027_v5  ;;  %v1194_v11 = vld [vmem:[%s10094_s4 + $0x8] sm:$0xff] }
 0x161   :  { %v651_v45 = vadd.f32 %v650_v44, %v617_v41 }
 0x162   :  { %v1029_v21 = vand.u32 4294901760, %v1028_v12 }
 0x163   :  { %v683_v50 = vadd.f32 %v682_v43, %v651_v45 }
 0x164   :  { %v1030_v24 = vsub.f32 %v1028_v12, %v1029_v21  ;;  %v7375_v29 = vpop.f32.mrf.mxu0 }
 0x165   :  { %v722_v54 = vadd.f32 %v721_v47, %v683_v50 }
 0x166   :  { %v1031_v26 = vand.u32 4294901760, %v1030_v24  ;;  %v7379_v31 = vpop.f32.mrf.mxu1 }
 0x167   :  { %v7359_v60 = vadd.f32 %v750_v51, %v722_v54 }
 0x168   :  { %v655_v61 = vpop.f32.mrf.mxu2  ;;  %v7373_v28 = vpop.f32.mrf.mxu3 }
 0x169   :  { %v656_v62 = vadd.f32 %v655_v61, %v621_v59  ;;  %v996_v9 = vsel %vm988_vm2, %v7359_v60, 0 }
 0x16a   :  { %v1017_v63 = vand.u32 4294901760, %v996_v9 }
 0x16b   :  { %v689_v4 = vadd.f32 %v688_v48, %v656_v62 }
 0x16c   :  { %v1057_v16 = vsub.f32 %v996_v9, %v1017_v63  ;;  %v7383_v33 = vpop.f32.mrf.mxu0 }
 0x16d   :  { %v726_v6 = vadd.f32 %v725_v1, %v689_v4 }
 0x16e   :  { %v1058_v18 = vand.u32 4294901760, %v1057_v16  ;;  %v7387_v36 = vpop.f32.mrf.mxu1 }
 0x16f   :  { %v7367_v13 = vadd.f32 %v754_v52, %v726_v6 }
 0x170   :  { %v1059_v23 = vsub.f32 %v1057_v16, %v1058_v18  ;;  %v7371_v27 = vpop.f32.mrf.mxu2  ;;  %v7381_v32 = vpop.f32.mrf.mxu3 }
 0x171   :  { %v999_v3 = vsel %vm988_vm2, %v7367_v13, 0 }
 0x172   :  { %v1015_v15 = vand.u32 4294901760, %v999_v3  ;;  %v1060_v25 = vand.u32 4294901760, %v1059_v23 }
 0x174   :  { %1016 = vmatpush.xpose.msra.mxu0 %v1015_v15  ;;  %1117 = vmatpush.xpose.msrb.mxu3 %v1015_v15  ;;  %v1051_v2 = vsub.f32 %v999_v3, %v1015_v15 }
 0x176   :  { %1087 = vmatpush.xpose.msrb.mxu2 %v1051_v2  ;;  %v1052_v17 = vand.u32 4294901760, %v1051_v2 }
 0x178   :  { %1018 = vmatpush.xpose.msra.mxu0 %v1017_v63  ;;  %1119 = vmatpush.xpose.msrb.mxu3 %v1017_v63  ;;  %v1053_v19 = vsub.f32 %v1051_v2, %v1052_v17  ;;  %v7377_v30 = vpop.f32.mrf.mxu2  ;;  %v7389_v37 = vpop.f32.mrf.mxu3 }
 0x17a   :  { %1090 = vmatpush.xpose.msrb.mxu2 %v1057_v16  ;;  %v1054_v22 = vand.u32 4294901760, %v1053_v19 }
 0x17b   :  { %1024 = vmatmul.f32.vlgmr.msra.gmra.mxu0 %v1023_v20  ;;  %1123 = vmatmul.f32.vlgmr.msrb.gmra.mxu3 %v1021_v14 }
 0x17c   :  { %1150 = vmatpush.xpose.msrb.mxu0 %v1052_v17  ;;  %1055 = vmatpush.xpose.msra.mxu1 %v1054_v22 }
 0x17d   :  { %1093 = vmatmul.f32.vlgmr.msrb.gmra.mxu2 %v1020_v10 }
 0x180   :  { %1154 = vmatpush.xpose.msrb.mxu0 %v1058_v18  ;;  %1061 = vmatpush.xpose.msra.mxu1 %v1060_v25  ;;  %v7385_v34 = vpop.f32.mrf.mxu2  ;;  %v7393_v42 = vpop.f32.mrf.mxu3 }
 0x183   :  { %1032 = vmatmul.f32.gmra.mxu0 %v1031_v26  ;;  %1063 = vmatmul.f32.vlgmr.msra.gmra.mxu1 %v1019_v56 }
 0x184   :  { %1179 = vmatpush.xpose.msrb.mxu1 %v1015_v15  ;;  %1129 = vmatmul.f32.gmra.mxu3 %v1029_v21 }
 0x185   :  { %1098 = vmatmul.f32.gmra.mxu2 %v1028_v12 }
 0x188   :  { %1181 = vmatpush.xpose.msrb.mxu1 %v1017_v63  ;;  %v7391_v39 = vpop.f32.mrf.mxu2 }
 0x18b   :  { %1067 = vmatmul.f32.gmra.mxu1 %v1027_v5  ;;  %1156 = vmatmul.f32.vlgmr.msrb.gmra.mxu0 %v1019_v56 }
 0x193   :  { %1160 = vmatmul.f32.gmra.mxu0 %v1027_v5  ;;  %1183 = vmatmul.f32.vlgmr.msrb.gmra.mxu1 %v1019_v56  ;;  %v1193_v56 = vld [vmem:[%s10094_s4] sm:$0xff] }
 0x19b   :  { %1187 = vmatmul.f32.gmra.mxu1 %v1027_v5 }
 0x1f8   :  { %v1025_v38 = vpop.f32.mrf.mxu0 }
 0x1fe   :  { %v1124_v49 = vpop.f32.mrf.mxu3 }
 0x200   :  { %v1033_v40 = vpop.f32.mrf.mxu0  ;;  %v1064_v41 = vpop.f32.mrf.mxu1 }
 0x201   :  { %v1065_v43 = vadd.f32 %v1064_v41, %v1025_v38  ;;  %v1094_v44 = vpop.f32.mrf.mxu2 }
 0x203   :  { %v1095_v47 = vadd.f32 %v1094_v44, %v1065_v43 }
 0x205   :  { %v1125_v53 = vadd.f32 %v1124_v49, %v1095_v47 }
 0x207   :  { %v1130_v48 = vpop.f32.mrf.mxu3 }
 0x208   :  { %v1068_v45 = vpop.f32.mrf.mxu1  ;;  %v1157_v50 = vpop.f32.mrf.mxu0 }
 0x209   :  { %v1069_v51 = vadd.f32 %v1068_v45, %v1033_v40  ;;  %v1158_v54 = vadd.f32 %v1157_v50, %v1125_v53  ;;  %v1099_v57 = vpop.f32.mrf.mxu2 }
 0x20b   :  { %v1100_v59 = vadd.f32 %v1099_v57, %v1069_v51 }
 0x20d   :  { %v1131_v9 = vadd.f32 %v1130_v48, %v1100_v59 }
 0x210   :  { %v1184_v58 = vpop.f32.mrf.mxu1  ;;  %v1161_v4 = vpop.f32.mrf.mxu0 }
 0x211   :  { %v1185_v61 = vadd.f32 %v1184_v58, %v1158_v54  ;;  %v1162_v6 = vadd.f32 %v1161_v4, %v1131_v9 }
 0x213   :  { %v1191_v62 = vmul.f32 0.35355338, %v1185_v61 }
 0x215   :  { %v1195_v1 = vadd.f32 %v1193_v56, %v1191_v62 }
 0x217   :  { %v1198_v10 = vsel %vm1197_vm3, %v1195_v1, -inf }
 0x218   :  { %v1188_v52 = vpop.f32.mrf.mxu1  ;;  %1199 = vmax.xlane.f32.xlu0 %v1198_v10 }
 0x219   :  { %v1189_v63 = vadd.f32 %v1188_v52, %v1162_v6 }
 0x21b   :  { %v1192_v3 = vmul.f32 0.35355338, %v1189_v63 }
 0x21d   :  { %v1196_v14 = vadd.f32 %v1194_v11, %v1192_v3 }
 0x21f   :  { %v1201_v5 = vsel %vm1197_vm3, %v1196_v14, -inf }
 0x220   :  { %1202 = vmax.xlane.f32.xlu1 %v1201_v5 }
 0x239   :  { %1449 = vrot.lane.b32.xlu1 %v7367_v13, %s6934_s6 }
 0x241   :  { %1445 = vrot.lane.b32.xlu1 %v7361_v0, %s6934_s6 }
 0x28b   :  { %v1200_v15 = vpop.xlane.xlu0 %1199 }
 0x28c   :  { %v1204_v16 = vsub.f32 %v1195_v1, %v1200_v15 }
 0x28e   :  { %v1206_v2 = vmul.f32 1.442695, %v1204_v16 }
 0x290   :  { %6886 = vpow2.f32 %v1206_v2 }
 0x293   :  { %v1203_v8 = vpop.xlane.xlu1 %1202 }
 0x294   :  { %v1205_v12 = vsub.f32 %v1196_v14, %v1203_v8 }
 0x296   :  { %v6887_v17 = vpop.eup %6886  ;;  %v1208_v18 = vmul.f32 1.442695, %v1205_v12 }
 0x297   :  { %v1210_v19 = vsel %vm1197_vm3, %v6887_v17, 0.0 }
 0x298   :  { %6888 = vpow2.f32 %v1208_v18  ;;  %1211 = vadd.xlane.f32.xlu2 %v1210_v19 }
 0x29e   :  { %v7408_v20 = vpop.eup %6888 }
 0x29f   :  { %v1213_v21 = vsel %vm1197_vm3, %v7408_v20, 0.0 }
 0x2a0   :  { %1214 = vadd.xlane.f32.xlu0 %v1213_v21 }
 0x2ab   :  { %v1450_v23 = vpop.permute.xlu1 %1449 }
 0x2ac   :  { %v1457_v24 = vsel %vm988_vm2, %v1450_v23, 0 }
 0x2ad   :  { %v7419_v26 = vand.u32 4294901760, %v1457_v24 }
 0x2af   :  { %v7424_v45 = vsub.f32 %v1457_v24, %v7419_v26 }
 0x2b0   :  { %769 = vrot.lane.b32.xlu2 %v7307_v7, %s6933_s25  ;;  %s6936_s25 = smov 104  }
 0x2b1   :  { %v1510_v58 = vand.u32 4294901760, %v7424_v45 }
 0x2b3   :  { %v1511_v9 = vsub.f32 %v7424_v45, %v1510_v58 }
 0x2b4   :  { %1447 = vrot.lane.b32.xlu0 %v7359_v60, %s6934_s6 }
 0x2b5   :  { %v1512_v16 = vand.u32 4294901760, %v1511_v9 }
 0x2b8   :  { %1443 = vrot.lane.b32.xlu2 %v7355_v46, %s6934_s6 }
 0x30b   :  { %v1212_v22 = vpop.xlane.xlu2 %1211 }
 0x30c   :  { %6890 = vrcp.f32 %v1212_v22  ;;  %v1227_v47 = vand.u32 2147483648, %v1212_v22  ;;  %v1225_v53 = vand.u32 2147483647, %v1212_v22  ;;  %vm1221_vm5 = vweird.f32 %v1212_v22 }
 0x30e   :  { %v1228_v59 = vor.u32 1.1754944e-38, %v1227_v47  ;;  %vm1226_vm7 = vcmp.eq.f32.partialorder %v1225_v53, 8.507059e+37 }
 0x312   :  { %v6891_v25 = vpop.eup %6890 }
 0x313   :  { %v1217_v38 = vmul.f32 %v6891_v25, %v1212_v22  ;;  %v770_v40 = vpop.permute.xlu2 %769  ;;  %v1215_v41 = vpop.xlane.xlu0 %1214  ;;  %vm1222_vm4 = vweird.f32 %v6891_v25 }
 0x314   :  { %v799_v43 = vadd.f32 %v7371_v27, %v770_v40  ;;  %v807_v7 = vadd.f32 %v7377_v30, %v770_v40  ;;  %6892 = vrcp.f32 %v1215_v41  ;;  %vm1223_vm6 = vmor %vm1221_vm5, %vm1222_vm4  ;;  %v1239_v10 = vand.u32 2147483647, %v1215_v41 }
 0x315   :  { %v1218_v44 = vsub.f32 1.0, %v1217_v38  ;;  %vm1235_vm9 = vweird.f32 %v1215_v41 }
 0x316   :  { %v848_v49 = vadd.f32 %v7373_v28, %v799_v43  ;;  %v852_v50 = vadd.f32 %v7381_v32, %v807_v7  ;;  %vm1240_vm11 = vcmp.eq.f32.partialorder %v1239_v10, 8.507059e+37  ;;  %v1446_v43 = vpop.permute.xlu1 %1445 }
 0x317   :  { %v1219_v51 = vmul.f32 %v6891_v25, %v1218_v44  ;;  %v1453_v53 = vsel %vm988_vm2, %v1446_v43, 0 }
 0x318   :  { %v882_v54 = vadd.f32 %v7375_v29, %v848_v49  ;;  %v887_v57 = vadd.f32 %v7383_v33, %v852_v50 }
 0x319   :  { %v1220_v27 = vadd.f32 %v6891_v25, %v1219_v51 }
 0x31a   :  { %v6893_v30 = vpop.eup %6892  ;;  %v914_v61 = vadd.f32 %v7379_v31, %v882_v54  ;;  %v920_v28 = vadd.f32 %v7387_v36, %v887_v57  ;;  %v1241_v36 = vand.u32 2147483648, %v1215_v41 }
 0x31b   :  { %v1224_v56 = vsel %vm1223_vm6, %v6891_v25, %v1220_v27  ;;  %v1231_v32 = vmul.f32 %v6893_v30, %v1215_v41  ;;  %vm1236_vm8 = vweird.f32 %v6893_v30  ;;  %v1444_v52 = vpop.permute.xlu2 %1443 }
 0x31c   :  { %v1229_v62 = vsel %vm1226_vm7, %v1228_v59, %v1224_v56  ;;  %v953_v48 = vadd.f32 %v7385_v34, %v914_v61  ;;  %v957_v29 = vadd.f32 %v7391_v39, %v920_v28  ;;  %vm7451_vm10 = vmor %vm1235_vm9, %vm1236_vm8  ;;  %v1451_v8 = vsel %vm988_vm2, %v1444_v52, 0 }
 0x31d   :  { %v1244_v33 = vmul.f32 %v6887_v17, %v1229_v62  ;;  %v1232_v4 = vsub.f32 1.0, %v1231_v32  ;;  %v7465_v22 = vand.u32 4294901760, %v1451_v8 }
 0x31e   :  { %v7439_v1 = vadd.f32 %v7389_v37, %v953_v48  ;;  %v7442_v31 = vadd.f32 %v7393_v42, %v957_v29  ;;  %v1242_v42 = vor.u32 1.1754944e-38, %v1241_v36 }
 0x31f   :  { %v1233_v6 = vmul.f32 %v6893_v30, %v1232_v4  ;;  %v1247_v34 = vsel %vm1197_vm3, %v1244_v33, 0  ;;  %v1478_v49 = vsub.f32 %v1451_v8, %v7465_v22 }
 0x320   :  { %v1266_v39 = vand.u32 4294901760, %v7442_v31  ;;  %v7447_v63 = vand.u32 4294901760, %v7439_v1  ;;  %v7449_v11 = vand.u32 4294901760, %v1247_v34 }
 0x321   :  { %v1234_v3 = vadd.f32 %v6893_v30, %v1233_v6  ;;  %v1479_v59 = vand.u32 4294901760, %v1478_v49 }
 0x322   :  { %1267 = vmatpush.msra.mxu2 %v1266_v39  ;;  %1368 = vmatpush.msra.mxu1 %v1266_v39  ;;  %v1302_v14 = vsub.f32 %v7442_v31, %v1266_v39  ;;  %v1308_v5 = vsub.f32 %v7439_v1, %v7447_v63  ;;  %v1271_v15 = vsub.f32 %v1247_v34, %v7449_v11 }
 0x323   :  { %v1238_v2 = vsel %vm7451_vm10, %v6893_v30, %v1234_v3  ;;  %v1485_v30 = vand.u32 4294901760, %v1453_v53  ;;  %v1480_v48 = vsub.f32 %v1478_v49, %v1479_v59 }
 0x324   :  { %1269 = vmatpush.msra.mxu2 %v7447_v63  ;;  %1338 = vmatpush.msra.mxu0 %v1302_v14  ;;  %v1272_v12 = vand.u32 4294901760, %v1271_v15  ;;  %v1303_v17 = vand.u32 4294901760, %v1302_v14  ;;  %v1309_v18 = vand.u32 4294901760, %v1308_v5  ;;  %v1243_v19 = vsel %vm1240_vm11, %v1242_v42, %v1238_v2 }
 0x325   :  { %1370 = vmatpush.msra.mxu1 %v7447_v63  ;;  %v1245_v21 = vmul.f32 %v7408_v20, %v1243_v19  ;;  %v1486_v62 = vsub.f32 %v1453_v53, %v1485_v30 }
 0x326   :  { %1341 = vmatpush.msra.mxu0 %v1308_v5  ;;  %v1448_v23 = vpop.permute.xlu0 %1447  ;;  %v1273_v24 = vsub.f32 %v1271_v15, %v1272_v12  ;;  %v1304_v25 = vsub.f32 %v1302_v14, %v1303_v17  ;;  %v1310_v38 = vsub.f32 %v1308_v5, %v1309_v18  ;;  %1374 = vmatmul.f32.vlgmr.msra.gmra.mxu1 %v1272_v12 }
 0x327   :  { %1513 = vmatpush.xpose.msrb.mxu1 %v1512_v16  ;;  %1401 = vmatpush.msrb.mxu2 %v1303_v17  ;;  %v1455_v40 = vsel %vm988_vm2, %v1448_v23, 0  ;;  %v1250_v41 = vsel %vm1197_vm3, %v1245_v21, 0 }
 0x328   :  { %v1475_v7 = vand.u32 4294901760, %v1455_v40  ;;  %1344 = vmatmul.f32.vlgmr.msra.gmra.mxu0 %v1271_v15  ;;  %v1274_v44 = vand.u32 4294901760, %v1273_v24  ;;  %v1305_v47 = vand.u32 4294901760, %v1304_v25  ;;  %v1278_v20 = vand.u32 4294901760, %v1250_v41  ;;  %v6857_v25 = vld [vmem:[%s10094_s4 + $0x10] sm:$0xff] }
 0x329   :  { %1474 = vmatpush.xpose.msrb.mxu0 %v7419_v26  ;;  %1405 = vmatpush.msrb.mxu2 %v1309_v18  ;;  %v1311_v51 = vand.u32 4294901760, %v1310_v38 }
 0x32a   :  { %v1515_v50 = vsub.f32 %v1455_v40, %v1475_v7  ;;  %1275 = vmatmul.f32.vlgmr.msra.gmra.mxu2 %v1274_v44  ;;  %1306 = vmatpush.msra.mxu3 %v1305_v47  ;;  %v1279_v54 = vsub.f32 %v1250_v41, %v1278_v20 }
 0x32b   :  { %1545 = vmatpush.xpose.msra.mxu2 %v7424_v45  ;;  %v1481_v45 = vand.u32 4294901760, %v1480_v48 }
 0x32c   :  { %1312 = vmatpush.msra.mxu3 %v1311_v51  ;;  %v1516_v57 = vand.u32 4294901760, %v1515_v50  ;;  %v1280_v27 = vand.u32 4294901760, %v1279_v54 }
 0x32d   :  { %1476 = vmatpush.xpose.msrb.mxu0 %v1475_v7  ;;  %1314 = vmatmul.f32.vlgmr.msra.gmra.mxu3 %v7449_v11 }
 0x32e   :  { %1430 = vmatpush.msrb.mxu3 %v1266_v39  ;;  %v1517_v61 = vsub.f32 %v1515_v50, %v1516_v57  ;;  %1380 = vmatmul.f32.gmra.mxu1 %v1280_v27  ;;  %v1281_v28 = vsub.f32 %v1279_v54, %v1280_v27 }
 0x32f   :  { %1548 = vmatpush.xpose.msra.mxu2 %v1515_v50  ;;  %v6858_v50 = vld [vmem:[%s10094_s4 + $0x18] sm:$0xff] }
 0x330   :  { %1349 = vmatmul.f32.gmra.mxu0 %v1279_v54  ;;  %1432 = vmatpush.msrb.mxu3 %v7447_v63  ;;  %v1518_v56 = vand.u32 4294901760, %v1517_v61  ;;  %v1282_v32 = vand.u32 4294901760, %v1281_v28 }
 0x331   :  { %1608 = vmatpush.xpose.msra.mxu0 %v1510_v58  ;;  %v1487_v58 = vand.u32 4294901760, %v1486_v62 }
 0x332   :  { %1575 = vmatpush.xpose.msra.mxu3 %v7419_v26  ;;  %1519 = vmatpush.xpose.msrb.mxu1 %v1518_v56 }
 0x333   :  { %1283 = vmatmul.f32.gmra.mxu2 %v1282_v32  ;;  %v1488_v29 = vsub.f32 %v1486_v62, %v1487_v58 }
 0x335   :  { %1612 = vmatpush.xpose.msra.mxu0 %v1516_v57  ;;  %1318 = vmatmul.f32.gmra.mxu3 %v1278_v20  ;;  %v1489_v33 = vand.u32 4294901760, %v1488_v29 }
 0x336   :  { %1637 = vmatpush.xpose.msra.mxu1 %v7419_v26  ;;  %1577 = vmatpush.xpose.msra.mxu3 %v1475_v7 }
 0x337   :  { %1521 = vmatmul.f32.vlgmr.msrb.gmra.mxu1 %v7465_v22 }
 0x338   :  { %1482 = vmatmul.f32.vlgmr.msrb.gmra.mxu0 %v1481_v45 }
 0x33a   :  { %1639 = vmatpush.xpose.msra.mxu1 %v1475_v7 }
 0x33b   :  { %1407 = vmatmul.f32.vlgmr.msrb.gmra.mxu2 %v7449_v11 }
 0x33d   :  { %1434 = vmatmul.f32.vlgmr.msrb.gmra.mxu3 %v7449_v11 }
 0x33f   :  { %1525 = vmatmul.f32.gmra.mxu1 %v1485_v30 }
 0x340   :  { %1490 = vmatmul.f32.gmra.mxu0 %v1489_v33 }
 0x343   :  { %1411 = vmatmul.f32.gmra.mxu2 %v1278_v20 }
 0x345   :  { %1438 = vmatmul.f32.gmra.mxu3 %v1278_v20 }
 0x347   :  { %1641 = vmatmul.f32.vlgmr.msra.gmra.mxu1 %v7465_v22 }
 0x348   :  { %1614 = vmatmul.f32.vlgmr.msra.gmra.mxu0 %v7465_v22 }
 0x34b   :  { %1551 = vmatmul.f32.vlgmr.msra.gmra.mxu2 %v1478_v49 }
 0x34d   :  { %1581 = vmatmul.f32.vlgmr.msra.gmra.mxu3 %v1479_v59 }
 0x34f   :  { %1645 = vmatmul.f32.gmra.mxu1 %v1485_v30 }
 0x350   :  { %1618 = vmatmul.f32.gmra.mxu0 %v1485_v30 }
 0x353   :  { %1556 = vmatmul.f32.gmra.mxu2 %v1486_v62 }
 0x355   :  { %1587 = vmatmul.f32.gmra.mxu3 %v1487_v58 }
 0x3a3   :  { %v7486_v4 = vpop.f32.mrf.mxu1 }
 0x3a5   :  { %v7484_v26 = vpop.f32.mrf.mxu0 }
 0x3ab   :  { %v7494_v10 = vpop.f32.mrf.mxu1 }
 0x3ad   :  { %v7488_v9 = vpop.f32.mrf.mxu2  ;;  %v7492_v6 = vpop.f32.mrf.mxu0 }
 0x3b0   :  { %v7490_v36 = vpop.f32.mrf.mxu3 }
 0x3b4   :  { %v1522_v11 = vpop.f32.mrf.mxu1 }
 0x3b5   :  { %v1483_v39 = vpop.f32.mrf.mxu0 }
 0x3b6   :  { %v7496_v34 = vpop.f32.mrf.mxu2  ;;  %v1523_v15 = vadd.f32 %v1522_v11, %v1483_v39 }
 0x3b8   :  { %v7498_v52 = vpop.f32.mrf.mxu3 }
 0x3bc   :  { %v1526_v14 = vpop.f32.mrf.mxu1 }
 0x3bd   :  { %v1491_v42 = vpop.f32.mrf.mxu0 }
 0x3be   :  { %v7500_v63 = vpop.f32.mrf.mxu2  ;;  %v1527_v21 = vadd.f32 %v1526_v14, %v1491_v42 }
 0x3c0   :  { %v7502_v3 = vpop.f32.mrf.mxu3 }
 0x3c4   :  { %v1642_v18 = vpop.f32.mrf.mxu1 }
 0x3c5   :  { %v1615_v8 = vpop.f32.mrf.mxu0 }
 0x3c6   :  { %v7504_v37 = vpop.f32.mrf.mxu2 }
 0x3c8   :  { %v7506_v5 = vpop.f32.mrf.mxu3 }
 0x3cc   :  { %v1646_v20 = vpop.f32.mrf.mxu1 }
 0x3cd   :  { %v1619_v7 = vpop.f32.mrf.mxu0 }
 0x3ce   :  { %v1552_v16 = vpop.f32.mrf.mxu2 }
 0x3cf   :  { %v1553_v2 = vadd.f32 %v1552_v16, %v1523_v15 }
 0x3d0   :  { %v1582_v12 = vpop.f32.mrf.mxu3 }
 0x3d1   :  { %v1583_v17 = vadd.f32 %v1582_v12, %v1553_v2 }
 0x3d3   :  { %v1616_v19 = vadd.f32 %v1615_v8, %v1583_v17 }
 0x3d5   :  { %v1643_v23 = vadd.f32 %v1642_v18, %v1616_v19 }
 0x3d6   :  { %v1557_v22 = vpop.f32.mrf.mxu2 }
 0x3d7   :  { %v1558_v24 = vadd.f32 %v1557_v22, %v1527_v21  ;;  %v1649_v38 = vmul.f32 0.35355338, %v1643_v23 }
 0x3d8   :  { %v1588_v40 = vpop.f32.mrf.mxu3 }
 0x3d9   :  { %v1589_v41 = vadd.f32 %v1588_v40, %v1558_v24  ;;  %v1654_v43 = vadd.f32 %v6857_v25, %v1649_v38 }
 0x3db   :  { %v1620_v44 = vadd.f32 %v1619_v7, %v1589_v41  ;;  %v1656_v47 = vsel %vm1197_vm3, %v1654_v43, -inf }
 0x3dc   :  { %1657 = vmax.xlane.f32.xlu0 %v1656_v47 }
 0x3dd   :  { %v1647_v49 = vadd.f32 %v1646_v20, %v1620_v44 }
 0x3df   :  { %v1650_v51 = vmul.f32 0.35355338, %v1647_v49 }
 0x3e1   :  { %v1655_v53 = vadd.f32 %v6858_v50, %v1650_v51 }
 0x3e3   :  { %v1659_v54 = vsel %vm1197_vm3, %v1655_v53, -inf }
 0x3e4   :  { %1660 = vmax.xlane.f32.xlu2 %v1659_v54 }
 0x3fc   :  { %1708 = vrot.lane.b32.xlu2 %v7442_v31, %s6934_s6 }
 0x404   :  { %2279 = vrot.lane.b32.xlu2 %v7359_v60, %s6935_s28 }
 0x44f   :  { %v1658_v57 = vpop.xlane.xlu0 %1657 }
 0x450   :  { %v1662_v27 = vsub.f32 %v1654_v43, %v1658_v57 }
 0x452   :  { %v1664_v30 = vmul.f32 1.442695, %v1662_v27 }
 0x454   :  { %6894 = vpow2.f32 %v1664_v30 }
 0x457   :  { %v1661_v59 = vpop.xlane.xlu2 %1660 }
 0x458   :  { %v1663_v61 = vsub.f32 %v1655_v53, %v1661_v59 }
 0x45a   :  { %v6895_v28 = vpop.eup %6894  ;;  %v1666_v56 = vmul.f32 1.442695, %v1663_v61 }
 0x45b   :  { %v1668_v32 = vsel %vm1197_vm3, %v6895_v28, 0.0 }
 0x45c   :  { %6896 = vpow2.f32 %v1666_v56  ;;  %1669 = vadd.xlane.f32.xlu1 %v1668_v32 }
 0x45f   :  { %v1709_v62 = vpop.permute.xlu2 %1708 }
 0x460   :  { %v7521_v48 = vand.u32 4294901760, %v1709_v62 }
 0x462   :  { %v6897_v45 = vpop.eup %6896  ;;  %v1768_v58 = vsub.f32 %v1709_v62, %v7521_v48  ;;  %1733 = vmatpush.msrb.mxu2 %v7521_v48  ;;  %1834 = vmatpush.msrb.mxu1 %v7521_v48 }
 0x463   :  { %v1671_v29 = vsel %vm1197_vm3, %v6897_v45, 0.0 }
 0x464   :  { %v1769_v33 = vand.u32 4294901760, %v1768_v58  ;;  %1672 = vadd.xlane.f32.xlu0 %v1671_v29  ;;  %1804 = vmatpush.msrb.mxu0 %v1768_v58 }
 0x466   :  { %v1770_v39 = vsub.f32 %v1768_v58, %v1769_v33 }
 0x468   :  { %v1771_v11 = vand.u32 4294901760, %v1770_v39 }
 0x46a   :  { %1772 = vmatpush.msrb.mxu3 %v1771_v11  ;;  %v1908_v11 = vld [vmem:[%s10097_s5 + $0x8] sm:$0xff] }
 0x475   :  { %1706 = vrot.lane.b32.xlu1 %v7439_v1, %s6934_s6 }
 0x478   :  { %2281 = vrot.lane.b32.xlu0 %v7367_v13, %s6935_s28 }
 0x47d   :  { %2277 = vrot.lane.b32.xlu1 %v7361_v0, %s6935_s28 }
 0x480   :  { %2275 = vrot.lane.b32.xlu0 %v7355_v46, %s6935_s28 }
 0x4cf   :  { %v1670_v42 = vpop.xlane.xlu1 %1669 }
 0x4d0   :  { %6898 = vrcp.f32 %v1670_v42  ;;  %v1685_v8 = vand.u32 2147483648, %v1670_v42  ;;  %v1683_v17 = vand.u32 2147483647, %v1670_v42  ;;  %vm1679_vm13 = vweird.f32 %v1670_v42 }
 0x4d2   :  { %v1686_v21 = vor.u32 1.1754944e-38, %v1685_v8  ;;  %vm1684_vm15 = vcmp.eq.f32.partialorder %v1683_v17, 8.507059e+37  ;;  %v1442_v8 = vld [vmem:[%s10097_s5] sm:$0xff] }
 0x4d6   :  { %v6899_v14 = vpop.eup %6898 }
 0x4d7   :  { %v1675_v15 = vmul.f32 %v6899_v14, %v1670_v42  ;;  %v1673_v16 = vpop.xlane.xlu0 %1672  ;;  %vm1680_vm12 = vweird.f32 %v6899_v14  ;;  %v1930_v42 = vand.u32 4294901760, %v1908_v11 }
 0x4d8   :  { %6900 = vrcp.f32 %v1673_v16  ;;  %vm1681_vm14 = vmor %vm1679_vm13, %vm1680_vm12  ;;  %v1699_v40 = vand.u32 2147483648, %v1673_v16  ;;  %v1697_v43 = vand.u32 2147483647, %v1673_v16  ;;  %vm1693_vm4 = vweird.f32 %v1673_v16 }
 0x4d9   :  { %v1676_v2 = vsub.f32 1.0, %v1675_v15 }
 0x4da   :  { %v1700_v20 = vor.u32 1.1754944e-38, %v1699_v40  ;;  %vm1698_vm6 = vcmp.eq.f32.partialorder %v1697_v43, 8.507059e+37  ;;  %v1320_v43 = vadd.f32 %v7498_v52, %v7496_v34 }
 0x4db   :  { %v1677_v12 = vmul.f32 %v6899_v14, %v1676_v2 }
 0x4dd   :  { %v1678_v18 = vadd.f32 %v6899_v14, %v1677_v12  ;;  %v2113_v12 = vand.u32 4294901760, %v1442_v8 }
 0x4de   :  { %v6901_v19 = vpop.eup %6900 }
 0x4df   :  { %v1682_v22 = vsel %vm1681_vm14, %v6899_v14, %v1678_v18  ;;  %v1689_v23 = vmul.f32 %v6901_v19, %v1673_v16  ;;  %vm1694_vm0 = vweird.f32 %v6901_v19  ;;  %v1965_v14 = vsub.f32 %v1908_v11, %v1930_v42 }
 0x4e0   :  { %v1687_v24 = vsel %vm1684_vm15, %v1686_v21, %v1682_v22  ;;  %vm1695_vm5 = vmor %vm1693_vm4, %vm1694_vm0  ;;  %v1316_v18 = vadd.f32 %v7490_v36, %v7488_v9 }
 0x4e1   :  { %v1702_v25 = vmul.f32 %v6895_v28, %v1687_v24  ;;  %v1690_v38 = vsub.f32 1.0, %v1689_v23  ;;  %v1966_v15 = vand.u32 4294901760, %v1965_v14 }
 0x4e2   :  { %v1346_v23 = vadd.f32 %v7484_v26, %v1316_v18 }
 0x4e3   :  { %v1691_v41 = vmul.f32 %v6901_v19, %v1690_v38  ;;  %v1713_v7 = vsel %vm1197_vm3, %v1702_v25, 0 }
 0x4e4   :  { %v1736_v44 = vand.u32 4294901760, %v1713_v7 }
 0x4e5   :  { %v1692_v47 = vadd.f32 %v6901_v19, %v1691_v41 }
 0x4e6   :  { %v1737_v49 = vsub.f32 %v1713_v7, %v1736_v44  ;;  %v1376_v7 = vadd.f32 %v7486_v4, %v1346_v23 }
 0x4e7   :  { %v1696_v50 = vsel %vm1695_vm5, %v6901_v19, %v1692_v47  ;;  %v1707_v51 = vpop.permute.xlu1 %1706  ;;  %v7546_v19 = vsub.f32 %v1442_v8, %v2113_v12 }
 0x4e8   :  { %v1734_v53 = vand.u32 4294901760, %v1707_v51  ;;  %v1738_v54 = vand.u32 4294901760, %v1737_v49  ;;  %v1701_v57 = vsel %vm1698_vm6, %v1700_v20, %v1696_v50  ;;  %v1351_v20 = vadd.f32 %v7492_v6, %v1320_v43 }
 0x4e9   :  { %v1703_v27 = vmul.f32 %v6897_v45, %v1701_v57  ;;  %v2149_v22 = vand.u32 4294901760, %v7546_v19 }
 0x4ea   :  { %v1774_v30 = vsub.f32 %v1707_v51, %v1734_v53  ;;  %1735 = vmatpush.msrb.mxu2 %v1734_v53  ;;  %1836 = vmatpush.msrb.mxu1 %v1734_v53  ;;  %v1739_v59 = vsub.f32 %v1737_v49, %v1738_v54  ;;  %v2282_v51 = vpop.permute.xlu0 %2281  ;;  %v1382_v34 = vadd.f32 %v7494_v10, %v1351_v20 }
 0x4eb   :  { %1840 = vmatmul.f32.vlgmr.msrb.gmra.mxu1 %v1738_v54  ;;  %v1716_v61 = vsel %vm1197_vm3, %v1703_v27, 0  ;;  %v2150_v25 = vsub.f32 %v7546_v19, %v2149_v22  ;;  %v2289_v27 = vsel %vm988_vm2, %v2282_v51, 0 }
 0x4ec   :  { %1867 = vmatpush.msra.mxu2 %v1769_v33  ;;  %1807 = vmatpush.msrb.mxu0 %v1774_v30  ;;  %v1740_v28 = vand.u32 4294901760, %v1739_v59  ;;  %v1775_v56 = vand.u32 4294901760, %v1774_v30  ;;  %v1744_v32 = vand.u32 4294901760, %v1716_v61  ;;  %v2280_v59 = vpop.permute.xlu2 %2279 }
 0x4ed   :  { %1810 = vmatmul.f32.vlgmr.msrb.gmra.mxu0 %v1737_v49  ;;  %v2151_v40 = vand.u32 4294901760, %v2150_v25  ;;  %v2287_v10 = vsel %vm988_vm2, %v2280_v59, 0 }
 0x4ee   :  { %1741 = vmatmul.f32.vlgmr.msrb.gmra.mxu2 %v1740_v28  ;;  %v1776_v62 = vsub.f32 %v1774_v30, %v1775_v56  ;;  %v1745_v58 = vsub.f32 %v1716_v61, %v1744_v32  ;;  %1931 = vmatpush.msra.mxu0 %v1930_v42 }
 0x4ef   :  { %1871 = vmatpush.msra.mxu2 %v1775_v56  ;;  %v7562_v56 = vand.u32 4294901760, %v2289_v27 }
 0x4f0   :  { %v1777_v29 = vand.u32 4294901760, %v1776_v62  ;;  %v1746_v39 = vand.u32 4294901760, %v1745_v58  ;;  %2056 = vmatpush.msrb.mxu0 %v1966_v15 }
 0x4f1   :  { %1996 = vmatpush.msrb.mxu2 %v1965_v14  ;;  %v7569_v11 = vsub.f32 %v2289_v27, %v7562_v56 }
 0x4f2   :  { %1778 = vmatpush.msrb.mxu3 %v1777_v29  ;;  %v1747_v45 = vsub.f32 %v1745_v58, %v1746_v39  ;;  %v2276_v20 = vpop.permute.xlu0 %2275 }
 0x4f3   :  { %1780 = vmatmul.f32.vlgmr.msrb.gmra.mxu3 %v1736_v44  ;;  %1846 = vmatmul.f32.gmra.mxu1 %v1746_v39 }
 0x4f4   :  { %1896 = vmatpush.msra.mxu3 %v7521_v48  ;;  %v1748_v33 = vand.u32 4294901760, %v1747_v45  ;;  %v1967_v48 = vsub.f32 %v1965_v14, %v1966_v15 }
 0x4f5   :  { %1815 = vmatmul.f32.gmra.mxu0 %v1745_v58 }
 0x4f6   :  { %1898 = vmatpush.msra.mxu3 %v1734_v53  ;;  %1749 = vmatmul.f32.gmra.mxu2 %v1748_v33  ;;  %v1968_v16 = vand.u32 4294901760, %v1967_v48  ;;  %v2307_v33 = vand.u32 4294901760, %v2287_v10 }
 0x4f8   :  { %2024 = vmatpush.msrb.mxu3 %v1930_v42  ;;  %1969 = vmatpush.msra.mxu1 %v1968_v16  ;;  %v2347_v8 = vsub.f32 %v2287_v10, %v2307_v33 }
 0x4fa   :  { %2082 = vmatpush.msrb.mxu1 %v1930_v42 }
 0x4fb   :  { %1784 = vmatmul.f32.gmra.mxu3 %v1744_v32 }
 0x4fe   :  { %1873 = vmatmul.f32.vlgmr.msra.gmra.mxu2 %v1736_v44 }
 0x4ff   :  { %2114 = vmatpush.msra.mxu2 %v2113_v12 }
 0x503   :  { %1900 = vmatmul.f32.vlgmr.msra.gmra.mxu3 %v1736_v44  ;;  %v1409_v44 = vadd.f32 %v7500_v63, %v1376_v7  ;;  %v1413_v63 = vadd.f32 %v7504_v37, %v1382_v34 }
 0x504   :  { %2152 = vmatpush.msra.mxu3 %v2151_v40 }
 0x505   :  { %v1436_v50 = vadd.f32 %v7502_v3, %v1409_v44  ;;  %v1440_v29 = vadd.f32 %v7506_v5, %v1413_v63 }
 0x506   :  { %1877 = vmatmul.f32.gmra.mxu2 %v1744_v32 }
 0x507   :  { %v2093_v30 = vsel %vm988_vm2, %v1436_v50, 0  ;;  %v2096_v48 = vsel %vm988_vm2, %v1440_v29, 0  ;;  %v2278_v50 = vpop.permute.xlu1 %2277 }
 0x508   :  { %v7564_v62 = vand.u32 4294901760, %v2093_v30 }
 0x50a   :  { %v2116_v14 = vsub.f32 %v2093_v30, %v7564_v62 }
 0x50b   :  { %1904 = vmatmul.f32.gmra.mxu3 %v1744_v32 }
 0x50c   :  { %v2117_v18 = vand.u32 4294901760, %v2116_v14 }
 0x568   :  { %v1841_v36 = vpop.f32.mrf.mxu1 }
 0x56a   :  { %v1811_v38 = vpop.f32.mrf.mxu0 }
 0x570   :  { %v1847_v61 = vpop.f32.mrf.mxu1 }
 0x571   :  { %v1742_v2 = vpop.f32.mrf.mxu2 }
 0x572   :  { %v1816_v54 = vpop.f32.mrf.mxu0 }
 0x576   :  { %v1781_v17 = vpop.f32.mrf.mxu3 }
 0x577   :  { %v1782_v24 = vadd.f32 %v1781_v17, %v1742_v2  ;;  %v2342_v17 = vand.u32 4294901760, %v7569_v11 }
 0x579   :  { %v1750_v21 = vpop.f32.mrf.mxu2  ;;  %v1812_v9 = vadd.f32 %v1811_v38, %v1782_v24  ;;  %v2348_v24 = vand.u32 4294901760, %v2347_v8  ;;  %v2343_v25 = vsub.f32 %v7569_v11, %v2342_v17  ;;  %v2118_v38 = vsub.f32 %v2116_v14, %v2117_v18 }
 0x57b   :  { %v1842_v49 = vadd.f32 %v1841_v36, %v1812_v9  ;;  %v2344_v43 = vand.u32 4294901760, %v2343_v25  ;;  %v2349_v7 = vsub.f32 %v2347_v8, %v2348_v24  ;;  %v2119_v9 = vand.u32 4294901760, %v2118_v38 }
 0x57e   :  { %v1785_v41 = vpop.f32.mrf.mxu3 }
 0x57f   :  { %v1786_v26 = vadd.f32 %v1785_v41, %v1750_v21  ;;  %v2123_v21 = vand.u32 4294901760, %v2096_v48 }
 0x581   :  { %v1874_v47 = vpop.f32.mrf.mxu2  ;;  %v1817_v52 = vadd.f32 %v1816_v54, %v1786_v26  ;;  %v2124_v40 = vsub.f32 %v2096_v48, %v2123_v21  ;;  %v2283_v26 = vsel %vm988_vm2, %v2276_v20, 0 }
 0x582   :  { %v1875_v53 = vadd.f32 %v1874_v47, %v1842_v49  ;;  %v2309_v49 = vand.u32 4294901760, %v2283_v26 }
 0x583   :  { %v1848_v32 = vadd.f32 %v1847_v61, %v1817_v52  ;;  %v2125_v36 = vand.u32 4294901760, %v2124_v40 }
 0x584   :  { %v2310_v51 = vsub.f32 %v2283_v26, %v2309_v49 }
 0x585   :  { %v2126_v44 = vsub.f32 %v2124_v40, %v2125_v36 }
 0x586   :  { %v1901_v57 = vpop.f32.mrf.mxu3 }
 0x587   :  { %v1902_v4 = vadd.f32 %v1901_v57, %v1875_v53  ;;  %v2127_v47 = vand.u32 4294901760, %v2126_v44  ;;  %v2285_v53 = vsel %vm988_vm2, %v2278_v50, 0  ;;  %v2311_v57 = vand.u32 4294901760, %v2310_v51  ;;  %v6859_v44 = vld [vmem:[%s10094_s4 + $0x20] sm:$0xff] }
 0x588   :  { %v2317_v54 = vand.u32 4294901760, %v2285_v53 }
 0x589   :  { %v1910_v6 = vsel %vm988_vm2, %v1902_v4, 0  ;;  %v1878_v3 = vpop.f32.mrf.mxu2  ;;  %v2312_v52 = vsub.f32 %v2310_v51, %v2311_v57 }
 0x58a   :  { %v1932_v28 = vand.u32 4294901760, %v1910_v6  ;;  %v1879_v39 = vadd.f32 %v1878_v3, %v1848_v32  ;;  %v2318_v34 = vsub.f32 %v2285_v53, %v2317_v54 }
 0x58b   :  { %v2313_v4 = vand.u32 4294901760, %v2312_v52 }
 0x58c   :  { %v1933_v58 = vsub.f32 %v1910_v6, %v1932_v28  ;;  %1971 = vmatmul.f32.vlgmr.msra.gmra.mxu1 %v1932_v28  ;;  %v2319_v27 = vand.u32 4294901760, %v2318_v34 }
 0x58d   :  { %2207 = vmatpush.msra.mxu1 %v2113_v12 }
 0x58e   :  { %v1934_v37 = vand.u32 4294901760, %v1933_v58  ;;  %v1905_v45 = vpop.f32.mrf.mxu3  ;;  %1999 = vmatmul.f32.vlgmr.msrb.gmra.mxu2 %v1933_v58  ;;  %v2320_v30 = vsub.f32 %v2318_v34, %v2319_v27 }
 0x58f   :  { %v1906_v42 = vadd.f32 %v1905_v45, %v1879_v39  ;;  %2239 = vmatpush.msrb.mxu2 %v2149_v22 }
 0x590   :  { %2028 = vmatmul.f32.vlgmr.msrb.gmra.mxu3 %v1934_v37  ;;  %v1935_v15 = vsub.f32 %v1933_v58, %v1934_v37  ;;  %v2321_v63 = vand.u32 4294901760, %v2320_v30 }
 0x591   :  { %v1913_v16 = vsel %vm988_vm2, %v1906_v42, 0  ;;  %2265 = vmatpush.msrb.mxu3 %v2113_v12 }
 0x592   :  { %v1940_v5 = vand.u32 4294901760, %v1913_v16  ;;  %v1936_v2 = vand.u32 4294901760, %v1935_v15 }
 0x594   :  { %1937 = vmatmul.f32.vlgmr.msra.gmra.mxu0 %v1936_v2  ;;  %1975 = vmatmul.f32.gmra.mxu1 %v1940_v5  ;;  %v1941_v23 = vsub.f32 %v1913_v16, %v1940_v5 }
 0x595   :  { %2179 = vmatpush.msra.mxu0 %v7546_v19  ;;  %v2350_v19 = vand.u32 4294901760, %v2349_v7 }
 0x596   :  { %2004 = vmatmul.f32.gmra.mxu2 %v1941_v23  ;;  %v1942_v22 = vand.u32 4294901760, %v1941_v23 }
 0x598   :  { %2034 = vmatmul.f32.gmra.mxu3 %v1942_v22  ;;  %v1943_v12 = vsub.f32 %v1941_v23, %v1942_v22 }
 0x59a   :  { %v1944_v41 = vand.u32 4294901760, %v1943_v12 }
 0x59c   :  { %1945 = vmatmul.f32.gmra.mxu0 %v1944_v41  ;;  %2084 = vmatmul.f32.vlgmr.msrb.gmra.mxu1 %v1932_v28 }
 0x59d   :  { %2345 = vmatpush.xpose.msrb.mxu1 %v2344_v43 }
 0x59e   :  { %2120 = vmatmul.f32.vlgmr.msra.gmra.mxu2 %v2119_v9 }
 0x59f   :  { %2377 = vmatpush.xpose.msra.mxu2 %v7569_v11 }
 0x5a0   :  { %2154 = vmatmul.f32.vlgmr.msra.gmra.mxu3 %v7564_v62 }
 0x5a1   :  { %2351 = vmatpush.xpose.msrb.mxu1 %v2350_v19  ;;  %2407 = vmatpush.xpose.msra.mxu3 %v7562_v56 }
 0x5a3   :  { %2380 = vmatpush.xpose.msra.mxu2 %v2347_v8 }
 0x5a4   :  { %2058 = vmatmul.f32.vlgmr.msrb.gmra.mxu0 %v1932_v28  ;;  %2088 = vmatmul.f32.gmra.mxu1 %v1940_v5 }
 0x5a5   :  { %2306 = vmatpush.xpose.msrb.mxu0 %v7562_v56  ;;  %2409 = vmatpush.xpose.msra.mxu3 %v2307_v33 }
 0x5a6   :  { %2128 = vmatmul.f32.gmra.mxu2 %v2127_v47 }
 0x5a8   :  { %2158 = vmatmul.f32.gmra.mxu3 %v2123_v21 }
 0x5a9   :  { %2308 = vmatpush.xpose.msrb.mxu0 %v2307_v33 }
 0x5ac   :  { %2062 = vmatmul.f32.gmra.mxu0 %v1940_v5  ;;  %2211 = vmatmul.f32.vlgmr.msra.gmra.mxu1 %v2117_v18 }
 0x5ad   :  { %2469 = vmatpush.xpose.msra.mxu1 %v7562_v56 }
 0x5ae   :  { %2241 = vmatmul.f32.vlgmr.msrb.gmra.mxu2 %v7564_v62 }
 0x5b0   :  { %2267 = vmatmul.f32.vlgmr.msrb.gmra.mxu3 %v7564_v62 }
 0x5b1   :  { %2471 = vmatpush.xpose.msra.mxu1 %v2307_v33 }
 0x5b4   :  { %2182 = vmatmul.f32.vlgmr.msra.gmra.mxu0 %v2116_v14  ;;  %2217 = vmatmul.f32.gmra.mxu1 %v2125_v36 }
 0x5b5   :  { %2440 = vmatpush.xpose.msra.mxu0 %v2342_v17 }
 0x5b6   :  { %2245 = vmatmul.f32.gmra.mxu2 %v2123_v21 }
 0x5b8   :  { %2271 = vmatmul.f32.gmra.mxu3 %v2123_v21 }
 0x5b9   :  { %2444 = vmatpush.xpose.msra.mxu0 %v2348_v24 }
 0x5bc   :  { %2187 = vmatmul.f32.gmra.mxu0 %v2124_v40  ;;  %2353 = vmatmul.f32.vlgmr.msrb.gmra.mxu1 %v2309_v49 }
 0x5be   :  { %2383 = vmatmul.f32.vlgmr.msra.gmra.mxu2 %v2310_v51 }
 0x5c0   :  { %2413 = vmatmul.f32.vlgmr.msra.gmra.mxu3 %v2311_v57 }
 0x5c4   :  { %2314 = vmatmul.f32.vlgmr.msrb.gmra.mxu0 %v2313_v4  ;;  %2357 = vmatmul.f32.gmra.mxu1 %v2317_v54 }
 0x5c6   :  { %2388 = vmatmul.f32.gmra.mxu2 %v2318_v34  ;;  %v6860_v34 = vld [vmem:[%s10094_s4 + $0x28] sm:$0xff] }
 0x5c8   :  { %2419 = vmatmul.f32.gmra.mxu3 %v2319_v27 }
 0x5cc   :  { %2322 = vmatmul.f32.gmra.mxu0 %v2321_v63  ;;  %2473 = vmatmul.f32.vlgmr.msra.gmra.mxu1 %v2309_v49 }
 0x5d4   :  { %2446 = vmatmul.f32.vlgmr.msra.gmra.mxu0 %v2309_v49  ;;  %2477 = vmatmul.f32.gmra.mxu1 %v2317_v54 }
 0x5dc   :  { %2450 = vmatmul.f32.gmra.mxu0 %v2317_v54 }
 0x609   :  { %v7586_v59 = vpop.f32.mrf.mxu1 }
 0x611   :  { %v7588_v6 = vpop.f32.mrf.mxu0  ;;  %v7590_v61 = vpop.f32.mrf.mxu1 }
 0x612   :  { %v7592_v28 = vpop.f32.mrf.mxu2 }
 0x613   :  { %v7594_v3 = vpop.f32.mrf.mxu3 }
 0x619   :  { %v7596_v56 = vpop.f32.mrf.mxu0  ;;  %v7598_v32 = vpop.f32.mrf.mxu1 }
 0x61a   :  { %10098 = vst [vmem:[#allocation4_spill] sm:$0xff] %v7598_v32  ;;  %v7600_v62 = vpop.f32.mrf.mxu2 }
 0x61b   :  { %v7602_v10 = vpop.f32.mrf.mxu3 }
 0x61c   :  { %10099 = vst [vmem:[#allocation5_spill] sm:$0xff] %v7602_v10 }
 0x621   :  { %v7604_v58 = vpop.f32.mrf.mxu0  ;;  %v7606_v29 = vpop.f32.mrf.mxu1 }
 0x622   :  { %10100 = vst [vmem:[#allocation6_spill] sm:$0xff] %v7606_v29  ;;  %v7608_v39 = vpop.f32.mrf.mxu2 }
 0x623   :  { %10101 = vst [vmem:[#allocation7_spill] sm:$0xff] %v7608_v39  ;;  %v7610_v37 = vpop.f32.mrf.mxu3 }
 0x624   :  { %10102 = vst [vmem:[#allocation8_spill] sm:$0xff] %v7610_v37 }
 0x629   :  { %v7612_v45 = vpop.f32.mrf.mxu0  ;;  %v7614_v33 = vpop.f32.mrf.mxu1 }
 0x62a   :  { %10103 = vst [vmem:[#allocation9_spill] sm:$0xff] %v7612_v45  ;;  %v7616_v11 = vpop.f32.mrf.mxu2 }
 0x62b   :  { %10104 = vst [vmem:[#allocation10_spill] sm:$0xff] %v7614_v33  ;;  %v7618_v42 = vpop.f32.mrf.mxu3 }
 0x62c   :  { %10105 = vst [vmem:[#allocation11_spill] sm:$0xff] %v7616_v11 }
 0x62d   :  { %10106 = vst [vmem:[#allocation12_spill] sm:$0xff] %v7618_v42 }
 0x631   :  { %v7620_v14 = vpop.f32.mrf.mxu0  ;;  %v7622_v15 = vpop.f32.mrf.mxu1 }
 0x632   :  { %10107 = vst [vmem:[#allocation13_spill] sm:$0xff] %v7620_v14  ;;  %v7624_v48 = vpop.f32.mrf.mxu2 }
 0x633   :  { %10108 = vst [vmem:[#allocation14_spill] sm:$0xff] %v7622_v15  ;;  %v7626_v16 = vpop.f32.mrf.mxu3 }
 0x634   :  { %10109 = vst [vmem:[#allocation15_spill] sm:$0xff] %v7624_v48 }
 0x635   :  { %10110 = vst [vmem:[#allocation16_spill] sm:$0xff] %v7626_v16 }
 0x639   :  { %v7628_v5 = vpop.f32.mrf.mxu0  ;;  %v2354_v2 = vpop.f32.mrf.mxu1 }
 0x63a   :  { %10111 = vst [vmem:[#allocation17_spill] sm:$0xff] %v7628_v5  ;;  %v7630_v8 = vpop.f32.mrf.mxu2 }
 0x63b   :  { %10112 = vst [vmem:[#allocation18_spill] sm:$0xff] %v7630_v8  ;;  %v7632_v18 = vpop.f32.mrf.mxu3 }
 0x63c   :  { %10113 = vst [vmem:[#allocation19_spill] sm:$0xff] %v7632_v18 }
 0x641   :  { %v2315_v17 = vpop.f32.mrf.mxu0  ;;  %v2358_v21 = vpop.f32.mrf.mxu1 }
 0x642   :  { %v2355_v23 = vadd.f32 %v2354_v2, %v2315_v17  ;;  %v2384_v22 = vpop.f32.mrf.mxu2 }
 0x643   :  { %v2414_v38 = vpop.f32.mrf.mxu3 }
 0x644   :  { %v2385_v25 = vadd.f32 %v2384_v22, %v2355_v23 }
 0x646   :  { %v2415_v40 = vadd.f32 %v2414_v38, %v2385_v25 }
 0x649   :  { %v2323_v24 = vpop.f32.mrf.mxu0  ;;  %v2474_v41 = vpop.f32.mrf.mxu1 }
 0x64a   :  { %v2359_v12 = vadd.f32 %v2358_v21, %v2323_v24  ;;  %v2389_v9 = vpop.f32.mrf.mxu2 }
 0x64b   :  { %v2420_v20 = vpop.f32.mrf.mxu3 }
 0x64c   :  { %v2390_v36 = vadd.f32 %v2389_v9, %v2359_v12 }
 0x64e   :  { %v2421_v26 = vadd.f32 %v2420_v20, %v2390_v36 }
 0x651   :  { %v2447_v43 = vpop.f32.mrf.mxu0  ;;  %v2478_v54 = vpop.f32.mrf.mxu1 }
 0x652   :  { %v2448_v7 = vadd.f32 %v2447_v43, %v2415_v40 }
 0x654   :  { %v2475_v19 = vadd.f32 %v2474_v41, %v2448_v7 }
 0x656   :  { %v2481_v47 = vmul.f32 0.35355338, %v2475_v19 }
 0x658   :  { %v2486_v49 = vadd.f32 %v6859_v44, %v2481_v47 }
 0x659   :  { %v2451_v50 = vpop.f32.mrf.mxu0 }
 0x65a   :  { %v2452_v51 = vadd.f32 %v2451_v50, %v2421_v26  ;;  %v2488_v53 = vsel %vm1197_vm3, %v2486_v49, -inf }
 0x65b   :  { %2489 = vmax.xlane.f32.xlu2 %v2488_v53 }
 0x65c   :  { %v2479_v57 = vadd.f32 %v2478_v54, %v2452_v51 }
 0x65e   :  { %v2482_v52 = vmul.f32 0.35355338, %v2479_v57 }
 0x660   :  { %v2487_v4 = vadd.f32 %v6860_v34, %v2482_v52 }
 0x662   :  { %v2491_v27 = vsel %vm1197_vm3, %v2487_v4, -inf }
 0x663   :  { %2492 = vmax.xlane.f32.xlu0 %v2491_v27 }
 0x677   :  { %2538 = vrot.lane.b32.xlu0 %v7442_v31, %s6935_s28 }
 0x67f   :  { %2928 = vrot.lane.b32.xlu0 %v7359_v60, %s6936_s25 }
 0x687   :  { %2926 = vrot.lane.b32.xlu0 %v7361_v0, %s6936_s25 }
 0x6ce   :  { %v2490_v30 = vpop.xlane.xlu2 %2489 }
 0x6cf   :  { %v2494_v63 = vsub.f32 %v2486_v49, %v2490_v30 }
 0x6d1   :  { %v2496_v2 = vmul.f32 1.442695, %v2494_v63 }
 0x6d3   :  { %6902 = vpow2.f32 %v2496_v2  ;;  %v2738_v2 = vld [vmem:[%s10097_s5 + $0x10] sm:$0xff] }
 0x6d6   :  { %v2493_v17 = vpop.xlane.xlu0 %2492 }
 0x6d7   :  { %v2495_v21 = vsub.f32 %v2487_v4, %v2493_v17 }
 0x6d9   :  { %v6903_v23 = vpop.eup %6902  ;;  %v2498_v22 = vmul.f32 1.442695, %v2495_v21 }
 0x6da   :  { %v2500_v24 = vsel %vm1197_vm3, %v6903_v23, 0.0 }
 0x6db   :  { %6904 = vpow2.f32 %v2498_v22  ;;  %2501 = vadd.xlane.f32.xlu1 %v2500_v24 }
 0x6e1   :  { %v6905_v25 = vpop.eup %6904 }
 0x6e2   :  { %v2503_v38 = vsel %vm1197_vm3, %v6905_v25, 0.0 }
 0x6e3   :  { %2504 = vadd.xlane.f32.xlu2 %v2503_v38 }
 0x6e9   :  { %v2539_v60 = vpop.permute.xlu0 %2538 }
 0x6ea   :  { %v7650_v40 = vand.u32 4294901760, %v2539_v60 }
 0x6ec   :  { %v2598_v0 = vsub.f32 %v2539_v60, %v7650_v40  ;;  %2563 = vmatpush.msrb.mxu2 %v7650_v40  ;;  %2664 = vmatpush.msrb.mxu1 %v7650_v40 }
 0x6ee   :  { %v2599_v12 = vand.u32 4294901760, %v2598_v0  ;;  %2634 = vmatpush.msrb.mxu0 %v2598_v0 }
 0x6f0   :  { %v2600_v41 = vsub.f32 %v2598_v0, %v2599_v12  ;;  %v2760_v0 = vand.u32 4294901760, %v2738_v2 }
 0x6f2   :  { %v2601_v43 = vand.u32 4294901760, %v2600_v41 }
 0x6f4   :  { %2536 = vrot.lane.b32.xlu1 %v7439_v1, %s6935_s28  ;;  %2602 = vmatpush.msrb.mxu3 %v2601_v43 }
 0x6fb   :  { %2930 = vrot.lane.b32.xlu2 %v7367_v13, %s6936_s25 }
 0x6fc   :  { %2924 = vrot.lane.b32.xlu1 %v7355_v46, %s6936_s25 }
 0x74e   :  { %v2502_v7 = vpop.xlane.xlu1 %2501 }
 0x74f   :  { %6906 = vrcp.f32 %v2502_v7  ;;  %v2517_v47 = vand.u32 2147483648, %v2502_v7  ;;  %v2515_v26 = vand.u32 2147483647, %v2502_v7  ;;  %vm2511_vm8 = vweird.f32 %v2502_v7 }
 0x751   :  { %v2518_v51 = vor.u32 1.1754944e-38, %v2517_v47  ;;  %vm2516_vm10 = vcmp.eq.f32.partialorder %v2515_v26, 8.507059e+37 }
 0x755   :  { %v6907_v9 = vpop.eup %6906 }
 0x756   :  { %v2507_v36 = vmul.f32 %v6907_v9, %v2502_v7  ;;  %v2505_v19 = vpop.xlane.xlu2 %2504  ;;  %vm2512_vm7 = vweird.f32 %v6907_v9 }
 0x757   :  { %6908 = vrcp.f32 %v2505_v19  ;;  %vm2513_vm9 = vmor %vm2511_vm8, %vm2512_vm7  ;;  %v2531_v34 = vand.u32 2147483648, %v2505_v19  ;;  %v2529_v27 = vand.u32 2147483647, %v2505_v19  ;;  %vm2525_vm12 = vweird.f32 %v2505_v19 }
 0x758   :  { %v2508_v44 = vsub.f32 1.0, %v2507_v36 }
 0x759   :  { %v2532_v21 = vor.u32 1.1754944e-38, %v2531_v34  ;;  %vm2530_vm14 = vcmp.eq.f32.partialorder %v2529_v27, 8.507059e+37 }
 0x75a   :  { %v2509_v20 = vmul.f32 %v6907_v9, %v2508_v44 }
 0x75c   :  { %v2510_v49 = vadd.f32 %v6907_v9, %v2509_v20  ;;  %v2795_v20 = vsub.f32 %v2738_v2, %v2760_v0 }
 0x75d   :  { %v6909_v50 = vpop.eup %6908 }
 0x75e   :  { %v2514_v13 = vsel %vm2513_vm9, %v6907_v9, %v2510_v49  ;;  %v2521_v53 = vmul.f32 %v6909_v50, %v2505_v19  ;;  %vm2526_vm11 = vweird.f32 %v6909_v50  ;;  %v2931_v36 = vpop.permute.xlu2 %2930 }
 0x75f   :  { %v2519_v46 = vsel %vm2516_vm10, %v2518_v51, %v2514_v13  ;;  %vm2527_vm13 = vmor %vm2525_vm12, %vm2526_vm11 }
 0x760   :  { %v2534_v54 = vmul.f32 %v6903_v23, %v2519_v46  ;;  %v2522_v57 = vsub.f32 1.0, %v2521_v53 }
 0x762   :  { %v2543_v52 = vsel %vm1197_vm3, %v2534_v54, 0  ;;  %v2523_v4 = vmul.f32 %v6909_v50, %v2522_v57 }
 0x763   :  { %v2566_v30 = vand.u32 4294901760, %v2543_v52 }
 0x764   :  { %v2524_v63 = vadd.f32 %v6909_v50, %v2523_v4 }
 0x765   :  { %v2567_v17 = vsub.f32 %v2543_v52, %v2566_v30 }
 0x766   :  { %v2528_v22 = vsel %vm2527_vm13, %v6909_v50, %v2524_v63  ;;  %v2537_v23 = vpop.permute.xlu1 %2536  ;;  %v2929_v50 = vpop.permute.xlu0 %2928 }
 0x767   :  { %v2533_v24 = vsel %vm2530_vm14, %v2532_v21, %v2528_v22  ;;  %v2564_v38 = vand.u32 4294901760, %v2537_v23  ;;  %v2568_v60 = vand.u32 4294901760, %v2567_v17  ;;  %v2936_v46 = vsel %vm988_vm2, %v2929_v50, 0 }
 0x768   :  { %v2535_v41 = vmul.f32 %v6905_v25, %v2533_v24  ;;  %v2938_v25 = vsel %vm988_vm2, %v2931_v36, 0  ;;  %v7671_v57 = vand.u32 4294901760, %v2936_v46  ;;  %v2796_v21 = vand.u32 4294901760, %v2795_v20 }
 0x769   :  { %v2604_v43 = vsub.f32 %v2537_v23, %v2564_v38  ;;  %2565 = vmatpush.msrb.mxu2 %v2564_v38  ;;  %2666 = vmatpush.msrb.mxu1 %v2564_v38  ;;  %v2569_v7 = vsub.f32 %v2567_v17, %v2568_v60 }
 0x76a   :  { %2670 = vmatmul.f32.vlgmr.msrb.gmra.mxu1 %v2568_v60  ;;  %v2546_v9 = vsel %vm1197_vm3, %v2535_v41, 0  ;;  %v7677_v52 = vsub.f32 %v2936_v46, %v7671_v57  ;;  %v2797_v22 = vsub.f32 %v2795_v20, %v2796_v21 }
 0x76b   :  { %2697 = vmatpush.msra.mxu2 %v2599_v12  ;;  %2637 = vmatpush.msrb.mxu0 %v2604_v43  ;;  %v2570_v19 = vand.u32 4294901760, %v2569_v7  ;;  %v2605_v44 = vand.u32 4294901760, %v2604_v43  ;;  %v2574_v47 = vand.u32 4294901760, %v2546_v9  ;;  %v7667_v12 = vand.u32 4294901760, %v2938_v25 }
 0x76c   :  { %2640 = vmatmul.f32.vlgmr.msrb.gmra.mxu0 %v2567_v17  ;;  %v2997_v27 = vand.u32 4294901760, %v7677_v52  ;;  %v2798_v23 = vand.u32 4294901760, %v2797_v22 }
 0x76d   :  { %2571 = vmatmul.f32.vlgmr.msrb.gmra.mxu2 %v2570_v19  ;;  %v2606_v26 = vsub.f32 %v2604_v43, %v2605_v44  ;;  %v2575_v49 = vsub.f32 %v2546_v9, %v2574_v47  ;;  %2761 = vmatpush.msra.mxu0 %v2760_v0  ;;  %v7674_v34 = vsub.f32 %v2938_v25, %v7667_v12 }
 0x76e   :  { %2701 = vmatpush.msra.mxu2 %v2605_v44  ;;  %v2998_v2 = vsub.f32 %v7677_v52, %v2997_v27  ;;  %2799 = vmatpush.msra.mxu1 %v2798_v23 }
 0x76f   :  { %v2607_v51 = vand.u32 4294901760, %v2606_v26  ;;  %v2576_v13 = vand.u32 4294901760, %v2575_v49  ;;  %v2991_v4 = vand.u32 4294901760, %v7674_v34  ;;  %2886 = vmatpush.msrb.mxu0 %v2796_v21  ;;  %v2925_v26 = vpop.permute.xlu1 %2924 }
 0x770   :  { %2826 = vmatpush.msrb.mxu2 %v2795_v20  ;;  %v2999_v17 = vand.u32 4294901760, %v2998_v2  ;;  %2912 = vmatpush.msrb.mxu1 %v2760_v0 }
 0x771   :  { %2608 = vmatpush.msrb.mxu3 %v2607_v51  ;;  %v2577_v53 = vsub.f32 %v2575_v49, %v2576_v13  ;;  %v2932_v51 = vsel %vm988_vm2, %v2925_v26, 0 }
 0x772   :  { %2610 = vmatmul.f32.vlgmr.msrb.gmra.mxu3 %v2566_v30  ;;  %2676 = vmatmul.f32.gmra.mxu1 %v2576_v13 }
 0x773   :  { %2726 = vmatpush.msra.mxu3 %v7650_v40  ;;  %v2578_v54 = vand.u32 4294901760, %v2577_v53  ;;  %v2992_v40 = vsub.f32 %v7674_v34, %v2991_v4 }
 0x774   :  { %2645 = vmatmul.f32.gmra.mxu0 %v2575_v49 }
 0x775   :  { %2728 = vmatpush.msra.mxu3 %v2564_v38  ;;  %2579 = vmatmul.f32.gmra.mxu2 %v2578_v54  ;;  %v2993_v63 = vand.u32 4294901760, %v2992_v40  ;;  %v2958_v40 = vand.u32 4294901760, %v2932_v51 }
 0x777   :  { %2854 = vmatpush.msrb.mxu3 %v2760_v0 }
 0x77a   :  { %2614 = vmatmul.f32.gmra.mxu3 %v2574_v47 }
 0x77d   :  { %2703 = vmatmul.f32.vlgmr.msra.gmra.mxu2 %v2566_v30 }
 0x77e   :  { %2955 = vmatpush.xpose.msra.mxu2 %v7667_v12 }
 0x782   :  { %2957 = vmatpush.xpose.msra.mxu2 %v7671_v57  ;;  %2730 = vmatmul.f32.vlgmr.msra.gmra.mxu3 %v2566_v30 }
 0x783   :  { %2994 = vmatpush.xpose.msra.mxu3 %v2993_v63 }
 0x785   :  { %2707 = vmatmul.f32.gmra.mxu2 %v2574_v47 }
 0x787   :  { %3000 = vmatpush.xpose.msra.mxu3 %v2999_v17  ;;  %v2927_v17 = vpop.permute.xlu0 %2926 }
 0x78a   :  { %2734 = vmatmul.f32.gmra.mxu3 %v2574_v47 }
 0x7e7   :  { %v2671_v36 = vpop.f32.mrf.mxu1 }
 0x7e9   :  { %v2641_v43 = vpop.f32.mrf.mxu0 }
 0x7ef   :  { %v2677_v13 = vpop.f32.mrf.mxu1 }
 0x7f0   :  { %v2572_v24 = vpop.f32.mrf.mxu2 }
 0x7f1   :  { %v2646_v47 = vpop.f32.mrf.mxu0 }
 0x7f5   :  { %v2611_v38 = vpop.f32.mrf.mxu3 }
 0x7f6   :  { %v2612_v41 = vadd.f32 %v2611_v38, %v2572_v24  ;;  %v2959_v24 = vsub.f32 %v2932_v51, %v2958_v40 }
 0x7f8   :  { %v2580_v60 = vpop.f32.mrf.mxu2  ;;  %v2642_v9 = vadd.f32 %v2641_v43, %v2612_v41 }
 0x7fa   :  { %v2672_v44 = vadd.f32 %v2671_v36, %v2642_v9  ;;  %v2960_v36 = vand.u32 4294901760, %v2959_v24 }
 0x7fd   :  { %v2615_v7 = vpop.f32.mrf.mxu3 }
 0x7fe   :  { %v2616_v19 = vadd.f32 %v2615_v7, %v2580_v60  ;;  %v2934_v60 = vsel %vm988_vm2, %v2927_v17, 0 }
 0x7ff   :  { %v2966_v9 = vand.u32 4294901760, %v2934_v60 }
 0x800   :  { %v2704_v30 = vpop.f32.mrf.mxu2  ;;  %v2647_v20 = vadd.f32 %v2646_v47, %v2616_v19 }
 0x801   :  { %v2705_v49 = vadd.f32 %v2704_v30, %v2672_v44  ;;  %v2967_v19 = vsub.f32 %v2934_v60, %v2966_v9  ;;  %v2961_v44 = vsub.f32 %v2959_v24, %v2960_v36 }
 0x802   :  { %v2678_v54 = vadd.f32 %v2677_v13, %v2647_v20 }
 0x805   :  { %v2731_v25 = vpop.f32.mrf.mxu3 }
 0x806   :  { %v2732_v50 = vadd.f32 %v2731_v25, %v2705_v49  ;;  %v2968_v49 = vand.u32 4294901760, %v2967_v19 }
 0x808   :  { %v2740_v0 = vsel %vm988_vm2, %v2732_v50, 0  ;;  %v2708_v46 = vpop.f32.mrf.mxu2  ;;  %v2969_v47 = vsub.f32 %v2967_v19, %v2968_v49 }
 0x809   :  { %v2762_v53 = vand.u32 4294901760, %v2740_v0  ;;  %v2709_v2 = vadd.f32 %v2708_v46, %v2678_v54 }
 0x80b   :  { %v2763_v63 = vsub.f32 %v2740_v0, %v2762_v53  ;;  %2801 = vmatmul.f32.vlgmr.msra.gmra.mxu1 %v2762_v53 }
 0x80c   :  { %3056 = vmatpush.xpose.msra.mxu1 %v7667_v12 }
 0x80d   :  { %v2764_v21 = vand.u32 4294901760, %v2763_v63  ;;  %v2735_v22 = vpop.f32.mrf.mxu3  ;;  %2829 = vmatmul.f32.vlgmr.msrb.gmra.mxu2 %v2763_v63 }
 0x80e   :  { %v2736_v23 = vadd.f32 %v2735_v22, %v2709_v2  ;;  %3089 = vmatpush.xpose.msrb.mxu2 %v2991_v4 }
 0x80f   :  { %v2765_v38 = vsub.f32 %v2763_v63, %v2764_v21  ;;  %2858 = vmatmul.f32.vlgmr.msrb.gmra.mxu3 %v2764_v21 }
 0x810   :  { %v2743_v41 = vsel %vm988_vm2, %v2736_v23, 0  ;;  %3058 = vmatpush.xpose.msra.mxu1 %v7671_v57  ;;  %3118 = vmatpush.xpose.msrb.mxu3 %v7667_v12 }
 0x811   :  { %v2766_v43 = vand.u32 4294901760, %v2765_v38  ;;  %v2770_v7 = vand.u32 4294901760, %v2743_v41 }
 0x812   :  { %3093 = vmatpush.xpose.msrb.mxu2 %v2997_v27  ;;  %v2962_v27 = vand.u32 4294901760, %v2961_v44 }
 0x813   :  { %2767 = vmatmul.f32.vlgmr.msra.gmra.mxu0 %v2766_v43  ;;  %2805 = vmatmul.f32.gmra.mxu1 %v2770_v7  ;;  %v2771_v30 = vsub.f32 %v2743_v41, %v2770_v7 }
 0x814   :  { %3026 = vmatpush.xpose.msra.mxu0 %v7674_v34  ;;  %3120 = vmatpush.xpose.msrb.mxu3 %v7671_v57  ;;  %v2970_v34 = vand.u32 4294901760, %v2969_v47 }
 0x815   :  { %2834 = vmatmul.f32.gmra.mxu2 %v2771_v30  ;;  %v2772_v4 = vand.u32 4294901760, %v2771_v30 }
 0x817   :  { %2864 = vmatmul.f32.gmra.mxu3 %v2772_v4  ;;  %v2773_v26 = vsub.f32 %v2771_v30, %v2772_v4  ;;  %v6861_v4 = vld [vmem:[%s10094_s4 + $0x30] sm:$0xff] }
 0x818   :  { %3029 = vmatpush.xpose.msra.mxu0 %v7677_v52 }
 0x819   :  { %v2774_v12 = vand.u32 4294901760, %v2773_v26 }
 0x81b   :  { %2775 = vmatmul.f32.gmra.mxu0 %v2774_v12  ;;  %2914 = vmatmul.f32.vlgmr.msrb.gmra.mxu1 %v2762_v53 }
 0x81d   :  { %2963 = vmatmul.f32.vlgmr.msra.gmra.mxu2 %v2962_v27 }
 0x81f   :  { %3002 = vmatmul.f32.vlgmr.msra.gmra.mxu3 %v2958_v40 }
 0x823   :  { %2888 = vmatmul.f32.vlgmr.msrb.gmra.mxu0 %v2762_v53  ;;  %2918 = vmatmul.f32.gmra.mxu1 %v2770_v7 }
 0x825   :  { %2971 = vmatmul.f32.gmra.mxu2 %v2970_v34 }
 0x827   :  { %3006 = vmatmul.f32.gmra.mxu3 %v2966_v9 }
 0x82b   :  { %2892 = vmatmul.f32.gmra.mxu0 %v2770_v7  ;;  %3062 = vmatmul.f32.vlgmr.msra.gmra.mxu1 %v2960_v36 }
 0x82d   :  { %3095 = vmatmul.f32.vlgmr.msrb.gmra.mxu2 %v2958_v40 }
 0x82f   :  { %3122 = vmatmul.f32.vlgmr.msrb.gmra.mxu3 %v2958_v40 }
 0x833   :  { %3032 = vmatmul.f32.vlgmr.msra.gmra.mxu0 %v2959_v24  ;;  %3068 = vmatmul.f32.gmra.mxu1 %v2968_v49 }
 0x835   :  { %3099 = vmatmul.f32.gmra.mxu2 %v2966_v9 }
 0x837   :  { %3126 = vmatmul.f32.gmra.mxu3 %v2966_v9 }
 0x83b   :  { %3037 = vmatmul.f32.gmra.mxu0 %v2967_v19 }
 0x888   :  { %v7695_v57 = vpop.f32.mrf.mxu1 }
 0x889   :  { %10114 = vst [vmem:[#allocation20_spill] sm:$0xff] %v7695_v57 }
 0x890   :  { %v7697_v52 = vpop.f32.mrf.mxu0  ;;  %v7699_v25 = vpop.f32.mrf.mxu2 }
 0x891   :  { %10115 = vst [vmem:[#allocation21_spill] sm:$0xff] %v7697_v52  ;;  %v7701_v20 = vpop.f32.mrf.mxu1 }
 0x892   :  { %10116 = vst [vmem:[#allocation22_spill] sm:$0xff] %v7699_v25  ;;  %v7703_v50 = vpop.f32.mrf.mxu3 }
 0x893   :  { %10117 = vst [vmem:[#allocation23_spill] sm:$0xff] %v7701_v20 }
 0x894   :  { %10118 = vst [vmem:[#allocation24_spill] sm:$0xff] %v7703_v50 }
 0x898   :  { %v7705_v51 = vpop.f32.mrf.mxu0  ;;  %v7707_v0 = vpop.f32.mrf.mxu2 }
 0x899   :  { %10119 = vst [vmem:[#allocation25_spill] sm:$0xff] %v7705_v51  ;;  %v7711_v53 = vpop.f32.mrf.mxu1 }
 0x89a   :  { %10120 = vst [vmem:[#allocation26_spill] sm:$0xff] %v7707_v0  ;;  %v7709_v13 = vpop.f32.mrf.mxu3 }
 0x89b   :  { %10121 = vst [vmem:[#allocation27_spill] sm:$0xff] %v7709_v13 }
 0x89c   :  { %10122 = vst [vmem:[#allocation28_spill] sm:$0xff] %v7711_v53 }
 0x8a0   :  { %v7713_v46 = vpop.f32.mrf.mxu0  ;;  %v2964_v54 = vpop.f32.mrf.mxu2 }
 0x8a1   :  { %10123 = vst [vmem:[#allocation29_spill] sm:$0xff] %v7713_v46  ;;  %v7715_v63 = vpop.f32.mrf.mxu1 }
 0x8a2   :  { %v3003_v40 = vpop.f32.mrf.mxu3  ;;  %10124 = vst [vmem:[#allocation30_spill] sm:$0xff] %v7715_v63  ;;  %v3662_v63 = vld [vmem:[%s10126_s2 + $0x30] sm:$0xff] }
 0x8a3   :  { %v3004_v22 = vadd.f32 %v3003_v40, %v2964_v54  ;;  %v7852_v8 = vand.u32 4294901760, %v3662_v63 }
 0x8a8   :  { %v7717_v2 = vpop.f32.mrf.mxu0  ;;  %v2972_v17 = vpop.f32.mrf.mxu2 }
 0x8a9   :  { %10125 = vst [vmem:[#allocation31_spill] sm:$0xff] %v7717_v2  ;;  %v3063_v23 = vpop.f32.mrf.mxu1 }
 0x8aa   :  { %v3007_v21 = vpop.f32.mrf.mxu3 }
 0x8ab   :  { %v3008_v9 = vadd.f32 %v3007_v21, %v2972_v17  ;;  %v6862_v17 = vld [vmem:[%s10094_s4 + $0x38] sm:$0xff] }
 0x8b0   :  { %v3033_v24 = vpop.f32.mrf.mxu0  ;;  %v3096_v60 = vpop.f32.mrf.mxu2 }
 0x8b1   :  { %v3034_v38 = vadd.f32 %v3033_v24, %v3004_v22  ;;  %v3069_v26 = vpop.f32.mrf.mxu1 }
 0x8b2   :  { %v3123_v43 = vpop.f32.mrf.mxu3 }
 0x8b3   :  { %v3064_v41 = vadd.f32 %v3063_v23, %v3034_v38 }
 0x8b5   :  { %v3097_v7 = vadd.f32 %v3096_v60, %v3064_v41 }
 0x8b7   :  { %v3124_v36 = vadd.f32 %v3123_v43, %v3097_v7 }
 0x8b8   :  { %v3038_v30 = vpop.f32.mrf.mxu0  ;;  %v3100_v27 = vpop.f32.mrf.mxu2 }
 0x8b9   :  { %v3130_v19 = vmul.f32 0.35355338, %v3124_v36  ;;  %v3039_v44 = vadd.f32 %v3038_v30, %v3008_v9 }
 0x8ba   :  { %v3127_v54 = vpop.f32.mrf.mxu3 }
 0x8bb   :  { %v3070_v12 = vadd.f32 %v3069_v26, %v3039_v44  ;;  %v3135_v49 = vadd.f32 %v6861_v4, %v3130_v19 }
 0x8bd   :  { %v3101_v47 = vadd.f32 %v3100_v27, %v3070_v12  ;;  %v3137_v34 = vsel %vm1197_vm3, %v3135_v49, -inf }
 0x8be   :  { %3138 = vmax.xlane.f32.xlu2 %v3137_v34 }
 0x8bf   :  { %v3128_v40 = vadd.f32 %v3127_v54, %v3101_v47 }
 0x8c1   :  { %v3131_v21 = vmul.f32 0.35355338, %v3128_v40 }
 0x8c3   :  { %v3136_v22 = vadd.f32 %v6862_v17, %v3131_v21 }
 0x8c5   :  { %v3140_v23 = vsel %vm1197_vm3, %v3136_v22, -inf }
 0x8c6   :  { %3141 = vmax.xlane.f32.xlu1 %v3140_v23 }
 0x8df   :  { %3187 = vrot.lane.b32.xlu1 %v7442_v31, %s6936_s25 }
 0x931   :  { %v3139_v24 = vpop.xlane.xlu2 %3138 }
 0x932   :  { %v3143_v38 = vsub.f32 %v3135_v49, %v3139_v24 }
 0x934   :  { %v3145_v60 = vmul.f32 1.442695, %v3143_v38 }
 0x936   :  { %6910 = vpow2.f32 %v3145_v60 }
 0x939   :  { %v3142_v41 = vpop.xlane.xlu1 %3141 }
 0x93a   :  { %v3144_v43 = vsub.f32 %v3136_v22, %v3142_v41 }
 0x93c   :  { %v6911_v7 = vpop.eup %6910  ;;  %v3147_v9 = vmul.f32 1.442695, %v3144_v43 }
 0x93d   :  { %v3149_v36 = vsel %vm1197_vm3, %v6911_v7, 0.0 }
 0x93e   :  { %6912 = vpow2.f32 %v3147_v9  ;;  %3150 = vadd.xlane.f32.xlu0 %v3149_v36 }
 0x944   :  { %v6913_v30 = vpop.eup %6912 }
 0x945   :  { %v3152_v4 = vsel %vm1197_vm3, %v6913_v30, 0.0 }
 0x946   :  { %3153 = vadd.xlane.f32.xlu2 %v3152_v4 }
 0x951   :  { %v3188_v19 = vpop.permute.xlu1 %3187 }
 0x952   :  { %v7731_v44 = vand.u32 4294901760, %v3188_v19  ;;  %3185 = vrot.lane.b32.xlu0 %v7439_v1, %s6936_s25 }
 0x954   :  { %v3247_v31 = vsub.f32 %v3188_v19, %v7731_v44  ;;  %3212 = vmatpush.msrb.mxu0 %v7731_v44  ;;  %3313 = vmatpush.msra.mxu3 %v7731_v44 }
 0x956   :  { %v3248_v26 = vand.u32 4294901760, %v3247_v31  ;;  %3283 = vmatpush.msra.mxu2 %v3247_v31 }
 0x958   :  { %v3249_v12 = vsub.f32 %v3247_v31, %v3248_v26 }
 0x95a   :  { %v3250_v49 = vand.u32 4294901760, %v3249_v12 }
 0x95c   :  { %3251 = vmatpush.msrb.mxu1 %v3250_v49 }
 0x9b1   :  { %v3151_v27 = vpop.xlane.xlu0 %3150 }
 0x9b2   :  { %6914 = vrcp.f32 %v3151_v27  ;;  %v3166_v17 = vand.u32 2147483648, %v3151_v27  ;;  %v3164_v21 = vand.u32 2147483647, %v3151_v27  ;;  %vm3160_vm0 = vweird.f32 %v3151_v27 }
 0x9b4   :  { %v3167_v24 = vor.u32 1.1754944e-38, %v3166_v17  ;;  %vm3165_vm5 = vcmp.eq.f32.partialorder %v3164_v21, 8.507059e+37 }
 0x9b8   :  { %v6915_v47 = vpop.eup %6914 }
 0x9b9   :  { %v3156_v34 = vmul.f32 %v6915_v47, %v3151_v27  ;;  %v3154_v54 = vpop.xlane.xlu2 %3153  ;;  %vm3161_vm15 = vweird.f32 %v6915_v47 }
 0x9ba   :  { %6916 = vrcp.f32 %v3154_v54  ;;  %vm3162_vm4 = vmor %vm3160_vm0, %vm3161_vm15  ;;  %v3178_v36 = vand.u32 2147483647, %v3154_v54  ;;  %v3180_v4 = vand.u32 2147483648, %v3154_v54  ;;  %vm3174_vm7 = vweird.f32 %v3154_v54 }
 0x9bb   :  { %v3157_v40 = vsub.f32 1.0, %v3156_v34 }
 0x9bc   :  { %vm3179_vm9 = vcmp.eq.f32.partialorder %v3178_v36, 8.507059e+37 }
 0x9bd   :  { %v3158_v1 = vmul.f32 %v6915_v47, %v3157_v40 }
 0x9bf   :  { %v3159_v22 = vadd.f32 %v6915_v47, %v3158_v1 }
 0x9c0   :  { %v6917_v23 = vpop.eup %6916 }
 0x9c1   :  { %v3163_v38 = vsel %vm3162_vm4, %v6915_v47, %v3159_v22  ;;  %v3170_v60 = vmul.f32 %v6917_v23, %v3154_v54  ;;  %vm3175_vm6 = vweird.f32 %v6917_v23  ;;  %v3181_v47 = vor.u32 1.1754944e-38, %v3180_v4 }
 0x9c2   :  { %v3168_v41 = vsel %vm3165_vm5, %v3167_v24, %v3163_v38  ;;  %vm3176_vm8 = vmor %vm3174_vm7, %vm3175_vm6 }
 0x9c3   :  { %v3183_v43 = vmul.f32 %v6911_v7, %v3168_v41  ;;  %v3171_v9 = vsub.f32 1.0, %v3170_v60 }
 0x9c4   :  { %v3186_v19 = vpop.permute.xlu0 %3185 }
 0x9c5   :  { %v3172_v31 = vmul.f32 %v6917_v23, %v3171_v9  ;;  %v3213_v12 = vand.u32 4294901760, %v3186_v19  ;;  %v3192_v49 = vsel %vm1197_vm3, %v3183_v43, 0 }
 0x9c6   :  { %v3215_v34 = vand.u32 4294901760, %v3192_v49 }
 0x9c7   :  { %v3173_v40 = vadd.f32 %v6917_v23, %v3172_v31  ;;  %v3253_v27 = vsub.f32 %v3186_v19, %v3213_v12  ;;  %3214 = vmatpush.msrb.mxu0 %v3213_v12  ;;  %3315 = vmatpush.msra.mxu3 %v3213_v12  ;;  %v3387_v31 = vld [vmem:[%s10097_s5 + $0x18] sm:$0xff] }
 0x9c8   :  { %v3216_v17 = vsub.f32 %v3192_v49, %v3215_v34 }
 0x9c9   :  { %3346 = vmatpush.msra.mxu0 %v3248_v26  ;;  %3286 = vmatpush.msra.mxu2 %v3253_v27  ;;  %v3254_v7 = vand.u32 4294901760, %v3253_v27  ;;  %v3177_v1 = vsel %vm3176_vm8, %v6917_v23, %v3173_v40  ;;  %v3669_v40 = vld [vmem:[%s10126_s2 + $0x68] sm:$0xff]  ;;  %vm6290_vm8 = vcmask 523264  }
 0x9ca   :  { %3289 = vmatmul.f32.vlgmr.msra.gmra.mxu2 %v3216_v17  ;;  %v3217_v21 = vand.u32 4294901760, %v3216_v17  ;;  %v3182_v22 = vsel %vm3179_vm9, %v3181_v47, %v3177_v1  ;;  %v7763_v47 = vand.u32 4294901760, %v3669_v40  ;;  %v3668_v1 = vld [vmem:[%s10126_s2 + $0x60] sm:$0xff] }
 0x9cb   :  { %3350 = vmatpush.msra.mxu0 %v3254_v7  ;;  %v3255_v24 = vsub.f32 %v3253_v27, %v3254_v7  ;;  %v3184_v38 = vmul.f32 %v6913_v30, %v3182_v22  ;;  %v3671_v30 = vld [vmem:[%s10126_s2 + $0x78] sm:$0xff] }
 0x9cc   :  { %3319 = vmatmul.f32.vlgmr.msra.gmra.mxu3 %v3217_v21  ;;  %v3218_v60 = vsub.f32 %v3216_v17, %v3217_v21  ;;  %v7744_v19 = vand.u32 4294901760, %v3671_v30 }
 0x9cd   :  { %v3256_v54 = vand.u32 4294901760, %v3255_v24  ;;  %v3195_v41 = vsel %vm1197_vm3, %v3184_v38, 0  ;;  %v7778_v24 = vand.u32 4294901760, %v3668_v1  ;;  %v7781_v38 = vsub.f32 %v3669_v40, %v7763_v47  ;;  %v3665_v40 = vld [vmem:[%s10126_s2 + $0x48] sm:$0xff] }
 0x9ce   :  { %v3219_v43 = vand.u32 4294901760, %v3218_v60  ;;  %v3223_v9 = vand.u32 4294901760, %v3195_v41  ;;  %v3667_v60 = vld [vmem:[%s10126_s2 + $0x58] sm:$0xff] }
 0x9cf   :  { %3257 = vmatpush.msrb.mxu1 %v3256_v54 }
 0x9d0   :  { %3220 = vmatmul.f32.vlgmr.msrb.gmra.mxu0 %v3219_v43  ;;  %3259 = vmatmul.f32.vlgmr.msrb.gmra.mxu1 %v3215_v34  ;;  %v3224_v26 = vsub.f32 %v3195_v41, %v3223_v9  ;;  %v10027_v43 = vand.u32 4294901760, %v7781_v38 }
 0x9d1   :  { %3375 = vmatpush.msra.mxu1 %v7731_v44  ;;  %v3670_v44 = vld [vmem:[%s10126_s2 + $0x70] sm:$0xff] }
 0x9d2   :  { %3294 = vmatmul.f32.gmra.mxu2 %v3224_v26  ;;  %v3225_v23 = vand.u32 4294901760, %v3224_v26  ;;  %v7755_v49 = vand.u32 4294901760, %v3670_v44 }
 0x9d3   :  { %3377 = vmatpush.msra.mxu1 %v3213_v12  ;;  %v7753_v12 = vsub.f32 %v3671_v30, %v7744_v19 }
 0x9d4   :  { %3325 = vmatmul.f32.gmra.mxu3 %v3225_v23  ;;  %v3226_v36 = vsub.f32 %v3224_v26, %v3225_v23  ;;  %v7766_v17 = vsub.f32 %v3670_v44, %v7755_v49  ;;  %v7794_v26 = vsub.f32 %v3668_v1, %v7778_v24  ;;  %v3666_v23 = vld [vmem:[%s10126_s2 + $0x50] sm:$0xff] }
 0x9d5   :  { %v10029_v27 = vand.u32 4294901760, %v7753_v12  ;;  %v7803_v30 = vand.u32 4294901760, %v3666_v23 }
 0x9d6   :  { %v3227_v4 = vand.u32 4294901760, %v3226_v36  ;;  %v10028_v22 = vand.u32 4294901760, %v7766_v17 }
 0x9d7   :  { %v3808_v21 = vsub.f32 %v7753_v12, %v10029_v27 }
 0x9d8   :  { %3228 = vmatmul.f32.gmra.mxu0 %v3227_v4  ;;  %3263 = vmatmul.f32.gmra.mxu1 %v3223_v9  ;;  %v3814_v41 = vsub.f32 %v7766_v17, %v10028_v22  ;;  %v3820_v4 = vsub.f32 %v7781_v38, %v10027_v43  ;;  %v3664_v43 = vld [vmem:[%s10126_s2 + $0x40] sm:$0xff] }
 0x9d9   :  { %v3809_v54 = vand.u32 4294901760, %v3808_v21 }
 0x9da   :  { %v3815_v36 = vand.u32 4294901760, %v3814_v41  ;;  %v3821_v1 = vand.u32 4294901760, %v3820_v4  ;;  %v7817_v41 = vsub.f32 %v3666_v23, %v7803_v30  ;;  %v7830_v23 = vand.u32 4294901760, %v3664_v43 }
 0x9dc   :  { %v10034_v22 = vand.u32 4294901760, %v7817_v41 }
 0x9e0   :  { %3352 = vmatmul.f32.vlgmr.msra.gmra.mxu0 %v3215_v34  ;;  %3379 = vmatmul.f32.vlgmr.msra.gmra.mxu1 %v3215_v34  ;;  %v7757_v34 = vand.u32 4294901760, %v3387_v31 }
 0x9e2   :  { %v3444_v7 = vsub.f32 %v3387_v31, %v7757_v34  ;;  %3503 = vmatpush.msrb.mxu1 %v7757_v34  ;;  %3410 = vmatpush.msrb.mxu2 %v7757_v34  ;;  %v10031_v31 = vand.u32 4294901760, %v7794_v26 }
 0x9e4   :  { %3475 = vmatpush.msrb.mxu0 %v3444_v7  ;;  %3810 = vmatpush.msra.mxu1 %v3809_v54  ;;  %v7814_v54 = vand.u32 4294901760, %v3665_v40  ;;  %v3445_v4 = vand.u32 4294901760, %v3444_v7 }
 0x9e6   :  { %3757 = vmatpush.msra.mxu0 %v7744_v19  ;;  %3816 = vmatpush.msra.mxu1 %v3815_v36  ;;  %v7833_v55 = vsub.f32 %v3665_v40, %v7814_v54  ;;  %v3446_v18 = vsub.f32 %v3444_v7, %v3445_v4  ;;  %v7846_v40 = vsub.f32 %v3664_v43, %v7830_v23 }
 0x9e7   :  { %3535 = vmatpush.msra.mxu2 %v3445_v4  ;;  %v3661_v4 = vld [vmem:[%s10126_s2 + $0x28] sm:$0xff] }
 0x9e8   :  { %3356 = vmatmul.f32.gmra.mxu0 %v3223_v9  ;;  %3383 = vmatmul.f32.gmra.mxu1 %v3223_v9  ;;  %v7791_v9 = vand.u32 4294901760, %v3667_v60  ;;  %v3447_v7 = vand.u32 4294901760, %v3446_v18  ;;  %v10036_v43 = vand.u32 4294901760, %v7846_v40 }
 0x9e9   :  { %3759 = vmatpush.msra.mxu0 %v7755_v49  ;;  %3822 = vmatpush.msra.mxu1 %v3821_v1 }
 0x9ea   :  { %v7806_v44 = vsub.f32 %v3667_v60, %v7791_v9  ;;  %v3826_v60 = vsub.f32 %v7794_v26, %v10031_v31  ;;  %v3663_v31 = vld [vmem:[%s10126_s2 + $0x38] sm:$0xff]  ;;  %3448 = vmatpush.msrb.mxu3 %v3447_v7  ;;  %v3660_v7 = vld [vmem:[%s10126_s2 + $0x20] sm:$0xff] }
 0x9eb   :  { %3761 = vmatpush.msra.mxu0 %v7763_v47  ;;  %v7842_v35 = vand.u32 4294901760, %v3663_v31 }
 0x9ec   :  { %v10032_v21 = vand.u32 4294901760, %v7806_v44  ;;  %v3827_v27 = vand.u32 4294901760, %v3826_v60  ;;  %v10035_v60 = vand.u32 4294901760, %v7833_v55  ;;  %3561 = vmatpush.msra.mxu3 %v7757_v34  ;;  %v3659_v34 = vld [vmem:[%s10126_s2 + $0x18] sm:$0xff] }
 0x9ed   :  { %3763 = vmatpush.msra.mxu0 %v7778_v24  ;;  %v7896_v16 = vand.u32 4294901760, %v3659_v34 }
 0x9ee   :  { %v3832_v36 = vsub.f32 %v7806_v44, %v10032_v21  ;;  %v3838_v21 = vsub.f32 %v7817_v41, %v10034_v22  ;;  %3828 = vmatpush.msra.mxu1 %v3827_v27  ;;  %v7855_v22 = vsub.f32 %v3663_v31, %v7842_v35  ;;  %v3844_v27 = vsub.f32 %v7833_v55, %v10035_v60 }
 0x9ef   :  { %3765 = vmatpush.msra.mxu0 %v7791_v9  ;;  %v7869_v31 = vsub.f32 %v3662_v63, %v7852_v8  ;;  %v3850_v60 = vsub.f32 %v7846_v40, %v10036_v43  ;;  %v7911_v53 = vsub.f32 %v3659_v34, %v7896_v16  ;;  %v3656_v34 = vld [vmem:[%s10126_s2] sm:$0xff] }
 0x9f0   :  { %v3833_v1 = vand.u32 4294901760, %v3832_v36  ;;  %v3839_v36 = vand.u32 4294901760, %v3838_v21  ;;  %v10037_v18 = vand.u32 4294901760, %v7855_v22  ;;  %v7866_v21 = vand.u32 4294901760, %v3661_v4 }
 0x9f1   :  { %3767 = vmatpush.msra.mxu0 %v7803_v30  ;;  %v10038_v63 = vand.u32 4294901760, %v7869_v31  ;;  %v3851_v43 = vand.u32 4294901760, %v3850_v60  ;;  %v3658_v60 = vld [vmem:[%s10126_s2 + $0x10] sm:$0xff]  ;;  %v10041_v48 = vand.u32 4294901760, %v7911_v53  ;;  %v7935_v20 = vand.u32 4294901760, %v3656_v34 }
 0x9f2   :  { %3834 = vmatpush.msra.mxu1 %v3833_v1  ;;  %v3845_v1 = vand.u32 4294901760, %v3844_v27  ;;  %v3856_v2 = vsub.f32 %v7855_v22, %v10037_v18  ;;  %v7886_v27 = vsub.f32 %v3661_v4, %v7866_v21 }
 0x9f3   :  { %3769 = vmatpush.msra.mxu0 %v7814_v54  ;;  %v3862_v18 = vsub.f32 %v7869_v31, %v10038_v63  ;;  %v7908_v63 = vand.u32 4294901760, %v3658_v60 }
 0x9f4   :  { %3840 = vmatpush.msra.mxu1 %v3839_v36  ;;  %v7883_v36 = vand.u32 4294901760, %v3660_v7  ;;  %v3857_v13 = vand.u32 4294901760, %v3856_v2  ;;  %v10039_v15 = vand.u32 4294901760, %v7886_v27 }
 0x9f5   :  { %3771 = vmatpush.msra.mxu0 %v7830_v23  ;;  %v7922_v42 = vsub.f32 %v3658_v60, %v7908_v63 }
 0x9f6   :  { %3846 = vmatpush.msra.mxu1 %v3845_v1  ;;  %v7899_v4 = vsub.f32 %v3660_v7, %v7883_v36  ;;  %v3863_v1 = vand.u32 4294901760, %v3862_v18  ;;  %v3868_v2 = vsub.f32 %v7886_v27, %v10039_v15  ;;  %v3657_v7 = vld [vmem:[%s10126_s2 + $0x8] sm:$0xff] }
 0x9f7   :  { %3773 = vmatpush.msra.mxu0 %v7842_v35  ;;  %v7919_v15 = vand.u32 4294901760, %v3657_v7  ;;  %v10042_v46 = vand.u32 4294901760, %v7922_v42 }
 0x9f8   :  { %3852 = vmatpush.msra.mxu1 %v3851_v43  ;;  %v10040_v43 = vand.u32 4294901760, %v7899_v4  ;;  %v3869_v18 = vand.u32 4294901760, %v3868_v2  ;;  %v3880_v2 = vsub.f32 %v7911_v53, %v10041_v48  ;;  %v7946_v48 = vsub.f32 %v3656_v34, %v7935_v20 }
 0x9f9   :  { %3775 = vmatpush.msra.mxu0 %v7852_v8  ;;  %v7938_v60 = vsub.f32 %v3657_v7, %v7919_v15  ;;  %v3886_v51 = vsub.f32 %v7922_v42, %v10042_v46 }
 0x9fa   :  { %3858 = vmatpush.msra.mxu1 %v3857_v13  ;;  %v3874_v13 = vsub.f32 %v7899_v4, %v10040_v43  ;;  %v3881_v43 = vand.u32 4294901760, %v3880_v2 }
 0x9fb   :  { %3777 = vmatpush.msra.mxu0 %v7866_v21  ;;  %v10043_v33 = vand.u32 4294901760, %v7938_v60  ;;  %v3887_v50 = vand.u32 4294901760, %v3886_v51 }
 0x9fc   :  { %3864 = vmatpush.msra.mxu1 %v3863_v1  ;;  %v3875_v1 = vand.u32 4294901760, %v3874_v13 }
 0x9fd   :  { %3779 = vmatpush.msra.mxu0 %v7883_v36  ;;  %v3892_v7 = vsub.f32 %v7938_v60, %v10043_v33 }
 0x9fe   :  { %3870 = vmatpush.msra.mxu1 %v3869_v18  ;;  %v10044_v18 = vand.u32 4294901760, %v7946_v48 }
 0x9ff   :  { %3781 = vmatpush.msra.mxu0 %v7896_v16  ;;  %v3893_v14 = vand.u32 4294901760, %v3892_v7 }
 0xa00   :  { %3876 = vmatpush.msra.mxu1 %v3875_v1  ;;  %v3898_v34 = vsub.f32 %v7946_v48, %v10044_v18 }
 0xa01   :  { %3783 = vmatpush.msra.mxu0 %v7908_v63 }
 0xa02   :  { %3882 = vmatpush.msra.mxu1 %v3881_v43  ;;  %v3899_v51 = vand.u32 4294901760, %v3898_v34 }
 0xa03   :  { %3785 = vmatpush.msra.mxu0 %v7919_v15 }
 0xa04   :  { %3888 = vmatpush.msra.mxu1 %v3887_v50 }
 0xa05   :  { %3787 = vmatpush.msra.mxu0 %v7935_v20 }
 0xa06   :  { %3894 = vmatpush.msra.mxu1 %v3893_v14 }
 0xa08   :  { %3900 = vmatpush.msra.mxu1 %v3899_v51 }
 0xa4d   :  { %v3221_v0 = vpop.f32.mrf.mxu0  ;;  %v3260_v5 = vpop.f32.mrf.mxu1 }
 0xa4e   :  { %v3261_v13 = vadd.f32 %v3260_v5, %v3221_v0  ;;  %v3290_v2 = vpop.f32.mrf.mxu2 }
 0xa4f   :  { %v3320_v33 = vpop.f32.mrf.mxu3 }
 0xa50   :  { %v3291_v1 = vadd.f32 %v3290_v2, %v3261_v13  ;;  %v10129_v2 = vand.u32 4294901760, %v7781_v38 }
 0xa52   :  { %v3321_v5 = vadd.f32 %v3320_v33, %v3291_v1 }
 0xa55   :  { %v3229_v11 = vpop.f32.mrf.mxu0  ;;  %v3264_v46 = vpop.f32.mrf.mxu1 }
 0xa56   :  { %v3265_v0 = vadd.f32 %v3264_v46, %v3229_v11  ;;  %v3295_v37 = vpop.f32.mrf.mxu2 }
 0xa57   :  { %v3326_v45 = vpop.f32.mrf.mxu3 }
 0xa58   :  { %v3296_v57 = vadd.f32 %v3295_v37, %v3265_v0  ;;  %v10130_v0 = vand.u32 4294901760, %v7794_v26 }
 0xa5a   :  { %v3327_v50 = vadd.f32 %v3326_v45, %v3296_v57  ;;  %v10128_v57 = vand.u32 4294901760, %v7766_v17 }
 0xa5d   :  { %v3353_v43 = vpop.f32.mrf.mxu0  ;;  %v3380_v25 = vpop.f32.mrf.mxu1 }
 0xa5e   :  { %v3354_v29 = vadd.f32 %v3353_v43, %v3321_v5 }
 0xa60   :  { %v3381_v7 = vadd.f32 %v3380_v25, %v3354_v29  ;;  %v10127_v29 = vand.u32 4294901760, %v7753_v12 }
 0xa62   :  { %v3389_v52 = vsel %vm988_vm2, %v3381_v7, 0 }
 0xa63   :  { %v7959_v18 = vand.u32 4294901760, %v3389_v52 }
 0xa65   :  { %v3412_v34 = vsub.f32 %v3389_v52, %v7959_v18  ;;  %v3357_v13 = vpop.f32.mrf.mxu0  ;;  %3450 = vmatmul.f32.vlgmr.msrb.gmra.mxu3 %v7959_v18  ;;  %v3384_v11 = vpop.f32.mrf.mxu1 }
 0xa66   :  { %v3358_v14 = vadd.f32 %v3357_v13, %v3327_v50  ;;  %3970 = vmatpush.msrb.mxu3 %v7744_v19  ;;  %v3683_v13 = vld [vmem:[%s10126_s2 + $0xd8] sm:$0xff] }
 0xa67   :  { %v3413_v33 = vand.u32 4294901760, %v3412_v34  ;;  %3478 = vmatmul.f32.vlgmr.msrb.gmra.mxu0 %v3412_v34 }
 0xa68   :  { %v3385_v46 = vadd.f32 %v3384_v11, %v3358_v14  ;;  %3972 = vmatpush.msrb.mxu3 %v7755_v49  ;;  %4017 = vmatpush.msrb.mxu0 %v10127_v29  ;;  %v3644_v14 = vld [vmem:[%s10004_s0] sm:$0xff] }
 0xa69   :  { %v3414_v37 = vsub.f32 %v3412_v34, %v3413_v33  ;;  %3507 = vmatmul.f32.vlgmr.msrb.gmra.mxu1 %v3413_v33  ;;  %v3684_v34 = vld [vmem:[%s10126_s2 + $0xe0] sm:$0xff]  ;;  %v8052_v29 = vand.u32 4294901760, %v3644_v14 }
 0xa6a   :  { %v3392_v45 = vsel %vm988_vm2, %v3385_v46, 0  ;;  %3974 = vmatpush.msrb.mxu3 %v7763_v47  ;;  %4021 = vmatpush.msrb.mxu0 %v10128_v57  ;;  %v3682_v46 = vld [vmem:[%s10126_s2 + $0xd0] sm:$0xff] }
 0xa6b   :  { %v3415_v52 = vand.u32 4294901760, %v3414_v37  ;;  %v7971_v25 = vand.u32 4294901760, %v3392_v45  ;;  %4088 = vmatpush.msrb.mxu1 %v7744_v19  ;;  %v3687_v19 = vld [vmem:[%s10126_s2 + $0xf8] sm:$0xff]  ;;  %v3681_v37 = vld [vmem:[%s10126_s2 + $0xc8] sm:$0xff] }
 0xa6c   :  { %3976 = vmatpush.msrb.mxu3 %v7778_v24  ;;  %4025 = vmatpush.msrb.mxu0 %v10129_v2  ;;  %v7997_v43 = vand.u32 4294901760, %v3687_v19  ;;  %v8080_v2 = vsub.f32 %v3644_v14, %v8052_v29 }
 0xa6d   :  { %3416 = vmatmul.f32.vlgmr.msrb.gmra.mxu2 %v3415_v52  ;;  %3454 = vmatmul.f32.gmra.mxu3 %v7971_v25  ;;  %v3420_v51 = vsub.f32 %v3392_v45, %v7971_v25  ;;  %v8065_v45 = vand.u32 4294901760, %v3682_v46 }
 0xa6e   :  { %3912 = vmatpush.msrb.mxu2 %v7753_v12  ;;  %3978 = vmatpush.msrb.mxu3 %v7791_v9  ;;  %v3686_v12 = vld [vmem:[%s10126_s2 + $0xf0] sm:$0xff] }
 0xa6f   :  { %3483 = vmatmul.f32.gmra.mxu0 %v3420_v51  ;;  %v3421_v1 = vand.u32 4294901760, %v3420_v51  ;;  %4090 = vmatpush.msrb.mxu1 %v7755_v49  ;;  %v8005_v7 = vand.u32 4294901760, %v3686_v12 }
 0xa70   :  { %3915 = vmatpush.msrb.mxu2 %v7766_v17  ;;  %3980 = vmatpush.msrb.mxu3 %v7803_v30  ;;  %v10131_v17 = vand.u32 4294901760, %v7806_v44 }
 0xa71   :  { %3513 = vmatmul.f32.gmra.mxu1 %v3421_v1  ;;  %v3422_v5 = vsub.f32 %v3420_v51, %v3421_v1  ;;  %4029 = vmatpush.msrb.mxu0 %v10130_v0  ;;  %v8085_v51 = vand.u32 4294901760, %v3681_v37  ;;  %v10136_v1 = vand.u32 4294901760, %v7869_v31 }
 0xa72   :  { %3918 = vmatpush.msrb.mxu2 %v7781_v38  ;;  %3982 = vmatpush.msrb.mxu3 %v7814_v54  ;;  %v3685_v38 = vld [vmem:[%s10126_s2 + $0xe8] sm:$0xff] }
 0xa73   :  { %v3423_v49 = vand.u32 4294901760, %v3422_v5  ;;  %4092 = vmatpush.msrb.mxu1 %v7763_v47  ;;  %4033 = vmatpush.msrb.mxu0 %v10131_v17  ;;  %v10132_v47 = vand.u32 4294901760, %v7817_v41  ;;  %v8015_v50 = vand.u32 4294901760, %v3685_v38  ;;  %v8097_v5 = vsub.f32 %v3682_v46, %v8065_v45 }
 0xa74   :  { %3921 = vmatpush.msrb.mxu2 %v7794_v26  ;;  %3984 = vmatpush.msrb.mxu3 %v7830_v23  ;;  %v8013_v26 = vsub.f32 %v3687_v19, %v7997_v43  ;;  %v3790_v17 = vand.u32 4294901760, %v8080_v2 }
 0xa75   :  { %3424 = vmatmul.f32.gmra.mxu2 %v3423_v49  ;;  %3563 = vmatmul.f32.vlgmr.msra.gmra.mxu3 %v7959_v18  ;;  %v8043_v11 = vsub.f32 %v3685_v38, %v8015_v50  ;;  %v10050_v14 = vand.u32 4294901760, %v8097_v5 }
 0xa76   :  { %3924 = vmatpush.msrb.mxu2 %v7806_v44  ;;  %3986 = vmatpush.msrb.mxu3 %v7842_v35  ;;  %v8026_v44 = vsub.f32 %v3686_v12, %v8005_v7  ;;  %v4179_v33 = vand.u32 4294901760, %v8013_v26  ;;  %v10137_v12 = vand.u32 4294901760, %v7886_v27 }
 0xa77   :  { %4094 = vmatpush.msrb.mxu1 %v7778_v24  ;;  %4037 = vmatpush.msrb.mxu0 %v10132_v47  ;;  %v10133_v24 = vand.u32 4294901760, %v7833_v55  ;;  %v4191_v52 = vand.u32 4294901760, %v8043_v11  ;;  %v8115_v47 = vsub.f32 %v3681_v37, %v8085_v51 }
 0xa78   :  { %3927 = vmatpush.msrb.mxu2 %v7817_v41  ;;  %3988 = vmatpush.msrb.mxu3 %v7852_v8  ;;  %v8036_v41 = vand.u32 4294901760, %v3684_v34  ;;  %v4180_v57 = vsub.f32 %v8013_v26, %v4179_v33 }
 0xa79   :  { %4096 = vmatpush.msrb.mxu1 %v7791_v9  ;;  %4041 = vmatpush.msrb.mxu0 %v10133_v24  ;;  %v10134_v9 = vand.u32 4294901760, %v7846_v40 }
 0xa7a   :  { %3930 = vmatpush.msrb.mxu2 %v7833_v55  ;;  %3990 = vmatpush.msrb.mxu3 %v7866_v21  ;;  %v8050_v55 = vand.u32 4294901760, %v3683_v13  ;;  %v4181_v49 = vand.u32 4294901760, %v4180_v57 }
 0xa7b   :  { %4098 = vmatpush.msrb.mxu1 %v7803_v30  ;;  %4045 = vmatpush.msrb.mxu0 %v10134_v9  ;;  %v4185_v30 = vand.u32 4294901760, %v8026_v44 }
 0xa7c   :  { %3933 = vmatpush.msrb.mxu2 %v7846_v40  ;;  %3992 = vmatpush.msrb.mxu3 %v7883_v36  ;;  %v8063_v40 = vsub.f32 %v3684_v34, %v8036_v41 }
 0xa7d   :  { %3537 = vmatmul.f32.vlgmr.msra.gmra.mxu2 %v7959_v18  ;;  %3567 = vmatmul.f32.gmra.mxu3 %v7971_v25  ;;  %v10135_v18 = vand.u32 4294901760, %v7855_v22  ;;  %v4186_v19 = vsub.f32 %v8026_v44, %v4185_v30 }
 0xa7e   :  { %3936 = vmatpush.msrb.mxu2 %v7855_v22  ;;  %4100 = vmatpush.msrb.mxu1 %v7814_v54  ;;  %v3680_v54 = vld [vmem:[%s10126_s2 + $0xc0] sm:$0xff]  ;;  %v8083_v22 = vsub.f32 %v3683_v13, %v8050_v55 }
 0xa7f   :  { %3994 = vmatpush.msrb.mxu3 %v7896_v16  ;;  %4049 = vmatpush.msrb.mxu0 %v10135_v18  ;;  %v8099_v0 = vand.u32 4294901760, %v3680_v54  ;;  %v4187_v34 = vand.u32 4294901760, %v4186_v19  ;;  %v3791_v18 = vsub.f32 %v8080_v2, %v3790_v17  ;;  %v10140_v19 = vand.u32 4294901760, %v7922_v42 }
 0xa80   :  { %3939 = vmatpush.msrb.mxu2 %v7869_v31  ;;  %4102 = vmatpush.msrb.mxu1 %v7830_v23  ;;  %v4197_v23 = vand.u32 4294901760, %v8063_v40  ;;  %v3679_v31 = vld [vmem:[%s10126_s2 + $0xb8] sm:$0xff]  ;;  %v10057_v38 = vand.u32 4294901760, %v8083_v22 }
 0xa81   :  { %3996 = vmatpush.msrb.mxu3 %v7908_v63  ;;  %4053 = vmatpush.msrb.mxu0 %v10136_v1  ;;  %v8122_v24 = vand.u32 4294901760, %v3679_v31  ;;  %v8132_v9 = vsub.f32 %v3680_v54, %v8099_v0  ;;  %v10048_v54 = vand.u32 4294901760, %v8115_v47 }
 0xa82   :  { %3942 = vmatpush.msrb.mxu2 %v7886_v27  ;;  %4104 = vmatpush.msrb.mxu1 %v7842_v35  ;;  %v4192_v35 = vsub.f32 %v8043_v11, %v4191_v52  ;;  %v3678_v27 = vld [vmem:[%s10126_s2 + $0xb0] sm:$0xff]  ;;  %v4198_v13 = vsub.f32 %v8063_v40, %v4197_v23  ;;  %v4204_v57 = vsub.f32 %v8083_v22, %v10057_v38 }
 0xa83   :  { %3998 = vmatpush.msrb.mxu3 %v7919_v15  ;;  %4057 = vmatpush.msrb.mxu0 %v10137_v12  ;;  %v8138_v37 = vand.u32 4294901760, %v3678_v27 }
 0xa84   :  { %3945 = vmatpush.msrb.mxu2 %v7899_v4  ;;  %4106 = vmatpush.msrb.mxu1 %v7852_v8  ;;  %v10138_v8 = vand.u32 4294901760, %v7899_v4  ;;  %v4193_v46 = vand.u32 4294901760, %v4192_v35  ;;  %v10139_v4 = vand.u32 4294901760, %v7911_v53  ;;  %v4199_v12 = vand.u32 4294901760, %v4198_v13 }
 0xa85   :  { %3541 = vmatmul.f32.gmra.mxu2 %v7971_v25  ;;  %4000 = vmatpush.msrb.mxu3 %v7935_v20  ;;  %v3677_v25 = vld [vmem:[%s10126_s2 + $0xa8] sm:$0xff]  ;;  %v10046_v35 = vand.u32 4294901760, %v8132_v9  ;;  %v4205_v13 = vand.u32 4294901760, %v4204_v57 }
 0xa86   :  { %3948 = vmatpush.msrb.mxu2 %v7911_v53  ;;  %4061 = vmatpush.msrb.mxu0 %v10138_v8  ;;  %v8155_v53 = vsub.f32 %v3679_v31, %v8122_v24  ;;  %v8157_v1 = vand.u32 4294901760, %v3677_v25  ;;  %v8171_v31 = vsub.f32 %v3678_v27, %v8138_v37  ;;  %v3792_v8 = vand.u32 4294901760, %v3791_v18 }
 0xa87   :  { %4108 = vmatpush.msrb.mxu1 %v7866_v21  ;;  %4182 = vmatpush.msra.mxu3 %v4181_v49  ;;  %v3676_v21 = vld [vmem:[%s10126_s2 + $0xa0] sm:$0xff]  ;;  %v4210_v49 = vsub.f32 %v8097_v5, %v10050_v14  ;;  %v10142_v18 = vand.u32 4294901760, %v7946_v48 }
 0xa88   :  { %3951 = vmatpush.msrb.mxu2 %v7922_v42  ;;  %4065 = vmatpush.msrb.mxu0 %v10139_v4  ;;  %v10141_v42 = vand.u32 4294901760, %v7938_v60  ;;  %v4216_v4 = vsub.f32 %v8115_v47, %v10048_v54  ;;  %v10045_v27 = vand.u32 4294901760, %v8155_v53 }
 0xa89   :  { %4110 = vmatpush.msrb.mxu1 %v7883_v36  ;;  %4188 = vmatpush.msra.mxu3 %v4187_v34  ;;  %v3675_v36 = vld [vmem:[%s10126_s2 + $0x98] sm:$0xff]  ;;  %v8173_v34 = vand.u32 4294901760, %v3676_v21  ;;  %v4211_v57 = vand.u32 4294901760, %v4210_v49 }
 0xa8a   :  { %3954 = vmatpush.msrb.mxu2 %v7938_v60  ;;  %4069 = vmatpush.msrb.mxu0 %v10140_v19  ;;  %v8190_v60 = vand.u32 4294901760, %v3675_v36  ;;  %v4222_v19 = vsub.f32 %v8132_v9, %v10046_v35  ;;  %v4217_v49 = vand.u32 4294901760, %v4216_v4 }
 0xa8b   :  { %4112 = vmatpush.msrb.mxu1 %v7896_v16  ;;  %4194 = vmatpush.msra.mxu3 %v4193_v46  ;;  %v3674_v16 = vld [vmem:[%s10126_s2 + $0x90] sm:$0xff]  ;;  %v8188_v46 = vsub.f32 %v3677_v25, %v8157_v1  ;;  %v10047_v25 = vand.u32 4294901760, %v8171_v31 }
 0xa8c   :  { %3957 = vmatpush.msrb.mxu2 %v7946_v48  ;;  %4073 = vmatpush.msrb.mxu0 %v10141_v42  ;;  %v8206_v48 = vand.u32 4294901760, %v3674_v16  ;;  %v3672_v42 = vld [vmem:[%s10126_s2 + $0x80] sm:$0xff] }
 0xa8d   :  { %4114 = vmatpush.msrb.mxu1 %v7908_v63  ;;  %4200 = vmatpush.msra.mxu3 %v4199_v12  ;;  %v3673_v63 = vld [vmem:[%s10126_s2 + $0x88] sm:$0xff]  ;;  %v8204_v12 = vsub.f32 %v3676_v21, %v8173_v34  ;;  %v10049_v21 = vand.u32 4294901760, %v8188_v46  ;;  %v4234_v4 = vsub.f32 %v8171_v31, %v10047_v25 }
 0xa8e   :  { %4129 = vmatpush.msra.mxu2 %v7997_v43  ;;  %4077 = vmatpush.msrb.mxu0 %v10142_v18  ;;  %v8218_v18 = vsub.f32 %v3675_v36, %v8190_v60  ;;  %v8230_v35 = vsub.f32 %v3674_v16, %v8206_v48  ;;  %v8232_v36 = vand.u32 4294901760, %v3672_v42 }
 0xa8f   :  { %4116 = vmatpush.msrb.mxu1 %v7919_v15  ;;  %3793 = vmatmul.f32.vlgmr.msra.gmra.mxu0 %v3792_v8  ;;  %v4228_v15 = vsub.f32 %v8155_v53, %v10045_v27  ;;  %v8220_v8 = vand.u32 4294901760, %v3673_v63  ;;  %v10051_v27 = vand.u32 4294901760, %v8204_v12 }
 0xa90   :  { %4131 = vmatpush.msra.mxu2 %v8005_v7  ;;  %4206 = vmatpush.msra.mxu3 %v4205_v13  ;;  %v4223_v13 = vand.u32 4294901760, %v4222_v19  ;;  %v4240_v19 = vsub.f32 %v8188_v46, %v10049_v21  ;;  %v10052_v16 = vand.u32 4294901760, %v8218_v18  ;;  %v10053_v21 = vand.u32 4294901760, %v8230_v35 }
 0xa91   :  { %4284 = vmatpush.msra.mxu0 %v8013_v26  ;;  %4118 = vmatpush.msrb.mxu1 %v7935_v20  ;;  %v3650_v20 = vld [vmem:[%s10004_s0 + $0x30] sm:$0xff]  ;;  %v8245_v25 = vsub.f32 %v3673_v63, %v8220_v8  ;;  %v8257_v14 = vsub.f32 %v3672_v42, %v8232_v36 }
 0xa92   :  { %4133 = vmatpush.msra.mxu2 %v8015_v50  ;;  %4212 = vmatpush.msra.mxu3 %v4211_v57  ;;  %v4229_v57 = vand.u32 4294901760, %v4228_v15  ;;  %v8249_v54 = vand.u32 4294901760, %v3650_v20  ;;  %v4246_v15 = vsub.f32 %v8204_v12, %v10051_v27  ;;  %v4241_v63 = vand.u32 4294901760, %v4240_v19  ;;  %v3698_v26 = vld [vmem:[%s10126_s2 + $0x150] sm:$0xff] }
 0xa93   :  { %3902 = vmatmul.f32.vlgmr.msra.gmra.mxu1 %v8052_v29  ;;  %4287 = vmatpush.msra.mxu0 %v8026_v44  ;;  %v10054_v19 = vand.u32 4294901760, %v8257_v14 }
 0xa94   :  { %4135 = vmatpush.msra.mxu2 %v8036_v41  ;;  %4342 = vmatpush.msra.mxu1 %v7997_v43  ;;  %v8269_v42 = vsub.f32 %v3650_v20, %v8249_v54  ;;  %v4247_v27 = vand.u32 4294901760, %v4246_v15 }
 0xa95   :  { %4218 = vmatpush.msra.mxu3 %v4217_v49  ;;  %4290 = vmatpush.msra.mxu0 %v8043_v11  ;;  %v4235_v49 = vand.u32 4294901760, %v4234_v4  ;;  %v10055_v4 = vand.u32 4294901760, %v8245_v25 }
 0xa96   :  { %4137 = vmatpush.msra.mxu2 %v8050_v55  ;;  %4344 = vmatpush.msra.mxu1 %v8005_v7 }
 0xa97   :  { %4224 = vmatpush.msra.mxu3 %v4223_v13  ;;  %4293 = vmatpush.msra.mxu0 %v8063_v40  ;;  %v4252_v13 = vsub.f32 %v8218_v18, %v10052_v16  ;;  %v4264_v20 = vsub.f32 %v8245_v25, %v10055_v4  ;;  %v3700_v4 = vld [vmem:[%s10126_s2 + $0x160] sm:$0xff] }
 0xa98   :  { %4139 = vmatpush.msra.mxu2 %v8065_v45  ;;  %4346 = vmatpush.msra.mxu1 %v8015_v50 }
 0xa99   :  { %4230 = vmatpush.msra.mxu3 %v4229_v57  ;;  %4296 = vmatpush.msra.mxu0 %v8083_v22  ;;  %v4258_v57 = vsub.f32 %v8230_v35, %v10053_v21  ;;  %v4253_v16 = vand.u32 4294901760, %v4252_v13  ;;  %v4270_v21 = vsub.f32 %v8257_v14, %v10054_v19  ;;  %v3703_v13 = vld [vmem:[%s10126_s2 + $0x178] sm:$0xff] }
 0xa9a   :  { %4141 = vmatpush.msra.mxu2 %v8085_v51  ;;  %4348 = vmatpush.msra.mxu1 %v8036_v41 }
 0xa9b   :  { %4236 = vmatpush.msra.mxu3 %v4235_v49  ;;  %4299 = vmatpush.msra.mxu0 %v8097_v5  ;;  %v10056_v49 = vand.u32 4294901760, %v8269_v42  ;;  %v4259_v15 = vand.u32 4294901760, %v4258_v57  ;;  %v4271_v57 = vand.u32 4294901760, %v4270_v21  ;;  %v3701_v21 = vld [vmem:[%s10126_s2 + $0x168] sm:$0xff] }
 0xa9c   :  { %4143 = vmatpush.msra.mxu2 %v8099_v0  ;;  %4350 = vmatpush.msra.mxu1 %v8050_v55 }
 0xa9d   :  { %4242 = vmatpush.msra.mxu3 %v4241_v63  ;;  %4302 = vmatpush.msra.mxu0 %v8115_v47  ;;  %v4265_v63 = vand.u32 4294901760, %v4264_v20  ;;  %v8307_v20 = vand.u32 4294901760, %v3703_v13 }
 0xa9e   :  { %4145 = vmatpush.msra.mxu2 %v8122_v24  ;;  %4352 = vmatpush.msra.mxu1 %v8065_v45 }
 0xa9f   :  { %4248 = vmatpush.msra.mxu3 %v4247_v27  ;;  %4305 = vmatpush.msra.mxu0 %v8132_v9  ;;  %v3799_v27 = vsub.f32 %v8269_v42, %v10056_v49 }
 0xaa0   :  { %4147 = vmatpush.msra.mxu2 %v8138_v37  ;;  %4354 = vmatpush.msra.mxu1 %v8085_v51 }
 0xaa1   :  { %4254 = vmatpush.msra.mxu3 %v4253_v16  ;;  %4308 = vmatpush.msra.mxu0 %v8155_v53  ;;  %v3702_v16 = vld [vmem:[%s10126_s2 + $0x170] sm:$0xff]  ;;  %v3800_v19 = vand.u32 4294901760, %v3799_v27  ;;  %v8324_v27 = vand.u32 4294901760, %v3701_v21 }
 0xaa2   :  { %4149 = vmatpush.msra.mxu2 %v8157_v1  ;;  %4356 = vmatpush.msra.mxu1 %v8099_v0 }
 0xaa3   :  { %4260 = vmatpush.msra.mxu3 %v4259_v15  ;;  %4311 = vmatpush.msra.mxu0 %v8171_v31  ;;  %v8315_v15 = vand.u32 4294901760, %v3702_v16 }
 0xaa4   :  { %4151 = vmatpush.msra.mxu2 %v8173_v34  ;;  %4358 = vmatpush.msra.mxu1 %v8122_v24 }
 0xaa5   :  { %4266 = vmatpush.msra.mxu3 %v4265_v63  ;;  %4314 = vmatpush.msra.mxu0 %v8188_v46  ;;  %v8322_v63 = vsub.f32 %v3703_v13, %v8307_v20  ;;  %v3699_v13 = vld [vmem:[%s10126_s2 + $0x158] sm:$0xff] }
 0xaa6   :  { %4153 = vmatpush.msra.mxu2 %v8190_v60  ;;  %4360 = vmatpush.msra.mxu1 %v8138_v37 }
 0xaa7   :  { %4272 = vmatpush.msra.mxu3 %v4271_v57  ;;  %3960 = vmatmul.f32.vlgmr.msrb.gmra.mxu2 %v8080_v2  ;;  %v8334_v57 = vsub.f32 %v3702_v16, %v8315_v15  ;;  %v3645_v2 = vld [vmem:[%s10004_s0 + $0x8] sm:$0xff] }
 0xaa8   :  { %4155 = vmatpush.msra.mxu2 %v8206_v48  ;;  %4317 = vmatpush.msra.mxu0 %v8204_v12  ;;  %v3697_v16 = vld [vmem:[%s10126_s2 + $0x148] sm:$0xff] }
 0xaa9   :  { %4362 = vmatpush.msra.mxu1 %v8157_v1  ;;  %3801 = vmatmul.f32.gmra.mxu0 %v3800_v19  ;;  %v8342_v19 = vand.u32 4294901760, %v3700_v4  ;;  %v8389_v11 = vand.u32 4294901760, %v3697_v16 }
 0xaaa   :  { %4157 = vmatpush.msra.mxu2 %v8220_v8  ;;  %4004 = vmatmul.f32.vlgmr.msrb.gmra.mxu3 %v3790_v17  ;;  %v8351_v17 = vsub.f32 %v3701_v21, %v8324_v27  ;;  %v8367_v21 = vand.u32 4294901760, %v3645_v2 }
 0xaab   :  { %4460 = vmatpush.msrb.mxu3 %v7997_v43  ;;  %4320 = vmatpush.msra.mxu0 %v8218_v18  ;;  %v10058_v43 = vand.u32 4294901760, %v8322_v63  ;;  %v8373_v44 = vsub.f32 %v3700_v4, %v8342_v19  ;;  %v3694_v4 = vld [vmem:[%s10126_s2 + $0x130] sm:$0xff] }
 0xaac   :  { %4159 = vmatpush.msra.mxu2 %v8232_v36  ;;  %4364 = vmatpush.msra.mxu1 %v8173_v34  ;;  %v10060_v38 = vand.u32 4294901760, %v8351_v17 }
 0xaad   :  { %4462 = vmatpush.msrb.mxu3 %v8005_v7  ;;  %3906 = vmatmul.f32.gmra.mxu1 %v8249_v54  ;;  %v10059_v7 = vand.u32 4294901760, %v8334_v57  ;;  %v4552_v49 = vsub.f32 %v8322_v63, %v10058_v43 }
 0xaae   :  { %4389 = vmatpush.msrb.mxu2 %v4179_v33  ;;  %v8359_v33 = vand.u32 4294901760, %v3699_v13  ;;  %4323 = vmatpush.msra.mxu0 %v8230_v35 }
 0xaaf   :  { %4366 = vmatpush.msra.mxu1 %v8190_v60  ;;  %4464 = vmatpush.msrb.mxu3 %v8015_v50  ;;  %v4558_v40 = vsub.f32 %v8334_v57, %v10059_v7  ;;  %v4553_v43 = vand.u32 4294901760, %v4552_v49 }
 0xab0   :  { %4393 = vmatpush.msrb.mxu2 %v4185_v30  ;;  %v8375_v30 = vand.u32 4294901760, %v3698_v26  ;;  %4326 = vmatpush.msra.mxu0 %v8245_v25  ;;  %v8387_v50 = vsub.f32 %v3699_v13, %v8359_v33 }
 0xab1   :  { %4368 = vmatpush.msra.mxu1 %v8206_v48  ;;  %4466 = vmatpush.msrb.mxu3 %v8036_v41  ;;  %v10143_v41 = vand.u32 4294901760, %v8083_v22  ;;  %v3695_v22 = vld [vmem:[%s10126_s2 + $0x138] sm:$0xff]  ;;  %v4559_v49 = vand.u32 4294901760, %v4558_v40 }
 0xab2   :  { %4397 = vmatpush.msrb.mxu2 %v4191_v52  ;;  %v3696_v52 = vld [vmem:[%s10126_s2 + $0x140] sm:$0xff]  ;;  %4329 = vmatpush.msra.mxu0 %v8257_v14  ;;  %v8407_v13 = vsub.f32 %v3698_v26, %v8375_v30  ;;  %v8424_v26 = vsub.f32 %v3697_v16, %v8389_v11 }
 0xab3   :  { %4370 = vmatpush.msra.mxu1 %v8220_v8  ;;  %4079 = vmatmul.f32.vlgmr.msrb.gmra.mxu0 %v8052_v29  ;;  %v8414_v7 = vand.u32 4294901760, %v3696_v52 }
 0xab4   :  { %4401 = vmatpush.msrb.mxu2 %v4197_v23  ;;  %v8400_v23 = vsub.f32 %v3645_v2, %v8367_v21  ;;  %4468 = vmatpush.msrb.mxu3 %v8050_v55  ;;  %v4564_v2 = vsub.f32 %v8351_v17, %v10060_v38  ;;  %v8439_v55 = vand.u32 4294901760, %v3695_v22 }
 0xab5   :  { %4501 = vmatpush.msrb.mxu0 %v8307_v20  ;;  %4372 = vmatpush.msra.mxu1 %v8232_v36 }
 0xab6   :  { %4405 = vmatpush.msrb.mxu2 %v10143_v41  ;;  %v10144_v41 = vand.u32 4294901760, %v8097_v5  ;;  %4120 = vmatmul.f32.vlgmr.msrb.gmra.mxu1 %v8052_v29  ;;  %v10145_v5 = vand.u32 4294901760, %v8115_v47  ;;  %v4565_v40 = vand.u32 4294901760, %v4564_v2  ;;  %v8446_v47 = vsub.f32 %v3696_v52, %v8414_v7 }
 0xab7   :  { %4470 = vmatpush.msrb.mxu3 %v8065_v45  ;;  %4503 = vmatpush.msrb.mxu0 %v8315_v15  ;;  %v3651_v45 = vld [vmem:[%s10004_s0 + $0x38] sm:$0xff]  ;;  %v10148_v29 = vand.u32 4294901760, %v8387_v50  ;;  %v10149_v52 = vand.u32 4294901760, %v8400_v23 }
 0xab8   :  { %4409 = vmatpush.msrb.mxu2 %v10144_v41  ;;  %v10146_v41 = vand.u32 4294901760, %v8373_v44  ;;  %4554 = vmatpush.msrb.mxu1 %v4553_v43  ;;  %v8464_v39 = vand.u32 4294901760, %v3651_v45 }
 0xab9   :  { %4472 = vmatpush.msrb.mxu3 %v8085_v51  ;;  %4505 = vmatpush.msrb.mxu0 %v8324_v27  ;;  %v4576_v38 = vsub.f32 %v8387_v50, %v10148_v29  ;;  %v8458_v51 = vand.u32 4294901760, %v3694_v4  ;;  %v4163_v2 = vsub.f32 %v8400_v23, %v10149_v52  ;;  %v10151_v29 = vand.u32 4294901760, %v8407_v13  ;;  %v3692_v52 = vld [vmem:[%s10126_s2 + $0x120] sm:$0xff] }
 0xaba   :  { %4413 = vmatpush.msrb.mxu2 %v10145_v5  ;;  %v4570_v16 = vsub.f32 %v8373_v44, %v10146_v41  ;;  %v3693_v5 = vld [vmem:[%s10126_s2 + $0x128] sm:$0xff]  ;;  %v10147_v41 = vand.u32 4294901760, %v8132_v9  ;;  %4560 = vmatpush.msrb.mxu1 %v4559_v49  ;;  %v10150_v9 = vand.u32 4294901760, %v8155_v53  ;;  %v8473_v49 = vsub.f32 %v3695_v22, %v8439_v55 }
 0xabb   :  { %3965 = vmatmul.f32.gmra.mxu2 %v8269_v42  ;;  %4474 = vmatpush.msrb.mxu3 %v8099_v0  ;;  %v4582_v43 = vsub.f32 %v8407_v13, %v10151_v29  ;;  %v8475_v10 = vand.u32 4294901760, %v3693_v5  ;;  %v4593_v53 = vand.u32 4294901760, %v8446_v47  ;;  %v10152_v0 = vand.u32 4294901760, %v8269_v42 }
 0xabc   :  { %4417 = vmatpush.msrb.mxu2 %v10147_v41  ;;  %v4571_v41 = vand.u32 4294901760, %v4570_v16  ;;  %4507 = vmatpush.msrb.mxu0 %v8342_v19  ;;  %v10153_v16 = vand.u32 4294901760, %v8171_v31  ;;  %v10154_v22 = vand.u32 4294901760, %v8424_v26  ;;  %v8490_v32 = vsub.f32 %v3694_v4, %v8458_v51 }
 0xabd   :  { %4566 = vmatpush.msrb.mxu1 %v4565_v40  ;;  %4010 = vmatmul.f32.gmra.mxu3 %v10152_v0  ;;  %v8495_v40 = vsub.f32 %v3651_v45, %v8464_v39  ;;  %v8497_v42 = vand.u32 4294901760, %v3692_v52  ;;  %v10155_v31 = vand.u32 4294901760, %v8188_v46  ;;  %v4583_v0 = vand.u32 4294901760, %v4582_v43  ;;  %v3690_v46 = vld [vmem:[%s10126_s2 + $0x110] sm:$0xff] }
 0xabe   :  { %4421 = vmatpush.msrb.mxu2 %v10150_v9  ;;  %v4577_v9 = vand.u32 4294901760, %v4576_v38  ;;  %v4588_v29 = vsub.f32 %v8424_v26, %v10154_v22  ;;  %4476 = vmatpush.msrb.mxu3 %v8122_v24  ;;  %v3691_v38 = vld [vmem:[%s10126_s2 + $0x118] sm:$0xff]  ;;  %v4164_v4 = vand.u32 4294901760, %v4163_v2  ;;  %v8506_v24 = vsub.f32 %v3693_v5, %v8475_v10 }
 0xabf   :  { %4509 = vmatpush.msrb.mxu0 %v8359_v33  ;;  %4572 = vmatpush.msrb.mxu1 %v4571_v41  ;;  %v4594_v45 = vsub.f32 %v8446_v47, %v4593_v53  ;;  %v10156_v43 = vand.u32 4294901760, %v8204_v12  ;;  %v10061_v5 = vand.u32 4294901760, %v8490_v32  ;;  %v8519_v41 = vand.u32 4294901760, %v3691_v38 }
 0xac0   :  { %4425 = vmatpush.msrb.mxu2 %v10153_v16  ;;  %v10062_v16 = vand.u32 4294901760, %v8473_v49  ;;  %4478 = vmatpush.msrb.mxu3 %v8138_v37  ;;  %v4589_v2 = vand.u32 4294901760, %v4588_v29  ;;  %v4170_v37 = vand.u32 4294901760, %v8495_v40  ;;  %v8525_v22 = vsub.f32 %v3692_v52, %v8497_v42 }
 0xac1   :  { %4511 = vmatpush.msrb.mxu0 %v8375_v30  ;;  %4578 = vmatpush.msrb.mxu1 %v4577_v9  ;;  %v3689_v9 = vld [vmem:[%s10126_s2 + $0x108] sm:$0xff]  ;;  %v4611_v29 = vand.u32 4294901760, %v8506_v24  ;;  %v4595_v52 = vand.u32 4294901760, %v4594_v45 }
 0xac2   :  { %4429 = vmatpush.msrb.mxu2 %v10155_v31  ;;  %4480 = vmatpush.msrb.mxu3 %v8157_v1  ;;  %v4600_v12 = vsub.f32 %v8473_v49, %v10062_v16  ;;  %v8534_v1 = vand.u32 4294901760, %v3690_v46  ;;  %v10157_v31 = vand.u32 4294901760, %v8218_v18  ;;  %v3688_v18 = vld [vmem:[%s10126_s2 + $0x100] sm:$0xff]  ;;  %v4617_v45 = vand.u32 4294901760, %v8525_v22 }
 0xac3   :  { %4513 = vmatpush.msrb.mxu0 %v8389_v11  ;;  %4584 = vmatpush.msrb.mxu1 %v4583_v0  ;;  %v4606_v0 = vsub.f32 %v8490_v32, %v10061_v5  ;;  %v8567_v16 = vand.u32 4294901760, %v3688_v18 }
 0xac4   :  { %4433 = vmatpush.msrb.mxu2 %v10156_v43  ;;  %4482 = vmatpush.msrb.mxu3 %v8173_v34  ;;  %v8546_v43 = vand.u32 4294901760, %v3689_v9  ;;  %v4171_v34 = vsub.f32 %v8495_v40, %v4170_v37  ;;  %v8564_v5 = vsub.f32 %v3690_v46, %v8534_v1 }
 0xac5   :  { %4165 = vmatmul.f32.vlgmr.msra.gmra.mxu2 %v4164_v4  ;;  %4515 = vmatpush.msrb.mxu0 %v8414_v7  ;;  %v8544_v4 = vsub.f32 %v3691_v38, %v8519_v41  ;;  %v4601_v38 = vand.u32 4294901760, %v4600_v12 }
 0xac6   :  { %4437 = vmatpush.msrb.mxu2 %v10157_v31  ;;  %4590 = vmatpush.msrb.mxu1 %v4589_v2  ;;  %v10158_v2 = vand.u32 4294901760, %v8230_v35  ;;  %v4612_v31 = vsub.f32 %v8506_v24, %v4611_v29  ;;  %v10159_v35 = vand.u32 4294901760, %v8245_v25  ;;  %v8574_v12 = vsub.f32 %v3689_v9, %v8546_v43 }
 0xac7   :  { %4083 = vmatmul.f32.gmra.mxu0 %v8249_v54  ;;  %4274 = vmatmul.f32.vlgmr.msra.gmra.mxu3 %v8367_v21  ;;  %v4172_v46 = vand.u32 4294901760, %v4171_v34 }
 0xac8   :  { %4441 = vmatpush.msrb.mxu2 %v10158_v2  ;;  %4484 = vmatpush.msrb.mxu3 %v8190_v60  ;;  %v4607_v2 = vand.u32 4294901760, %v4606_v0  ;;  %v4623_v60 = vand.u32 4294901760, %v8544_v4  ;;  %v4613_v25 = vand.u32 4294901760, %v4612_v31  ;;  %v4629_v0 = vand.u32 4294901760, %v8564_v5 }
 0xac9   :  { %4517 = vmatpush.msrb.mxu0 %v8439_v55  ;;  %4596 = vmatpush.msrb.mxu1 %v4595_v52  ;;  %v4618_v52 = vsub.f32 %v8525_v22, %v4617_v45 }
 0xaca   :  { %4124 = vmatmul.f32.gmra.mxu1 %v8249_v54  ;;  %4445 = vmatpush.msrb.mxu2 %v10159_v35  ;;  %v10160_v54 = vand.u32 4294901760, %v8257_v14  ;;  %v4624_v9 = vsub.f32 %v8544_v4, %v4623_v60  ;;  %v4635_v14 = vand.u32 4294901760, %v8574_v12 }
 0xacb   :  { %4486 = vmatpush.msrb.mxu3 %v8206_v48  ;;  %4519 = vmatpush.msrb.mxu0 %v8458_v51  ;;  %v8587_v48 = vsub.f32 %v3688_v18, %v8567_v16  ;;  %v4619_v34 = vand.u32 4294901760, %v4618_v52  ;;  %v4630_v18 = vsub.f32 %v8564_v5, %v4629_v0 }
 0xacc   :  { %4602 = vmatpush.msrb.mxu1 %v4601_v38  ;;  %4449 = vmatpush.msrb.mxu2 %v10160_v54  ;;  %v4636_v31 = vsub.f32 %v8574_v12, %v4635_v14 }
 0xacd   :  { %4488 = vmatpush.msrb.mxu3 %v8220_v8  ;;  %4521 = vmatpush.msrb.mxu0 %v8475_v10  ;;  %v3646_v8 = vld [vmem:[%s10004_s0 + $0x10] sm:$0xff]  ;;  %v4641_v38 = vand.u32 4294901760, %v8587_v48 }
 0xace   :  { %4608 = vmatpush.msrb.mxu1 %v4607_v2  ;;  %4656 = vmatpush.msra.mxu2 %v8322_v63  ;;  %v8610_v35 = vand.u32 4294901760, %v3646_v8  ;;  %v4631_v2 = vand.u32 4294901760, %v4630_v18  ;;  %v4637_v54 = vand.u32 4294901760, %v4636_v31  ;;  %v10163_v18 = vand.u32 4294901760, %v8334_v57 }
 0xacf   :  { %4173 = vmatmul.f32.gmra.mxu2 %v4172_v46  ;;  %4490 = vmatpush.msrb.mxu3 %v8232_v36  ;;  %v4625_v36 = vand.u32 4294901760, %v4624_v9  ;;  %v10161_v46 = vand.u32 4294901760, %v8400_v23  ;;  %v4642_v52 = vsub.f32 %v8587_v48, %v4641_v38 }
 0xad0   :  { %4523 = vmatpush.msrb.mxu0 %v8497_v42  ;;  %4614 = vmatpush.msrb.mxu1 %v4613_v25  ;;  %v8623_v25 = vsub.f32 %v3646_v8, %v8610_v35 }
 0xad1   :  { %4659 = vmatpush.msra.mxu2 %v8334_v57  ;;  %4714 = vmatpush.msra.mxu3 %v8307_v20  ;;  %v3719_v57 = vld [vmem:[%s10126_s2 + $0x1f8] sm:$0xff] }
 0xad2   :  { %4278 = vmatmul.f32.gmra.mxu3 %v8464_v39  ;;  %4332 = vmatmul.f32.vlgmr.msra.gmra.mxu0 %v8400_v23  ;;  %v4643_v23 = vand.u32 4294901760, %v4642_v52  ;;  %v4534_v9 = vand.u32 4294901760, %v8623_v25 }
 0xad3   :  { %4525 = vmatpush.msrb.mxu0 %v8519_v41  ;;  %4620 = vmatpush.msrb.mxu1 %v4619_v34  ;;  %v10162_v34 = vand.u32 4294901760, %v8322_v63  ;;  %v3652_v63 = vld [vmem:[%s10004_s0 + $0x40] sm:$0xff] }
 0xad4   :  { %4662 = vmatpush.msra.mxu2 %v8351_v17  ;;  %4716 = vmatpush.msra.mxu3 %v8315_v15  ;;  %v4535_v8 = vsub.f32 %v8623_v25, %v4534_v9 }
 0xad5   :  { %4376 = vmatmul.f32.vlgmr.msra.gmra.mxu1 %v10161_v46  ;;  %4527 = vmatpush.msrb.mxu0 %v8534_v1 }
 0xad6   :  { %4626 = vmatpush.msrb.mxu1 %v4625_v36  ;;  %4665 = vmatpush.msra.mxu2 %v8373_v44  ;;  %v10166_v36 = vand.u32 4294901760, %v8387_v50 }
 0xad7   :  { %4718 = vmatpush.msra.mxu3 %v8324_v27  ;;  %4529 = vmatpush.msrb.mxu0 %v8546_v43 }
 0xad8   :  { %4632 = vmatpush.msrb.mxu1 %v4631_v2  ;;  %4668 = vmatpush.msra.mxu2 %v8387_v50  ;;  %v10167_v50 = vand.u32 4294901760, %v8407_v13 }
 0xad9   :  { %4720 = vmatpush.msra.mxu3 %v8342_v19  ;;  %4451 = vmatmul.f32.vlgmr.msrb.gmra.mxu2 %v8367_v21 }
 0xada   :  { %4531 = vmatpush.msrb.mxu0 %v8567_v16  ;;  %4638 = vmatpush.msrb.mxu1 %v4637_v54 }
 0xadb   :  { %4671 = vmatpush.msra.mxu2 %v8407_v13  ;;  %4722 = vmatpush.msra.mxu3 %v8359_v33  ;;  %v10168_v13 = vand.u32 4294901760, %v8424_v26 }
 0xadc   :  { %4761 = vmatpush.msra.mxu0 %v10162_v34  ;;  %4492 = vmatmul.f32.vlgmr.msrb.gmra.mxu3 %v8367_v21  ;;  %v10164_v21 = vand.u32 4294901760, %v8351_v17  ;;  %v8667_v17 = vand.u32 4294901760, %v3719_v57 }
 0xadd   :  { %4337 = vmatmul.f32.gmra.mxu0 %v8495_v40  ;;  %4644 = vmatpush.msrb.mxu1 %v4643_v23  ;;  %v10165_v40 = vand.u32 4294901760, %v8373_v44  ;;  %v1973_v44 = vadd.f32 %v7586_v59, %v7588_v6  ;;  %v3716_v6 = vld [vmem:[%s10126_s2 + $0x1e0] sm:$0xff] }
 0xade   :  { %4674 = vmatpush.msra.mxu2 %v8424_v26  ;;  %4724 = vmatpush.msra.mxu3 %v8375_v30  ;;  %v8692_v59 = vsub.f32 %v3719_v57, %v8667_v17  ;;  %v8711_v54 = vand.u32 4294901760, %v3716_v6  ;;  %v3712_v57 = vld [vmem:[%s10126_s2 + $0x1c0] sm:$0xff] }
 0xadf   :  { %4765 = vmatpush.msra.mxu0 %v10163_v18  ;;  %4832 = vmatpush.msra.mxu1 %v8307_v20  ;;  %v4536_v20 = vand.u32 4294901760, %v4535_v8  ;;  %v2001_v46 = vadd.f32 %v7592_v28, %v1973_v44  ;;  %v3715_v28 = vld [vmem:[%s10126_s2 + $0x1d8] sm:$0xff]  ;;  %v3714_v8 = vld [vmem:[%s10126_s2 + $0x1d0] sm:$0xff] }
 0xae0   :  { %4382 = vmatmul.f32.gmra.mxu1 %v4170_v37  ;;  %4677 = vmatpush.msra.mxu2 %v8446_v47  ;;  %v8663_v37 = vand.u32 4294901760, %v3652_v63  ;;  %v4923_v26 = vand.u32 4294901760, %v8692_v59  ;;  %v8728_v34 = vand.u32 4294901760, %v3715_v28  ;;  %v10169_v47 = vand.u32 4294901760, %v8473_v49 }
 0xae1   :  { %4726 = vmatpush.msra.mxu3 %v8389_v11  ;;  %4769 = vmatpush.msra.mxu0 %v10164_v21  ;;  %v2030_v23 = vadd.f32 %v7594_v3, %v2001_v46  ;;  %v3713_v21 = vld [vmem:[%s10126_s2 + $0x1c8] sm:$0xff]  ;;  %v3710_v46 = vld [vmem:[%s10126_s2 + $0x1b0] sm:$0xff] }
 0xae2   :  { %4834 = vmatpush.msra.mxu1 %v8315_v15  ;;  %4680 = vmatpush.msra.mxu2 %v8473_v49  ;;  %v3718_v15 = vld [vmem:[%s10126_s2 + $0x1f0] sm:$0xff]  ;;  %v8684_v31 = vsub.f32 %v3652_v63, %v8663_v37  ;;  %v4924_v49 = vsub.f32 %v8692_v59, %v4923_v26 }
 0xae3   :  { %4728 = vmatpush.msra.mxu3 %v8414_v7  ;;  %4773 = vmatpush.msra.mxu0 %v10165_v40  ;;  %v8686_v2 = vand.u32 4294901760, %v3718_v15  ;;  %v2060_v18 = vadd.f32 %v7604_v58, %v2030_v23  ;;  %v8760_v58 = vand.u32 4294901760, %v3714_v8  ;;  %v8777_v40 = vand.u32 4294901760, %v3713_v21 }
 0xae4   :  { %4836 = vmatpush.msra.mxu1 %v8324_v27  ;;  %4683 = vmatpush.msra.mxu2 %v8490_v32  ;;  %v3717_v27 = vld [vmem:[%s10126_s2 + $0x1e8] sm:$0xff] }
 0xae5   :  { %4730 = vmatpush.msra.mxu3 %v8439_v55  ;;  %4777 = vmatpush.msra.mxu0 %v10166_v36  ;;  %v8709_v52 = vsub.f32 %v3718_v15, %v8686_v2  ;;  %v10171_v36 = vld [vmem:[#allocation4_spill] sm:$0xff] }
 0xae6   :  { %4838 = vmatpush.msra.mxu1 %v8342_v19  ;;  %4537 = vmatmul.f32.vlgmr.msrb.gmra.mxu0 %v4536_v20  ;;  %v8699_v19 = vand.u32 4294901760, %v3717_v27  ;;  %v2086_v44 = vadd.f32 %v10171_v36, %v2060_v18  ;;  %v3709_v18 = vld [vmem:[%s10126_s2 + $0x1a8] sm:$0xff]  ;;  %v3708_v36 = vld [vmem:[%s10126_s2 + $0x1a0] sm:$0xff] }
 0xae7   :  { %4686 = vmatpush.msra.mxu2 %v8506_v24  ;;  %4732 = vmatpush.msra.mxu3 %v8458_v51  ;;  %v4929_v3 = vand.u32 4294901760, %v8709_v52  ;;  %v3711_v24 = vld [vmem:[%s10126_s2 + $0x1b8] sm:$0xff] }
 0xae8   :  { %4781 = vmatpush.msra.mxu0 %v10167_v50  ;;  %4840 = vmatpush.msra.mxu1 %v8359_v33  ;;  %v4542_v33 = vand.u32 4294901760, %v8684_v31  ;;  %v8794_v50 = vand.u32 4294901760, %v3712_v57 }
 0xae9   :  { %4646 = vmatmul.f32.vlgmr.msrb.gmra.mxu1 %v8610_v35  ;;  %4689 = vmatpush.msra.mxu2 %v8525_v22  ;;  %v4930_v20 = vsub.f32 %v8709_v52, %v4929_v3  ;;  %v8809_v22 = vsub.f32 %v3713_v21, %v8777_v40 }
 0xaea   :  { %4734 = vmatpush.msra.mxu3 %v8475_v10  ;;  %4785 = vmatpush.msra.mxu0 %v10168_v13 }
 0xaeb   :  { %4842 = vmatpush.msra.mxu1 %v8375_v30  ;;  %4455 = vmatmul.f32.gmra.mxu2 %v8464_v39  ;;  %v8723_v30 = vsub.f32 %v3717_v27, %v8699_v19  ;;  %v4925_v27 = vand.u32 4294901760, %v4924_v49  ;;  %v4931_v13 = vand.u32 4294901760, %v4930_v20  ;;  %v10174_v49 = vld [vmem:[#allocation9_spill] sm:$0xff]  ;;  %v10066_v20 = vand.u32 4294901760, %v8809_v22 }
 0xaec   :  { %4692 = vmatpush.msra.mxu2 %v8544_v4  ;;  %4736 = vmatpush.msra.mxu3 %v8497_v42 }
 0xaed   :  { %4789 = vmatpush.msra.mxu0 %v4593_v53  ;;  %4844 = vmatpush.msra.mxu1 %v8389_v11  ;;  %v4543_v11 = vsub.f32 %v8684_v31, %v4542_v33  ;;  %v1977_v53 = vadd.f32 %v7590_v61, %v7596_v56  ;;  %v10170_v61 = vand.u32 4294901760, %v8490_v32  ;;  %v4935_v56 = vand.u32 4294901760, %v8723_v30 }
 0xaee   :  { %4496 = vmatmul.f32.gmra.mxu3 %v8464_v39  ;;  %4695 = vmatpush.msra.mxu2 %v8564_v5  ;;  %v8741_v39 = vsub.f32 %v3716_v6, %v8711_v54 }
 0xaef   :  { %4738 = vmatpush.msra.mxu3 %v8519_v41  ;;  %4793 = vmatpush.msra.mxu0 %v10169_v47  ;;  %v4544_v32 = vand.u32 4294901760, %v4543_v11  ;;  %v2006_v15 = vadd.f32 %v7600_v62, %v1977_v53  ;;  %v8792_v62 = vsub.f32 %v3714_v8, %v8760_v58  ;;  %v10173_v8 = vld [vmem:[#allocation7_spill] sm:$0xff]  ;;  %v8821_v11 = vsub.f32 %v3712_v57, %v8794_v50 }
 0xaf0   :  { %4846 = vmatpush.msra.mxu1 %v8414_v7  ;;  %4698 = vmatpush.msra.mxu2 %v8574_v12  ;;  %v8751_v63 = vpop.f32.mrf.mxu2  ;;  %v8765_v7 = vsub.f32 %v3715_v28, %v8728_v34  ;;  %v2122_v47 = vadd.f32 %v10173_v8, %v2086_v44  ;;  %v8823_v53 = vand.u32 4294901760, %v3710_v46  ;;  %v10177_v44 = vld [vmem:[#allocation8_spill] sm:$0xff] }
 0xaf1   :  { %4740 = vmatpush.msra.mxu3 %v8534_v1  ;;  %4797 = vmatpush.msra.mxu0 %v10170_v61  ;;  %v10175_v61 = vld [vmem:[#allocation21_spill] sm:$0xff] }
 0xaf2   :  { %4848 = vmatpush.msra.mxu1 %v8439_v55  ;;  %4701 = vmatpush.msra.mxu2 %v8587_v48  ;;  %v4941_v55 = vand.u32 4294901760, %v8741_v39  ;;  %v4947_v6 = vand.u32 4294901760, %v8765_v7 }
 0xaf3   :  { %4742 = vmatpush.msra.mxu3 %v8546_v43  ;;  %4801 = vmatpush.msra.mxu0 %v4611_v29  ;;  %v4936_v29 = vsub.f32 %v8723_v30, %v4935_v56 }
 0xaf4   :  { %4850 = vmatpush.msra.mxu1 %v8458_v51  ;;  %4704 = vmatmul.f32.vlgmr.msra.gmra.mxu2 %v8623_v25  ;;  %v3451_v51 = vpop.f32.mrf.mxu3  ;;  %v4942_v28 = vsub.f32 %v8741_v39, %v4941_v55 }
 0xaf5   :  { %4873 = vmatpush.msrb.mxu2 %v8667_v17  ;;  %4744 = vmatpush.msra.mxu3 %v8567_v16  ;;  %v4937_v25 = vand.u32 4294901760, %v4936_v29  ;;  %v8850_v29 = vand.u32 4294901760, %v3709_v18  ;;  %v3452_v5 = vadd.f32 %v3451_v51, %v8751_v63  ;;  %v10180_v51 = vld [vmem:[#allocation13_spill] sm:$0xff] }
 0xaf6   :  { %4805 = vmatpush.msra.mxu0 %v4617_v45  ;;  %4852 = vmatpush.msra.mxu1 %v8475_v10  ;;  %v8811_v45 = vand.u32 4294901760, %v3711_v24  ;;  %v10172_v10 = vld [vmem:[#allocation5_spill] sm:$0xff]  ;;  %v4943_v57 = vand.u32 4294901760, %v4942_v28  ;;  %v10178_v28 = vld [vmem:[#allocation6_spill] sm:$0xff] }
 0xaf7   :  { %4545 = vmatmul.f32.gmra.mxu0 %v4544_v32  ;;  %4748 = vmatmul.f32.vlgmr.msra.gmra.mxu3 %v4534_v9  ;;  %v2036_v23 = vadd.f32 %v10172_v10, %v2006_v15  ;;  %v10071_v9 = vand.u32 4294901760, %v8792_v62  ;;  %v10176_v32 = vld [vmem:[#allocation20_spill] sm:$0xff] }
 0xaf8   :  { %4875 = vmatpush.msrb.mxu2 %v8686_v2  ;;  %4926 = vmatpush.msrb.mxu3 %v4925_v27  ;;  %v2803_v4 = vadd.f32 %v10176_v32, %v10175_v61  ;;  %v8842_v15 = vsub.f32 %v3711_v24, %v8811_v45  ;;  %v2156_v27 = vadd.f32 %v10177_v44, %v2122_v47  ;;  %v10063_v24 = vand.u32 4294901760, %v8821_v11 }
 0xaf9   :  { %4809 = vmatpush.msra.mxu0 %v4623_v60  ;;  %4854 = vmatpush.msra.mxu1 %v8497_v42  ;;  %v2064_v21 = vadd.f32 %v10174_v49, %v2036_v23  ;;  %v4948_v42 = vsub.f32 %v8765_v7, %v4947_v6  ;;  %v8836_v60 = vpop.f32.mrf.mxu2  ;;  %v10179_v23 = vld [vmem:[#allocation22_spill] sm:$0xff] }
 0xafa   :  { %4650 = vmatmul.f32.gmra.mxu1 %v8663_v37  ;;  %4877 = vmatpush.msrb.mxu2 %v8699_v19  ;;  %v2831_v63 = vadd.f32 %v10179_v23, %v2803_v4  ;;  %v2184_v8 = vadd.f32 %v10180_v51, %v2156_v27  ;;  %v10064_v47 = vand.u32 4294901760, %v8842_v15  ;;  %v10184_v51 = vld [vmem:[#allocation25_spill] sm:$0xff] }
 0xafb   :  { %4932 = vmatpush.msrb.mxu3 %v4931_v13  ;;  %4813 = vmatpush.msra.mxu0 %v4629_v0  ;;  %v4954_v0 = vsub.f32 %v8792_v62, %v10071_v9  ;;  %v8860_v13 = vsub.f32 %v3710_v46, %v8823_v53  ;;  %v2090_v10 = vadd.f32 %v10178_v28, %v2064_v21  ;;  %v4949_v12 = vand.u32 4294901760, %v4948_v42  ;;  %v10183_v28 = vld [vmem:[#allocation10_spill] sm:$0xff] }
 0xafc   :  { %4856 = vmatpush.msra.mxu1 %v8519_v41  ;;  %4879 = vmatpush.msrb.mxu2 %v8711_v54  ;;  %v3707_v41 = vld [vmem:[%s10126_s2 + $0x198] sm:$0xff]  ;;  %v4960_v46 = vsub.f32 %v8809_v22, %v10066_v20  ;;  %v3455_v49 = vpop.f32.mrf.mxu3  ;;  %v8884_v21 = vsub.f32 %v3709_v18, %v8850_v29  ;;  %v4966_v42 = vsub.f32 %v8821_v11, %v10063_v24 }
 0xafd   :  { %4938 = vmatpush.msrb.mxu3 %v4937_v25  ;;  %4817 = vmatpush.msra.mxu0 %v4635_v14  ;;  %v8869_v14 = vand.u32 4294901760, %v3708_v36  ;;  %v3479_v25 = vpop.f32.mrf.mxu0  ;;  %v8886_v61 = vand.u32 4294901760, %v3707_v41  ;;  %v4955_v4 = vand.u32 4294901760, %v4954_v0  ;;  %v10065_v48 = vand.u32 4294901760, %v8860_v13  ;;  %v3647_v0 = vld [vmem:[%s10004_s0 + $0x18] sm:$0xff] }
 0xafe   :  { %4858 = vmatpush.msra.mxu1 %v8534_v1  ;;  %4881 = vmatpush.msrb.mxu2 %v8728_v34  ;;  %v3706_v1 = vld [vmem:[%s10126_s2 + $0x190] sm:$0xff]  ;;  %v3480_v32 = vadd.f32 %v3479_v25, %v3452_v5  ;;  %v2213_v23 = vadd.f32 %v10183_v28, %v2184_v8  ;;  %v10185_v25 = vld [vmem:[#allocation23_spill] sm:$0xff]  ;;  %v3508_v8 = vpop.f32.mrf.mxu1 }
 0xaff   :  { %4944 = vmatpush.msrb.mxu3 %v4943_v57  ;;  %4709 = vmatmul.f32.gmra.mxu2 %v8684_v31  ;;  %v10182_v57 = vld [vmem:[#allocation24_spill] sm:$0xff]  ;;  %v8901_v27 = vsub.f32 %v3708_v36, %v8869_v14  ;;  %v8903_v5 = vand.u32 4294901760, %v3706_v1  ;;  %v2807_v24 = vadd.f32 %v10185_v25, %v10184_v51  ;;  %v4972_v36 = vsub.f32 %v8842_v15, %v10064_v47 }
 0xb00   :  { %4821 = vmatpush.msra.mxu0 %v4641_v38  ;;  %4860 = vmatpush.msra.mxu1 %v8546_v43  ;;  %v3705_v43 = vld [vmem:[%s10126_s2 + $0x188] sm:$0xff]  ;;  %v2860_v44 = vadd.f32 %v10182_v57, %v2831_v63  ;;  %v3704_v63 = vld [vmem:[%s10126_s2 + $0x180] sm:$0xff]  ;;  %v10069_v31 = vand.u32 4294901760, %v8884_v21  ;;  %v4967_v57 = vand.u32 4294901760, %v4966_v42  ;;  %v3509_v28 = vadd.f32 %v3508_v8, %v3480_v32  ;;  %v10187_v51 = vld [vmem:[#allocation12_spill] sm:$0xff] }
 0xb01   :  { %4823 = vmatmul.f32.vlgmr.msra.gmra.mxu0 %v8610_v35  ;;  %4883 = vmatpush.msrb.mxu2 %v8760_v58  ;;  %v10181_v38 = vld [vmem:[#allocation11_spill] sm:$0xff]  ;;  %v3456_v32 = vadd.f32 %v3455_v49, %v8836_v60  ;;  %v4973_v8 = vand.u32 4294901760, %v4972_v36  ;;  %v10191_v60 = vld [vmem:[#allocation28_spill] sm:$0xff] }
 0xb02   :  { %v2130_v18 = vadd.f32 %v10181_v38, %v2090_v10  ;;  %4950 = vmatpush.msrb.mxu3 %v4949_v12  ;;  %5028 = vmatpush.msrb.mxu0 %v8692_v59  ;;  %v4961_v10 = vand.u32 4294901760, %v4960_v46  ;;  %v10186_v12 = vld [vmem:[#allocation29_spill] sm:$0xff]  ;;  %v8927_v46 = vand.u32 4294901760, %v3705_v43  ;;  %v10188_v42 = vld [vmem:[#allocation15_spill] sm:$0xff] }
 0xb03   :  { %4754 = vmatmul.f32.gmra.mxu3 %v4542_v33  ;;  %4862 = vmatpush.msra.mxu1 %v8567_v16  ;;  %v2890_v38 = vadd.f32 %v10186_v12, %v2860_v44  ;;  %v3538_v33 = vpop.f32.mrf.mxu2  ;;  %v8925_v16 = vsub.f32 %v3707_v41, %v8886_v61  ;;  %v4978_v44 = vsub.f32 %v8860_v13, %v10065_v48  ;;  %v10067_v41 = vand.u32 4294901760, %v8901_v27 }
 0xb04   :  { %4864 = vmatmul.f32.vlgmr.msra.gmra.mxu1 %v8610_v35  ;;  %4885 = vmatpush.msrb.mxu2 %v8777_v40  ;;  %v8933_v35 = vand.u32 4294901760, %v3647_v0  ;;  %v2160_v25 = vadd.f32 %v10187_v51, %v2130_v18  ;;  %v8942_v12 = vand.u32 4294901760, %v3704_v63  ;;  %v2243_v47 = vadd.f32 %v10188_v42, %v2213_v23  ;;  %v10189_v51 = vld [vmem:[#allocation17_spill] sm:$0xff] }
 0xb05   :  { %4956 = vmatpush.msrb.mxu3 %v4955_v4  ;;  %5031 = vmatpush.msrb.mxu0 %v8709_v52  ;;  %v8940_v4 = vsub.f32 %v3706_v1, %v8903_v5  ;;  %v3539_v18 = vadd.f32 %v3538_v33, %v3509_v28  ;;  %v4984_v1 = vsub.f32 %v8884_v21, %v10069_v31  ;;  %v10068_v20 = vand.u32 4294901760, %v8925_v16  ;;  %v3484_v28 = vpop.f32.mrf.mxu0 }
 0xb06   :  { %5086 = vmatpush.msrb.mxu1 %v8667_v17  ;;  %4887 = vmatpush.msrb.mxu2 %v8794_v50  ;;  %v2189_v48 = vadd.f32 %v10189_v51, %v2160_v25  ;;  %v8955_v23 = vsub.f32 %v3705_v43, %v8927_v46  ;;  %v2916_v49 = vadd.f32 %v10191_v60, %v2890_v38  ;;  %v4979_v36 = vand.u32 4294901760, %v4978_v44  ;;  %v3564_v25 = vpop.f32.mrf.mxu3 }
 0xb07   :  { %4962 = vmatpush.msrb.mxu3 %v4961_v10  ;;  %5034 = vmatpush.msrb.mxu0 %v8723_v30  ;;  %v10190_v10 = vld [vmem:[#allocation26_spill] sm:$0xff]  ;;  %v8961_v33 = vsub.f32 %v3647_v0, %v8933_v35  ;;  %v4990_v43 = vsub.f32 %v8901_v27, %v10067_v41  ;;  %v8970_v38 = vsub.f32 %v3704_v63, %v8942_v12 }
 0xb08   :  { %5088 = vmatpush.msrb.mxu1 %v8686_v2  ;;  %4889 = vmatpush.msrb.mxu2 %v8811_v45  ;;  %v2836_v42 = vadd.f32 %v10190_v10, %v2807_v24  ;;  %v10070_v24 = vand.u32 4294901760, %v8940_v4  ;;  %v3485_v51 = vadd.f32 %v3484_v28, %v3456_v32  ;;  %v3565_v0 = vadd.f32 %v3564_v25, %v3539_v18  ;;  %v10193_v63 = vld [vmem:[#allocation14_spill] sm:$0xff]  ;;  %v3514_v25 = vpop.f32.mrf.mxu1 }
 0xb09   :  { %4968 = vmatpush.msrb.mxu3 %v4967_v57  ;;  %5037 = vmatpush.msrb.mxu0 %v8741_v39  ;;  %v10192_v57 = vld [vmem:[#allocation16_spill] sm:$0xff]  ;;  %v4985_v10 = vand.u32 4294901760, %v4984_v1  ;;  %v4996_v60 = vsub.f32 %v8925_v16, %v10068_v20  ;;  %v5007_v41 = vand.u32 4294901760, %v8955_v23  ;;  %v2219_v32 = vadd.f32 %v10193_v63, %v2189_v48 }
 0xb0a   :  { %5090 = vmatpush.msrb.mxu1 %v8699_v19  ;;  %4891 = vmatpush.msrb.mxu2 %v8823_v53  ;;  %v2269_v44 = vadd.f32 %v10192_v57, %v2243_v47  ;;  %v3653_v47 = vld [vmem:[%s10004_s0 + $0x48] sm:$0xff]  ;;  %v4906_v1 = vand.u32 4294901760, %v8961_v33  ;;  %v4991_v57 = vand.u32 4294901760, %v4990_v43  ;;  %v5002_v20 = vsub.f32 %v8940_v4, %v10070_v24  ;;  %v10196_v24 = vld [vmem:[#allocation18_spill] sm:$0xff] }
 0xb0b   :  { %4974 = vmatpush.msrb.mxu3 %v4973_v8  ;;  %5040 = vmatpush.msrb.mxu0 %v8765_v7  ;;  %v10194_v8 = vld [vmem:[#allocation27_spill] sm:$0xff]  ;;  %v3542_v31 = vpop.f32.mrf.mxu2  ;;  %v5013_v48 = vand.u32 4294901760, %v8970_v38  ;;  %v8996_v63 = vand.u32 4294901760, %v3653_v47  ;;  %v4997_v43 = vand.u32 4294901760, %v4996_v60  ;;  %v2247_v9 = vadd.f32 %v10196_v24, %v2219_v32  ;;  %v10197_v60 = vld [vmem:[#allocation30_spill] sm:$0xff] }
 0xb0c   :  { %5092 = vmatpush.msrb.mxu1 %v8711_v54  ;;  %4827 = vmatmul.f32.gmra.mxu0 %v8663_v37  ;;  %v2866_v28 = vadd.f32 %v10194_v8, %v2836_v42  ;;  %v2922_v18 = vadd.f32 %v2916_v49, %v2269_v44  ;;  %v10195_v42 = vld [vmem:[#allocation31_spill] sm:$0xff]  ;;  %v3515_v44 = vadd.f32 %v3514_v25, %v3485_v51  ;;  %v10198_v24 = vld [vmem:[#allocation2_spill] sm:$0xff] }
 0xb0d   :  { %4893 = vmatpush.msrb.mxu2 %v8850_v29  ;;  %4980 = vmatpush.msrb.mxu3 %v4979_v36  ;;  %v5008_v8 = vsub.f32 %v8955_v23, %v5007_v41  ;;  %v4907_v51 = vsub.f32 %v8961_v33, %v4906_v1  ;;  %v6876_v32 = vld [vmem:[%s10005_s9] ss:$0 sm:$0xff] }
 0xb0e   :  { %5043 = vmatpush.msrb.mxu0 %v8792_v62  ;;  %5094 = vmatpush.msrb.mxu1 %v8728_v34  ;;  %v2894_v49 = vadd.f32 %v10195_v42, %v2866_v28  ;;  %v3571_v36 = vadd.f32 %v3565_v0, %v2922_v18  ;;  %v5003_v0 = vand.u32 4294901760, %v5002_v20  ;;  %v9020_v18 = vsub.f32 %v3653_v47, %v8996_v63  ;;  %v3568_v20 = vpop.f32.mrf.mxu3  ;;  %v10199_v42 = vld [vmem:[#allocation19_spill] sm:$0xff] }
 0xb0f   :  { %4868 = vmatmul.f32.gmra.mxu1 %v8663_v37  ;;  %4895 = vmatpush.msrb.mxu2 %v8869_v14  ;;  %v3543_v37 = vadd.f32 %v3542_v31, %v3515_v44  ;;  %v5009_v25 = vand.u32 4294901760, %v5008_v8  ;;  %v4908_v44 = vand.u32 4294901760, %v4907_v51 }
 0xb10   :  { %4986 = vmatpush.msrb.mxu3 %v4985_v10  ;;  %5046 = vmatpush.msrb.mxu0 %v8809_v22  ;;  %v5014_v10 = vsub.f32 %v8970_v38, %v5013_v48  ;;  %v2920_v28 = vadd.f32 %v10197_v60, %v2894_v49  ;;  %v3573_v31 = vadd.f32 %v3571_v36, %v10198_v24  ;;  %v4914_v60 = vand.u32 4294901760, %v9020_v18 }
 0xb11   :  { %5096 = vmatpush.msrb.mxu1 %v8760_v58  ;;  %4897 = vmatpush.msrb.mxu2 %v8886_v61  ;;  %v2273_v49 = vadd.f32 %v10199_v42, %v2247_v9  ;;  %v3569_v36 = vadd.f32 %v3568_v20, %v3543_v37  ;;  %v3733_v37 = vld [vmem:[%s10126_s2 + $0x268] sm:$0xff] }
 0xb12   :  { %4992 = vmatpush.msrb.mxu3 %v4991_v57  ;;  %5049 = vmatpush.msrb.mxu0 %v8821_v11  ;;  %v3735_v57 = vld [vmem:[%s10126_s2 + $0x278] sm:$0xff]  ;;  %v5015_v47 = vand.u32 4294901760, %v5014_v10  ;;  %v9035_v9 = vadd.f32 %v6876_v32, %v3573_v31  ;;  %v3732_v10 = vld [vmem:[%s10126_s2 + $0x260] sm:$0xff]  ;;  %v4915_v31 = vsub.f32 %v9020_v18, %v4914_v60  ;;  %v9062_v59 = vand.u32 4294901760, %v3733_v37 }
 0xb13   :  { %5098 = vmatpush.msrb.mxu1 %v8777_v40  ;;  %4899 = vmatpush.msrb.mxu2 %v8903_v5  ;;  %v2923_v8 = vadd.f32 %v2920_v28, %v2273_v49  ;;  %v9038_v24 = vand.u32 4294901760, %v3735_v57  ;;  %v9073_v49 = vand.u32 4294901760, %v3732_v10 }
 0xb14   :  { %4998 = vmatpush.msrb.mxu3 %v4997_v43  ;;  %5052 = vmatpush.msrb.mxu0 %v8842_v15  ;;  %v3734_v43 = vld [vmem:[%s10126_s2 + $0x270] sm:$0xff]  ;;  %v3581_v28 = vsel %vm299_vm1, %v9035_v9, 0.0 }
 0xb15   :  { %5100 = vmatpush.msrb.mxu1 %v8794_v50  ;;  %4901 = vmatpush.msrb.mxu2 %v8927_v46  ;;  %v3572_v51 = vadd.f32 %v3569_v36, %v2923_v8  ;;  %v9060_v20 = vsub.f32 %v3735_v57, %v9038_v24  ;;  %v3731_v57 = vld [vmem:[%s10126_s2 + $0x258] sm:$0xff]  ;;  %v3730_v36 = vld [vmem:[%s10126_s2 + $0x250] sm:$0xff] }
 0xb16   :  { %5004 = vmatpush.msrb.mxu3 %v5003_v0  ;;  %5055 = vmatpush.msrb.mxu0 %v8860_v13  ;;  %v9045_v0 = vand.u32 4294901760, %v3734_v43 }
 0xb17   :  { %5102 = vmatpush.msrb.mxu1 %v8811_v45  ;;  %4903 = vmatpush.msrb.mxu2 %v8942_v12  ;;  %v5295_v52 = vand.u32 4294901760, %v9060_v20 }
 0xb18   :  { %5010 = vmatpush.msrb.mxu3 %v5009_v25  ;;  %5058 = vmatpush.msrb.mxu0 %v8884_v21  ;;  %v9071_v42 = vsub.f32 %v3734_v43, %v9045_v0  ;;  %v9107_v43 = vand.u32 4294901760, %v3730_v36 }
 0xb19   :  { %5104 = vmatpush.msrb.mxu1 %v8823_v53  ;;  %4909 = vmatmul.f32.vlgmr.msrb.gmra.mxu2 %v4908_v44  ;;  %v9091_v44 = vand.u32 4294901760, %v3731_v57 }
 0xb1a   :  { %5133 = vmatpush.msra.mxu2 %v4923_v26  ;;  %5016 = vmatpush.msrb.mxu3 %v5015_v47  ;;  %v10200_v26 = vld [vmem:[#allocation3_spill] sm:$0xff]  ;;  %v5301_v30 = vand.u32 4294901760, %v9071_v42 }
 0xb1b   :  { %5061 = vmatpush.msrb.mxu0 %v8901_v27  ;;  %5106 = vmatpush.msrb.mxu1 %v8850_v29  ;;  %v3574_v25 = vadd.f32 %v3572_v51, %v10200_v26  ;;  %v3729_v47 = vld [vmem:[%s10126_s2 + $0x248] sm:$0xff]  ;;  %v10201_v51 = vand.u32 4294901760, %v8792_v62 }
 0xb1c   :  { %5018 = vmatmul.f32.vlgmr.msrb.gmra.mxu3 %v8933_v35  ;;  %5137 = vmatpush.msra.mxu2 %v4929_v3  ;;  %v9084_v3 = vsub.f32 %v3733_v37, %v9062_v59  ;;  %v9123_v8 = vand.u32 4294901760, %v3729_v47  ;;  %v5302_v37 = vsub.f32 %v9071_v42, %v5301_v30 }
 0xb1d   :  { %5204 = vmatpush.msra.mxu3 %v8667_v17  ;;  %5064 = vmatpush.msrb.mxu0 %v8925_v16  ;;  %v4916_v17 = vand.u32 4294901760, %v4915_v31 }
 0xb1e   :  { %5108 = vmatpush.msrb.mxu1 %v8869_v14  ;;  %3582 = vadd.xlane.f32.xlu2 %v3581_v28  ;;  %v5307_v39 = vand.u32 4294901760, %v9084_v3 }
 0xb1f   :  { %5141 = vmatpush.msra.mxu2 %v4935_v56  ;;  %5206 = vmatpush.msra.mxu3 %v8686_v2  ;;  %v9096_v2 = vadd.f32 %v6876_v32, %v3574_v25  ;;  %v9100_v56 = vsub.f32 %v3732_v10, %v9073_v49  ;;  %v9121_v32 = vsub.f32 %v3731_v57, %v9091_v44  ;;  %v3726_v25 = vld [vmem:[%s10126_s2 + $0x230] sm:$0xff] }
 0xb20   :  { %5067 = vmatpush.msrb.mxu0 %v8940_v4  ;;  %5110 = vmatpush.msrb.mxu1 %v8886_v61  ;;  %v9140_v10 = vsub.f32 %v3730_v36, %v9107_v43  ;;  %v5308_v26 = vsub.f32 %v9084_v3, %v5307_v39  ;;  %v9155_v57 = vsub.f32 %v3729_v47, %v9123_v8  ;;  %v5303_v36 = vand.u32 4294901760, %v5302_v37 }
 0xb21   :  { %5145 = vmatpush.msra.mxu2 %v4941_v55  ;;  %5208 = vmatpush.msra.mxu3 %v8699_v19  ;;  %v5296_v19 = vsub.f32 %v9060_v20, %v5295_v52  ;;  %v3728_v55 = vld [vmem:[%s10126_s2 + $0x240] sm:$0xff]  ;;  %v5313_v7 = vand.u32 4294901760, %v9100_v56  ;;  %v5319_v62 = vand.u32 4294901760, %v9121_v32 }
 0xb22   :  { %5070 = vmatpush.msrb.mxu0 %v8955_v23  ;;  %5112 = vmatpush.msrb.mxu1 %v8903_v5  ;;  %v9142_v28 = vand.u32 4294901760, %v3728_v55  ;;  %v10072_v47 = vand.u32 4294901760, %v9140_v10  ;;  %v5309_v37 = vand.u32 4294901760, %v5308_v26 }
 0xb23   :  { %4917 = vmatmul.f32.gmra.mxu2 %v4916_v17  ;;  %5210 = vmatpush.msra.mxu3 %v8711_v54  ;;  %v3584_v54 = vsel %vm299_vm1, %v9096_v2, 0.0  ;;  %v5297_v31 = vand.u32 4294901760, %v5296_v19  ;;  %v10202_v17 = vand.u32 4294901760, %v8809_v22  ;;  %v5314_v19 = vsub.f32 %v9100_v56, %v5313_v7 }
 0xb24   :  { %5149 = vmatpush.msra.mxu2 %v4947_v6  ;;  %5073 = vmatpush.msrb.mxu0 %v8970_v38  ;;  %v3727_v6 = vld [vmem:[%s10126_s2 + $0x238] sm:$0xff]  ;;  %v9175_v22 = vand.u32 4294901760, %v3726_v25 }
 0xb25   :  { %5114 = vmatpush.msrb.mxu1 %v8927_v46  ;;  %5022 = vmatmul.f32.gmra.mxu3 %v8996_v63 }
 0xb26   :  { %5076 = vmatmul.f32.vlgmr.msrb.gmra.mxu0 %v8961_v33  ;;  %5153 = vmatpush.msra.mxu2 %v10201_v51  ;;  %v9173_v33 = vsub.f32 %v3728_v55, %v9142_v28  ;;  %v10073_v51 = vand.u32 4294901760, %v9155_v57 }
 0xb27   :  { %5212 = vmatpush.msra.mxu3 %v8728_v34  ;;  %5245 = vmatpush.msra.mxu0 %v9038_v24  ;;  %v9157_v34 = vand.u32 4294901760, %v3727_v6 }
 0xb28   :  { %5116 = vmatpush.msrb.mxu1 %v8942_v12  ;;  %3585 = vadd.xlane.f32.xlu2 %v3584_v54  ;;  %v3725_v54 = vld [vmem:[%s10126_s2 + $0x228] sm:$0xff]  ;;  %v10074_v26 = vand.u32 4294901760, %v9173_v33 }
 0xb29   :  { %5120 = vmatmul.f32.vlgmr.msrb.gmra.mxu1 %v4906_v1  ;;  %5157 = vmatpush.msra.mxu2 %v10202_v17  ;;  %v10203_v1 = vand.u32 4294901760, %v8821_v11  ;;  %v9186_v55 = vsub.f32 %v3727_v6, %v9157_v34  ;;  %v9188_v17 = vand.u32 4294901760, %v3725_v54  ;;  %v3724_v11 = vld [vmem:[%s10126_s2 + $0x220] sm:$0xff]  ;;  %v5326_v6 = vsub.f32 %v9140_v10, %v10072_v47 }
 0xb2a   :  { %5214 = vmatpush.msra.mxu3 %v8760_v58  ;;  %5247 = vmatpush.msra.mxu0 %v9045_v0  ;;  %v5320_v58 = vsub.f32 %v9121_v32, %v5319_v62 }
 0xb2b   :  { %5298 = vmatpush.msra.mxu1 %v5297_v31  ;;  %5161 = vmatpush.msra.mxu2 %v10203_v1  ;;  %v5315_v31 = vand.u32 4294901760, %v5314_v19  ;;  %v9202_v1 = vsub.f32 %v3726_v25, %v9175_v22  ;;  %v5332_v25 = vsub.f32 %v9155_v57, %v10073_v51  ;;  %v9218_v47 = vsub.f32 %v3725_v54, %v9188_v17  ;;  %v3721_v51 = vld [vmem:[%s10126_s2 + $0x208] sm:$0xff] }
 0xb2c   :  { %5216 = vmatpush.msra.mxu3 %v8777_v40  ;;  %5249 = vmatpush.msra.mxu0 %v9062_v59  ;;  %v10204_v40 = vand.u32 4294901760, %v8842_v15  ;;  %v9208_v15 = vand.u32 4294901760, %v3724_v11  ;;  %v5321_v19 = vand.u32 4294901760, %v5320_v58  ;;  %v5327_v58 = vand.u32 4294901760, %v5326_v6 }
 0xb2d   :  { %5304 = vmatpush.msra.mxu1 %v5303_v36  ;;  %v3723_v36 = vld [vmem:[%s10126_s2 + $0x218] sm:$0xff]  ;;  %v5338_v54 = vsub.f32 %v9173_v33, %v10074_v26  ;;  %v5333_v6 = vand.u32 4294901760, %v5332_v25  ;;  %v9258_v26 = vand.u32 4294901760, %v3721_v51 }
 0xb2e   :  { %5165 = vmatpush.msra.mxu2 %v10204_v40  ;;  %5218 = vmatpush.msra.mxu3 %v8794_v50  ;;  %v10205_v50 = vand.u32 4294901760, %v8860_v13  ;;  %v10075_v40 = vand.u32 4294901760, %v9186_v55  ;;  %v9224_v13 = vand.u32 4294901760, %v3723_v36 }
 0xb2f   :  { %5251 = vmatpush.msra.mxu0 %v9073_v49  ;;  %5310 = vmatpush.msra.mxu1 %v5309_v37  ;;  %v3722_v37 = vld [vmem:[%s10126_s2 + $0x210] sm:$0xff]  ;;  %v5339_v25 = vand.u32 4294901760, %v5338_v54 }
 0xb30   :  { %5081 = vmatmul.f32.gmra.mxu0 %v9020_v18  ;;  %5169 = vmatpush.msra.mxu2 %v10205_v50  ;;  %v5349_v50 = vand.u32 4294901760, %v9202_v1  ;;  %v9240_v18 = vsub.f32 %v3724_v11, %v9208_v15  ;;  %v9256_v11 = vsub.f32 %v3723_v36, %v9224_v13 }
 0xb31   :  { %5220 = vmatpush.msra.mxu3 %v8811_v45  ;;  %5253 = vmatpush.msra.mxu0 %v9091_v44  ;;  %v10206_v45 = vand.u32 4294901760, %v8884_v21  ;;  %v9242_v21 = vand.u32 4294901760, %v3722_v37 }
 0xb32   :  { %5316 = vmatpush.msra.mxu1 %v5315_v31  ;;  %v10207_v31 = vand.u32 4294901760, %v8901_v27  ;;  %v3720_v27 = vld [vmem:[%s10126_s2 + $0x200] sm:$0xff]  ;;  %v5361_v36 = vand.u32 4294901760, %v9240_v18 }
 0xb33   :  { %5126 = vmatmul.f32.gmra.mxu1 %v4914_v60  ;;  %5173 = vmatpush.msra.mxu2 %v10206_v45  ;;  %v3648_v60 = vld [vmem:[%s10004_s0 + $0x20] sm:$0xff]  ;;  %v5355_v45 = vand.u32 4294901760, %v9218_v47 }
 0xb34   :  { %5222 = vmatpush.msra.mxu3 %v8823_v53  ;;  %5255 = vmatpush.msra.mxu0 %v9107_v43  ;;  %v5344_v53 = vsub.f32 %v9186_v55, %v10075_v40  ;;  %v9274_v40 = vsub.f32 %v3722_v37, %v9242_v21  ;;  %v9287_v37 = vsub.f32 %v3721_v51, %v9258_v26 }
 0xb35   :  { %5322 = vmatpush.msra.mxu1 %v5321_v19  ;;  %5177 = vmatpush.msra.mxu2 %v10207_v31  ;;  %v10208_v19 = vand.u32 4294901760, %v8925_v16  ;;  %v9268_v31 = vand.u32 4294901760, %v3648_v60  ;;  %v10209_v16 = vand.u32 4294901760, %v8940_v4  ;;  %v5356_v54 = vsub.f32 %v9218_v47, %v5355_v45 }
 0xb36   :  { %5224 = vmatpush.msra.mxu3 %v8850_v29  ;;  %5257 = vmatpush.msra.mxu0 %v9123_v8  ;;  %v5350_v29 = vsub.f32 %v9202_v1, %v5349_v50 }
 0xb37   :  { %5328 = vmatpush.msra.mxu1 %v5327_v58  ;;  %5181 = vmatpush.msra.mxu2 %v10208_v19  ;;  %v5345_v58 = vand.u32 4294901760, %v5344_v53  ;;  %v9281_v19 = vand.u32 4294901760, %v3720_v27  ;;  %v5373_v53 = vand.u32 4294901760, %v9274_v40  ;;  %v5357_v23 = vand.u32 4294901760, %v5356_v54 }
 0xb38   :  { %5226 = vmatpush.msra.mxu3 %v8869_v14  ;;  %5259 = vmatpush.msra.mxu0 %v9142_v28  ;;  %v5367_v14 = vand.u32 4294901760, %v9256_v11  ;;  %v5351_v4 = vand.u32 4294901760, %v5350_v29 }
 0xb39   :  { %5334 = vmatpush.msra.mxu1 %v5333_v6  ;;  %5185 = vmatpush.msra.mxu2 %v10209_v16  ;;  %v9292_v6 = vsub.f32 %v3648_v60, %v9268_v31  ;;  %v5379_v60 = vand.u32 4294901760, %v9287_v37 }
 0xb3a   :  { %5228 = vmatpush.msra.mxu3 %v8886_v61  ;;  %5261 = vmatpush.msra.mxu0 %v9157_v34  ;;  %v5362_v61 = vsub.f32 %v9240_v18, %v5361_v36  ;;  %v5368_v51 = vsub.f32 %v9256_v11, %v5367_v14 }
 0xb3b   :  { %5340 = vmatpush.msra.mxu1 %v5339_v25  ;;  %5189 = vmatpush.msra.mxu2 %v5007_v41  ;;  %v9303_v41 = vsub.f32 %v3720_v27, %v9281_v19  ;;  %v5278_v38 = vand.u32 4294901760, %v9292_v6 }
 0xb3c   :  { %5230 = vmatpush.msra.mxu3 %v8903_v5  ;;  %5263 = vmatpush.msra.mxu0 %v9175_v22  ;;  %v3654_v5 = vld [vmem:[%s10004_s0 + $0x50] sm:$0xff]  ;;  %v5369_v29 = vand.u32 4294901760, %v5368_v51 }
 0xb3d   :  { %5346 = vmatpush.msra.mxu1 %v5345_v58  ;;  %5193 = vmatpush.msra.mxu2 %v5013_v48  ;;  %v5363_v48 = vand.u32 4294901760, %v5362_v61  ;;  %v9321_v27 = vand.u32 4294901760, %v3654_v5  ;;  %v5385_v25 = vand.u32 4294901760, %v9303_v41  ;;  %v5279_v16 = vsub.f32 %v9292_v6, %v5278_v38 }
 0xb3e   :  { %5232 = vmatpush.msra.mxu3 %v8927_v46  ;;  %5265 = vmatpush.msra.mxu0 %v9188_v17  ;;  %v5374_v46 = vsub.f32 %v9274_v40, %v5373_v53 }
 0xb3f   :  { %5352 = vmatpush.msra.mxu1 %v5351_v4  ;;  %5195 = vmatmul.f32.vlgmr.msra.gmra.mxu2 %v8933_v35  ;;  %v5386_v54 = vsub.f32 %v9303_v41, %v5385_v25  ;;  %v5280_v61 = vand.u32 4294901760, %v5279_v16 }
 0xb40   :  { %5400 = vmatpush.msrb.mxu2 %v9060_v20  ;;  %5234 = vmatpush.msra.mxu3 %v8942_v12  ;;  %v5380_v12 = vsub.f32 %v9287_v37, %v5379_v60  ;;  %v5375_v58 = vand.u32 4294901760, %v5374_v46  ;;  %v3751_v20 = vld [vmem:[%s10126_s2 + $0x2f8] sm:$0xff] }
 0xb41   :  { %5267 = vmatpush.msra.mxu0 %v9208_v15  ;;  %5358 = vmatpush.msra.mxu1 %v5357_v23 }
 0xb42   :  { %5236 = vmatmul.f32.vlgmr.msra.gmra.mxu3 %v8933_v35  ;;  %5403 = vmatpush.msrb.mxu2 %v9071_v42  ;;  %v9337_v35 = vsub.f32 %v3654_v5, %v9321_v27  ;;  %v5381_v4 = vand.u32 4294901760, %v5380_v12  ;;  %v5387_v5 = vand.u32 4294901760, %v5386_v54  ;;  %v9381_v42 = vand.u32 4294901760, %v3751_v20 }
 0xb43   :  { %5458 = vmatpush.msrb.mxu3 %v9038_v24  ;;  %5269 = vmatpush.msra.mxu0 %v9224_v13 }
 0xb44   :  { %5364 = vmatpush.msra.mxu1 %v5363_v48  ;;  %5406 = vmatpush.msrb.mxu2 %v9084_v3  ;;  %v5286_v23 = vand.u32 4294901760, %v9337_v35  ;;  %v9400_v3 = vsub.f32 %v3751_v20, %v9381_v42  ;;  %v3742_v20 = vld [vmem:[%s10126_s2 + $0x2b0] sm:$0xff] }
 0xb45   :  { %5460 = vmatpush.msrb.mxu3 %v9045_v0  ;;  %5271 = vmatpush.msra.mxu0 %v9242_v21 }
 0xb46   :  { %5370 = vmatpush.msra.mxu1 %v5369_v29  ;;  %5409 = vmatpush.msrb.mxu2 %v9100_v56  ;;  %v5287_v51 = vsub.f32 %v9337_v35, %v5286_v23  ;;  %v10210_v56 = vand.u32 4294901760, %v9140_v10  ;;  %v3745_v29 = vld [vmem:[%s10126_s2 + $0x2c8] sm:$0xff] }
 0xb47   :  { %5462 = vmatpush.msrb.mxu3 %v9062_v59  ;;  %5273 = vmatpush.msra.mxu0 %v9258_v26 }
 0xb48   :  { %5376 = vmatpush.msra.mxu1 %v5375_v58  ;;  %5199 = vmatmul.f32.gmra.mxu2 %v8996_v63 }
 0xb49   :  { %5412 = vmatpush.msrb.mxu2 %v9121_v32  ;;  %5464 = vmatpush.msrb.mxu3 %v9073_v49  ;;  %v3747_v32 = vld [vmem:[%s10126_s2 + $0x2d8] sm:$0xff] }
 0xb4a   :  { %5275 = vmatpush.msra.mxu0 %v9281_v19  ;;  %5382 = vmatpush.msra.mxu1 %v5381_v4  ;;  %v9429_v48 = vand.u32 4294901760, %v3747_v32  ;;  %v9469_v4 = vand.u32 4294901760, %v3745_v29 }
 0xb4b   :  { %5240 = vmatmul.f32.gmra.mxu3 %v8996_v63  ;;  %5281 = vmatmul.f32.vlgmr.msra.gmra.mxu0 %v5280_v61  ;;  %v5288_v63 = vand.u32 4294901760, %v5287_v51 }
 0xb4c   :  { %5415 = vmatpush.msrb.mxu2 %v9140_v10  ;;  %5466 = vmatpush.msrb.mxu3 %v9091_v44  ;;  %v9497_v51 = vsub.f32 %v3745_v29, %v9469_v4 }
 0xb4d   :  { %5505 = vmatpush.msrb.mxu0 %v5295_v52  ;;  %5388 = vmatpush.msra.mxu1 %v5387_v5 }
 0xb4e   :  { %5390 = vmatmul.f32.vlgmr.msra.gmra.mxu1 %v9268_v31  ;;  %5418 = vmatpush.msrb.mxu2 %v9155_v57 }
 0xb4f   :  { %5468 = vmatpush.msrb.mxu3 %v9107_v43  ;;  %5509 = vmatpush.msrb.mxu0 %v5301_v30 }
 0xb50   :  { %5576 = vmatpush.msrb.mxu1 %v9038_v24  ;;  %5421 = vmatpush.msrb.mxu2 %v9173_v33  ;;  %v3750_v24 = vld [vmem:[%s10126_s2 + $0x2f0] sm:$0xff] }
 0xb51   :  { %5470 = vmatpush.msrb.mxu3 %v9123_v8  ;;  %5513 = vmatpush.msrb.mxu0 %v5307_v39  ;;  %v9389_v52 = vand.u32 4294901760, %v3750_v24 }
 0xb52   :  { %5578 = vmatpush.msrb.mxu1 %v9045_v0  ;;  %5424 = vmatpush.msrb.mxu2 %v9186_v55  ;;  %v3749_v0 = vld [vmem:[%s10126_s2 + $0x2e8] sm:$0xff] }
 0xb53   :  { %5472 = vmatpush.msrb.mxu3 %v9142_v28  ;;  %5517 = vmatpush.msrb.mxu0 %v5313_v7  ;;  %v9402_v30 = vand.u32 4294901760, %v3749_v0  ;;  %v10211_v7 = vand.u32 4294901760, %v9155_v57  ;;  %v3746_v57 = vld [vmem:[%s10126_s2 + $0x2d0] sm:$0xff] }
 0xb54   :  { %5580 = vmatpush.msrb.mxu1 %v9062_v59  ;;  %5289 = vmatmul.f32.gmra.mxu0 %v5288_v63  ;;  %v3748_v59 = vld [vmem:[%s10126_s2 + $0x2e0] sm:$0xff]  ;;  %v9452_v16 = vand.u32 4294901760, %v3746_v57 }
 0xb55   :  { %5427 = vmatpush.msrb.mxu2 %v9202_v1  ;;  %5474 = vmatpush.msrb.mxu3 %v9157_v34  ;;  %v9412_v39 = vand.u32 4294901760, %v3748_v59  ;;  %v9424_v10 = vsub.f32 %v3749_v0, %v9402_v30  ;;  %v3743_v1 = vld [vmem:[%s10126_s2 + $0x2b8] sm:$0xff] }
 0xb56   :  { %5521 = vmatpush.msrb.mxu0 %v5319_v62  ;;  %5582 = vmatpush.msrb.mxu1 %v9073_v49  ;;  %v9410_v49 = vsub.f32 %v3750_v24, %v9389_v52  ;;  %v10212_v62 = vand.u32 4294901760, %v9173_v33  ;;  %v10213_v33 = vand.u32 4294901760, %v9186_v55  ;;  %v9458_v55 = vsub.f32 %v3747_v32, %v9429_v48  ;;  %v3741_v24 = vld [vmem:[%s10126_s2 + $0x2a8] sm:$0xff] }
 0xb57   :  { %5394 = vmatmul.f32.gmra.mxu1 %v9321_v27  ;;  %5430 = vmatpush.msrb.mxu2 %v9218_v47  ;;  %v9438_v46 = vsub.f32 %v3748_v59, %v9412_v39  ;;  %v5679_v12 = vand.u32 4294901760, %v9424_v10  ;;  %v9483_v61 = vsub.f32 %v3746_v57, %v9452_v16  ;;  %v9499_v63 = vand.u32 4294901760, %v3743_v1 }
 0xb58   :  { %5476 = vmatpush.msrb.mxu3 %v9175_v22  ;;  %5525 = vmatpush.msrb.mxu0 %v10210_v56  ;;  %v5691_v47 = vand.u32 4294901760, %v9458_v55  ;;  %v9534_v59 = vand.u32 4294901760, %v3741_v24  ;;  %v3739_v56 = vld [vmem:[%s10126_s2 + $0x298] sm:$0xff] }
 0xb59   :  { %5584 = vmatpush.msrb.mxu1 %v9091_v44  ;;  %5433 = vmatpush.msrb.mxu2 %v9240_v18  ;;  %v5667_v44 = vand.u32 4294901760, %v9400_v3  ;;  %v5685_v54 = vand.u32 4294901760, %v9438_v46  ;;  %v5697_v18 = vand.u32 4294901760, %v9483_v61  ;;  %v9527_v0 = vsub.f32 %v3743_v1, %v9499_v63 }
 0xb5a   :  { %5478 = vmatpush.msrb.mxu3 %v9188_v17  ;;  %5529 = vmatpush.msrb.mxu0 %v10211_v7  ;;  %v9566_v57 = vand.u32 4294901760, %v3739_v56 }
 0xb5b   :  { %5586 = vmatpush.msrb.mxu1 %v9107_v43  ;;  %5436 = vmatpush.msrb.mxu2 %v9256_v11  ;;  %v5673_v43 = vand.u32 4294901760, %v9410_v49  ;;  %v9521_v11 = vand.u32 4294901760, %v3742_v20  ;;  %v5715_v7 = vand.u32 4294901760, %v9527_v0 }
 0xb5c   :  { %5480 = vmatpush.msrb.mxu3 %v9208_v15  ;;  %5533 = vmatpush.msrb.mxu0 %v10212_v62  ;;  %v9564_v62 = vsub.f32 %v3741_v24, %v9534_v59 }
 0xb5d   :  { %5588 = vmatpush.msrb.mxu1 %v9123_v8  ;;  %5439 = vmatpush.msrb.mxu2 %v9274_v40  ;;  %v5668_v8 = vsub.f32 %v9400_v3, %v5667_v44  ;;  %v5674_v58 = vsub.f32 %v9410_v49, %v5673_v43  ;;  %v5698_v40 = vsub.f32 %v9483_v61, %v5697_v18 }
 0xb5e   :  { %5482 = vmatpush.msrb.mxu3 %v9224_v13  ;;  %5537 = vmatpush.msrb.mxu0 %v10213_v33  ;;  %v9548_v32 = vsub.f32 %v3742_v20, %v9521_v11  ;;  %v5727_v1 = vand.u32 4294901760, %v9564_v62 }
 0xb5f   :  { %5590 = vmatpush.msrb.mxu1 %v9142_v28  ;;  %5442 = vmatpush.msrb.mxu2 %v9287_v37  ;;  %v3744_v28 = vld [vmem:[%s10126_s2 + $0x2c0] sm:$0xff]  ;;  %v5699_v33 = vand.u32 4294901760, %v5698_v40 }
 0xb60   :  { %5484 = vmatpush.msrb.mxu3 %v9242_v21  ;;  %5541 = vmatpush.msrb.mxu0 %v5349_v50  ;;  %v5680_v50 = vsub.f32 %v9424_v10, %v5679_v12  ;;  %v9485_v5 = vand.u32 4294901760, %v3744_v28 }
 0xb61   :  { %5592 = vmatpush.msrb.mxu1 %v9157_v34  ;;  %5445 = vmatpush.msrb.mxu2 %v9303_v41  ;;  %v5669_v34 = vand.u32 4294901760, %v5668_v8  ;;  %v3737_v41 = vld [vmem:[%s10126_s2 + $0x288] sm:$0xff] }
 0xb62   :  { %5486 = vmatpush.msrb.mxu3 %v9258_v26  ;;  %5545 = vmatpush.msrb.mxu0 %v5355_v45  ;;  %v5686_v45 = vsub.f32 %v9438_v46, %v5685_v54 }
 0xb63   :  { %5594 = vmatpush.msrb.mxu1 %v9175_v22  ;;  %5448 = vmatmul.f32.vlgmr.msrb.gmra.mxu2 %v9292_v6  ;;  %v5675_v22 = vand.u32 4294901760, %v5674_v58  ;;  %v5692_v6 = vsub.f32 %v9458_v55, %v5691_v47  ;;  %v3736_v58 = vld [vmem:[%s10126_s2 + $0x280] sm:$0xff] }
 0xb64   :  { %5617 = vmatpush.msra.mxu2 %v9381_v42  ;;  %5488 = vmatpush.msrb.mxu3 %v9281_v19 }
 0xb65   :  { %5549 = vmatpush.msrb.mxu0 %v5361_v36  ;;  %5596 = vmatpush.msrb.mxu1 %v9188_v17  ;;  %v5681_v17 = vand.u32 4294901760, %v5680_v50  ;;  %v9511_v36 = vsub.f32 %v3744_v28, %v9485_v5  ;;  %v5716_v28 = vsub.f32 %v9527_v0, %v5715_v7  ;;  %v9601_v50 = vand.u32 4294901760, %v3737_v41 }
 0xb66   :  { %5492 = vmatmul.f32.vlgmr.msrb.gmra.mxu3 %v5278_v38  ;;  %5619 = vmatpush.msra.mxu2 %v9389_v52  ;;  %v5703_v38 = vand.u32 4294901760, %v9497_v51 }
 0xb67   :  { %5670 = vmatpush.msra.mxu3 %v5669_v34  ;;  %5553 = vmatpush.msrb.mxu0 %v5367_v14  ;;  %v5687_v14 = vand.u32 4294901760, %v5686_v45  ;;  %v9599_v34 = vsub.f32 %v3739_v56, %v9566_v57  ;;  %v5717_v24 = vand.u32 4294901760, %v5716_v28  ;;  %v6937_v56 = vmov 32.0  }
 0xb68   :  { %5598 = vmatpush.msrb.mxu1 %v9208_v15  ;;  %5621 = vmatpush.msra.mxu2 %v9402_v30  ;;  %v3740_v15 = vld [vmem:[%s10126_s2 + $0x2a0] sm:$0xff]  ;;  %6918 = vrcp.f32 %v6937_v56 }
 0xb69   :  { %5676 = vmatpush.msra.mxu3 %v5675_v22  ;;  %5557 = vmatpush.msrb.mxu0 %v5373_v53  ;;  %v5709_v53 = vand.u32 4294901760, %v9511_v36  ;;  %v9550_v37 = vand.u32 4294901760, %v3740_v15 }
 0xb6a   :  { %5600 = vmatpush.msrb.mxu1 %v9224_v13  ;;  %5623 = vmatpush.msra.mxu2 %v9412_v39  ;;  %v5693_v13 = vand.u32 4294901760, %v5692_v6  ;;  %v5728_v6 = vsub.f32 %v9564_v62, %v5727_v1 }
 0xb6b   :  { %5682 = vmatpush.msra.mxu3 %v5681_v17  ;;  %5561 = vmatpush.msrb.mxu0 %v5379_v60  ;;  %v5704_v60 = vsub.f32 %v9497_v51, %v5703_v38  ;;  %v5710_v29 = vsub.f32 %v9511_v36, %v5709_v53  ;;  %v9615_v17 = vand.u32 4294901760, %v3736_v58 }
 0xb6c   :  { %5602 = vmatpush.msrb.mxu1 %v9242_v21  ;;  %5453 = vmatmul.f32.gmra.mxu2 %v9337_v35  ;;  %v3738_v21 = vld [vmem:[%s10126_s2 + $0x290] sm:$0xff] }
 0xb6d   :  { %5625 = vmatpush.msra.mxu2 %v9429_v48  ;;  %5688 = vmatpush.msra.mxu3 %v5687_v14  ;;  %v9582_v35 = vand.u32 4294901760, %v3738_v21  ;;  %v5705_v8 = vand.u32 4294901760, %v5704_v60  ;;  %v5739_v14 = vand.u32 4294901760, %v9599_v34 }
 0xb6e   :  { %5565 = vmatpush.msrb.mxu0 %v5385_v25  ;;  %5604 = vmatpush.msrb.mxu1 %v9258_v26  ;;  %v5721_v26 = vand.u32 4294901760, %v9548_v32  ;;  %v9580_v25 = vsub.f32 %v3740_v15, %v9550_v37  ;;  %v9625_v15 = vsub.f32 %v3737_v41, %v9601_v50  ;;  %v5729_v41 = vand.u32 4294901760, %v5728_v6  ;;  %v6919_v6 = vpop.eup %6918 }
 0xb6f   :  { %5498 = vmatmul.f32.gmra.mxu3 %v5286_v23  ;;  %5567 = vmatmul.f32.vlgmr.msrb.gmra.mxu0 %v9268_v31  ;;  %v3649_v23 = vld [vmem:[%s10004_s0 + $0x28] sm:$0xff]  ;;  %v9613_v20 = vsub.f32 %v3738_v21, %v9582_v35  ;;  %vm3592_vm2 = vweird.f32 %v6919_v6 }
 0xb70   :  { %5627 = vmatpush.msra.mxu2 %v9452_v16  ;;  %5694 = vmatpush.msra.mxu3 %v5693_v13  ;;  %v9604_v22 = vand.u32 4294901760, %v3649_v23  ;;  %v5733_v45 = vand.u32 4294901760, %v9580_v25 }
 0xb71   :  { %5772 = vmatpush.msra.mxu0 %v9400_v3  ;;  %5606 = vmatpush.msrb.mxu1 %v9281_v19  ;;  %v5711_v19 = vand.u32 4294901760, %v5710_v29  ;;  %v10077_v21 = vand.u32 4294901760, %v9613_v20  ;;  %v3655_v29 = vld [vmem:[%s10004_s0 + $0x58] sm:$0xff] }
 0xb72   :  { %5608 = vmatmul.f32.vlgmr.msrb.gmra.mxu1 %v9268_v31  ;;  %5629 = vmatpush.msra.mxu2 %v9469_v4  ;;  %v5722_v31 = vsub.f32 %v9548_v32, %v5721_v26  ;;  %v9629_v40 = vsub.f32 %v3649_v23, %v9604_v22  ;;  %v5734_v60 = vsub.f32 %v9580_v25, %v5733_v45 }
 0xb73   :  { %5700 = vmatpush.msra.mxu3 %v5699_v33  ;;  %5775 = vmatpush.msra.mxu0 %v9410_v49  ;;  %v9638_v33 = vsub.f32 %v3736_v58, %v9615_v17  ;;  %v5740_v23 = vsub.f32 %v9599_v34, %v5739_v14 }
 0xb74   :  { %5830 = vmatpush.msra.mxu1 %v9381_v42  ;;  %5631 = vmatpush.msra.mxu2 %v9485_v5  ;;  %v5723_v13 = vand.u32 4294901760, %v5722_v31  ;;  %v5650_v28 = vand.u32 4294901760, %v9629_v40  ;;  %v5735_v58 = vand.u32 4294901760, %v5734_v60 }
 0xb75   :  { %5706 = vmatpush.msra.mxu3 %v5705_v8  ;;  %5778 = vmatpush.msra.mxu0 %v9424_v10  ;;  %v10076_v8 = vand.u32 4294901760, %v9625_v15  ;;  %v10078_v31 = vand.u32 4294901760, %v9638_v33 }
 0xb76   :  { %5832 = vmatpush.msra.mxu1 %v9389_v52  ;;  %5633 = vmatpush.msra.mxu2 %v9499_v63 }
 0xb77   :  { %5712 = vmatpush.msra.mxu3 %v5711_v19  ;;  %5781 = vmatpush.msra.mxu0 %v9438_v46  ;;  %v5746_v19 = vsub.f32 %v9613_v20, %v10077_v21  ;;  %v5752_v56 = vsub.f32 %v9625_v15, %v10076_v8  ;;  %v3588_v8 = vmul.f32 32.0, %v6919_v6 }
 0xb78   :  { %5834 = vmatpush.msra.mxu1 %v9402_v30  ;;  %5571 = vmatmul.f32.gmra.mxu0 %v9321_v27 }
 0xb79   :  { %5635 = vmatpush.msra.mxu2 %v9521_v11  ;;  %5718 = vmatpush.msra.mxu3 %v5717_v24  ;;  %v9658_v24 = vand.u32 4294901760, %v3655_v29  ;;  %v5747_v60 = vand.u32 4294901760, %v5746_v19  ;;  %v5753_v21 = vand.u32 4294901760, %v5752_v56 }
 0xb7a   :  { %5784 = vmatpush.msra.mxu0 %v9458_v55  ;;  %5836 = vmatpush.msra.mxu1 %v9412_v39 }
 0xb7b   :  { %5612 = vmatmul.f32.gmra.mxu1 %v9321_v27  ;;  %5637 = vmatpush.msra.mxu2 %v9534_v59  ;;  %v5741_v27 = vand.u32 4294901760, %v5740_v23  ;;  %v9676_v23 = vsub.f32 %v3655_v29, %v9658_v24 }
 0xb7c   :  { %5724 = vmatpush.msra.mxu3 %v5723_v13  ;;  %5787 = vmatpush.msra.mxu0 %v9483_v61  ;;  %v5651_v13 = vsub.f32 %v9629_v40, %v5650_v28 }
 0xb7d   :  { %5838 = vmatpush.msra.mxu1 %v9429_v48  ;;  %5639 = vmatpush.msra.mxu2 %v9550_v37  ;;  %v5658_v29 = vand.u32 4294901760, %v9676_v23 }
 0xb7e   :  { %5730 = vmatpush.msra.mxu3 %v5729_v41  ;;  %5790 = vmatpush.msra.mxu0 %v9497_v51  ;;  %v5758_v41 = vsub.f32 %v9638_v33, %v10078_v31  ;;  %v3589_v31 = vsub.f32 1.0, %v3588_v8 }
 0xb7f   :  { %5840 = vmatpush.msra.mxu1 %v9452_v16  ;;  %5641 = vmatpush.msra.mxu2 %v9566_v57 }
 0xb80   :  { %5736 = vmatpush.msra.mxu3 %v5735_v58  ;;  %5793 = vmatpush.msra.mxu0 %v9511_v36  ;;  %v5652_v58 = vand.u32 4294901760, %v5651_v13  ;;  %v5759_v19 = vand.u32 4294901760, %v5758_v41  ;;  %v3590_v56 = vmul.f32 %v6919_v6, %v3589_v31  ;;  %v10216_v36 = vand.u32 4294901760, %v9638_v33 }
 0xb81   :  { %5842 = vmatpush.msra.mxu1 %v9469_v4  ;;  %5643 = vmatpush.msra.mxu2 %v9582_v35 }
 0xb82   :  { %5742 = vmatpush.msra.mxu3 %v5741_v27  ;;  %5796 = vmatpush.msra.mxu0 %v9527_v0  ;;  %v5659_v27 = vsub.f32 %v9676_v23, %v5658_v29  ;;  %v6877_v0 = vld [vmem:[%s10006_s13] ss:$0 sm:$0xff] }
 0xb83   :  { %5844 = vmatpush.msra.mxu1 %v9485_v5  ;;  %5645 = vmatpush.msra.mxu2 %v9601_v50 }
 0xb84   :  { %5748 = vmatpush.msra.mxu3 %v5747_v60  ;;  %5799 = vmatpush.msra.mxu0 %v9548_v32  ;;  %v5660_v3 = vand.u32 4294901760, %v5659_v27 }
 0xb85   :  { %5846 = vmatpush.msra.mxu1 %v9499_v63  ;;  %5647 = vmatpush.msra.mxu2 %v9615_v17 }
 0xb86   :  { %5754 = vmatpush.msra.mxu3 %v5753_v21  ;;  %5802 = vmatpush.msra.mxu0 %v9564_v62  ;;  %v9706_v21 = vpop.f32.mrf.mxu0 }
 0xb87   :  { %5848 = vmatpush.msra.mxu1 %v9521_v11  ;;  %5653 = vmatmul.f32.vlgmr.msra.gmra.mxu2 %v5652_v58  ;;  %v3795_v32 = vadd.f32 %v6877_v0, %v9706_v21 }
 0xb88   :  { %5877 = vmatpush.msrb.mxu2 %v5667_v44  ;;  %5760 = vmatpush.msra.mxu3 %v5759_v19  ;;  %v3591_v44 = vadd.f32 %v6919_v6, %v3590_v56 }
 0xb89   :  { %5805 = vmatpush.msra.mxu0 %v9580_v25  ;;  %5850 = vmatpush.msra.mxu1 %v9534_v59 }
 0xb8a   :  { %5762 = vmatmul.f32.vlgmr.msra.gmra.mxu3 %v9604_v22  ;;  %5881 = vmatpush.msrb.mxu2 %v5673_v43 }
 0xb8b   :  { %5948 = vmatpush.msrb.mxu3 %v9381_v42  ;;  %5808 = vmatpush.msra.mxu0 %v9599_v34  ;;  %v9714_v42 = vsel %vm3592_vm2, %v6919_v6, %v3591_v44 }
 0xb8c   :  { %5852 = vmatpush.msra.mxu1 %v9550_v37  ;;  %5885 = vmatpush.msrb.mxu2 %v5679_v12 }
 0xb8d   :  { %5950 = vmatpush.msrb.mxu3 %v9389_v52  ;;  %5811 = vmatpush.msra.mxu0 %v9613_v20  ;;  %v9719_v52 = vpop.f32.mrf.mxu1 }
 0xb8e   :  { %5854 = vmatpush.msra.mxu1 %v9566_v57  ;;  %5889 = vmatpush.msrb.mxu2 %v5685_v54  ;;  %v3802_v43 = vpop.f32.mrf.mxu0 }
 0xb8f   :  { %5952 = vmatpush.msrb.mxu3 %v9402_v30  ;;  %5814 = vmatpush.msra.mxu0 %v9625_v15 }
 0xb90   :  { %5856 = vmatpush.msra.mxu1 %v9582_v35  ;;  %5661 = vmatmul.f32.gmra.mxu2 %v5660_v3 }
 0xb91   :  { %5893 = vmatpush.msrb.mxu2 %v5691_v47  ;;  %5954 = vmatpush.msrb.mxu3 %v9412_v39  ;;  %v3583_v49 = vpop.xlane.xlu2 %3582 }
 0xb92   :  { %5817 = vmatpush.msra.mxu0 %v9638_v33  ;;  %5858 = vmatpush.msra.mxu1 %v9601_v50  ;;  %v3594_v30 = vmul.f32 %v9714_v42, %v3583_v49 }
 0xb93   :  { %5766 = vmatmul.f32.gmra.mxu3 %v9658_v24  ;;  %5820 = vmatmul.f32.vlgmr.msra.gmra.mxu0 %v9629_v40 }
 0xb94   :  { %5897 = vmatpush.msrb.mxu2 %v5697_v18  ;;  %5956 = vmatpush.msrb.mxu3 %v9429_v48  ;;  %v9731_v39 = vsub.f32 %v9035_v9, %v3594_v30  ;;  %v3961_v48 = vpop.f32.mrf.mxu2 }
 0xb95   :  { %5860 = vmatpush.msra.mxu1 %v9615_v17  ;;  %v3907_v46 = vpop.f32.mrf.mxu1 }
 0xb96   :  { %5864 = vmatmul.f32.vlgmr.msra.gmra.mxu1 %v5650_v28  ;;  %5901 = vmatpush.msrb.mxu2 %v5703_v38  ;;  %v3598_v10 = vmul.f32 %v9731_v39, %v9731_v39  ;;  %v4080_v61 = vpop.f32.mrf.mxu0 }
 0xb97   :  { %5958 = vmatpush.msrb.mxu3 %v9452_v16  ;;  %v4005_v16 = vpop.f32.mrf.mxu3 }
 0xb98   :  { %5905 = vmatpush.msrb.mxu2 %v5709_v53  ;;  %v3600_v9 = vsel %vm299_vm1, %v3598_v10, 0.0 }
 0xb99   :  { %5960 = vmatpush.msrb.mxu3 %v9469_v4  ;;  %3601 = vadd.xlane.f32.xlu2 %v3600_v9 }
 0xb9a   :  { %5909 = vmatpush.msrb.mxu2 %v5715_v7  ;;  %v3904_v7 = vadd.f32 %v9719_v52, %v3795_v32 }
 0xb9b   :  { %5962 = vmatpush.msrb.mxu3 %v9485_v5  ;;  %5825 = vmatmul.f32.gmra.mxu0 %v9676_v23  ;;  %v3586_v12 = vpop.xlane.xlu2 %3585 }
 0xb9c   :  { %5913 = vmatpush.msrb.mxu2 %v5721_v26  ;;  %v3595_v55 = vmul.f32 %v9714_v42, %v3586_v12  ;;  %v3966_v47 = vpop.f32.mrf.mxu2  ;;  %v3962_v25 = vadd.f32 %v3961_v48, %v3904_v7 }
 0xb9d   :  { %5964 = vmatpush.msrb.mxu3 %v9499_v63  ;;  %v4121_v51 = vpop.f32.mrf.mxu1  ;;  %v10215_v63 = vand.u32 4294901760, %v9625_v15 }
 0xb9e   :  { %5870 = vmatmul.f32.gmra.mxu1 %v5658_v29  ;;  %5917 = vmatpush.msrb.mxu2 %v5727_v1  ;;  %v9758_v54 = vsub.f32 %v9096_v2, %v3595_v55  ;;  %v10214_v2 = vand.u32 4294901760, %v9613_v20  ;;  %v4006_v34 = vadd.f32 %v4005_v16, %v3962_v25 }
 0xb9f   :  { %5966 = vmatpush.msrb.mxu3 %v9521_v11  ;;  %v4011_v18 = vpop.f32.mrf.mxu3  ;;  %v4084_v11 = vpop.f32.mrf.mxu0 }
 0xba0   :  { %5921 = vmatpush.msrb.mxu2 %v5733_v45  ;;  %v3599_v4 = vmul.f32 %v9758_v54, %v9758_v54  ;;  %v4081_v20 = vadd.f32 %v4080_v61, %v4006_v34 }
 0xba1   :  { %5968 = vmatpush.msrb.mxu3 %v9534_v59 }
 0xba2   :  { %5925 = vmatpush.msrb.mxu2 %v5739_v14  ;;  %v3603_v5 = vsel %vm299_vm1, %v3599_v4, 0.0  ;;  %v4122_v40 = vadd.f32 %v4121_v51, %v4081_v20 }
 0xba3   :  { %5970 = vmatpush.msrb.mxu3 %v9550_v37  ;;  %3604 = vadd.xlane.f32.xlu0 %v3603_v5 }
 0xba4   :  { %5929 = vmatpush.msrb.mxu2 %v10214_v2  ;;  %v4166_v38 = vpop.f32.mrf.mxu2 }
 0xba5   :  { %5972 = vmatpush.msrb.mxu3 %v9566_v57  ;;  %v4125_v59 = vpop.f32.mrf.mxu1  ;;  %v3803_v57 = vadd.f32 %v6877_v0, %v3802_v43  ;;  %v4167_v31 = vadd.f32 %v4166_v38, %v4122_v40 }
 0xba6   :  { %5933 = vmatpush.msrb.mxu2 %v10215_v63 }
 0xba7   :  { %5974 = vmatpush.msrb.mxu3 %v9582_v35  ;;  %v4275_v53 = vpop.f32.mrf.mxu3  ;;  %v4333_v37 = vpop.f32.mrf.mxu0  ;;  %v3908_v1 = vadd.f32 %v3907_v46, %v3803_v57 }
 0xba8   :  { %5937 = vmatpush.msrb.mxu2 %v10216_v36  ;;  %v4276_v60 = vadd.f32 %v4275_v53, %v4167_v31 }
 0xba9   :  { %5976 = vmatpush.msrb.mxu3 %v9601_v50  ;;  %5939 = vmatmul.f32.vlgmr.msrb.gmra.mxu2 %v9604_v22 }
 0xbaa   :  { %v4334_v19 = vadd.f32 %v4333_v37, %v4276_v60 }
 0xbab   :  { %5978 = vmatpush.msrb.mxu3 %v9615_v17 }
 0xbac   :  { %5980 = vmatmul.f32.vlgmr.msrb.gmra.mxu3 %v9604_v22  ;;  %v4174_v62 = vpop.f32.mrf.mxu2  ;;  %v3967_v22 = vadd.f32 %v3966_v47, %v3908_v1 }
 0xbad   :  { %v4377_v26 = vpop.f32.mrf.mxu1 }
 0xbae   :  { %v4012_v14 = vadd.f32 %v4011_v18, %v3967_v22  ;;  %v4378_v3 = vadd.f32 %v4377_v26, %v4334_v19 }
 0xbaf   :  { %v4279_v35 = vpop.f32.mrf.mxu3  ;;  %v4338_v50 = vpop.f32.mrf.mxu0 }
 0xbb0   :  { %v4085_v33 = vadd.f32 %v4084_v11, %v4012_v14 }
 0xbb1   :  { %5943 = vmatmul.f32.gmra.mxu2 %v9658_v24 }
 0xbb4   :  { %5984 = vmatmul.f32.gmra.mxu3 %v9658_v24  ;;  %v4452_v45 = vpop.f32.mrf.mxu2  ;;  %v4126_v24 = vadd.f32 %v4125_v59, %v4085_v33 }
 0xbb5   :  { %v4383_v17 = vpop.f32.mrf.mxu1  ;;  %v4453_v21 = vadd.f32 %v4452_v45, %v4378_v3 }
 0xbb6   :  { %v4175_v41 = vadd.f32 %v4174_v62, %v4126_v24 }
 0xbb7   :  { %v4493_v15 = vpop.f32.mrf.mxu3  ;;  %v4538_v8 = vpop.f32.mrf.mxu0 }
 0xbb8   :  { %v4280_v29 = vadd.f32 %v4279_v35, %v4175_v41  ;;  %v4494_v10 = vadd.f32 %v4493_v15, %v4453_v21 }
 0xbba   :  { %v4339_v44 = vadd.f32 %v4338_v50, %v4280_v29  ;;  %v4539_v48 = vadd.f32 %v4538_v8, %v4494_v10 }
 0xbbc   :  { %v4456_v28 = vpop.f32.mrf.mxu2  ;;  %v4384_v30 = vadd.f32 %v4383_v17, %v4339_v44 }
 0xbbd   :  { %v4647_v13 = vpop.f32.mrf.mxu1 }
 0xbbe   :  { %v4457_v46 = vadd.f32 %v4456_v28, %v4384_v30  ;;  %v4648_v55 = vadd.f32 %v4647_v13, %v4539_v48 }
 0xbbf   :  { %v4497_v6 = vpop.f32.mrf.mxu3  ;;  %v4546_v23 = vpop.f32.mrf.mxu0 }
 0xbc0   :  { %v4498_v4 = vadd.f32 %v4497_v6, %v4457_v46 }
 0xbc2   :  { %v4547_v2 = vadd.f32 %v4546_v23, %v4498_v4 }
 0xbc4   :  { %v4705_v58 = vpop.f32.mrf.mxu2 }
 0xbc5   :  { %v4651_v56 = vpop.f32.mrf.mxu1  ;;  %v4706_v61 = vadd.f32 %v4705_v58, %v4648_v55 }
 0xbc6   :  { %v4652_v18 = vadd.f32 %v4651_v56, %v4547_v2 }
 0xbc7   :  { %v4749_v27 = vpop.f32.mrf.mxu3  ;;  %v4824_v52 = vpop.f32.mrf.mxu0 }
 0xbc8   :  { %v4750_v51 = vadd.f32 %v4749_v27, %v4706_v61 }
 0xbca   :  { %v4825_v11 = vadd.f32 %v4824_v52, %v4750_v51 }
 0xbcc   :  { %v4710_v49 = vpop.f32.mrf.mxu2 }
 0xbcd   :  { %v4865_v43 = vpop.f32.mrf.mxu1  ;;  %v4711_v38 = vadd.f32 %v4710_v49, %v4652_v18 }
 0xbce   :  { %v4866_v53 = vadd.f32 %v4865_v43, %v4825_v11 }
 0xbcf   :  { %v4755_v9 = vpop.f32.mrf.mxu3  ;;  %v4828_v12 = vpop.f32.mrf.mxu0 }
 0xbd0   :  { %v4756_v32 = vadd.f32 %v4755_v9, %v4711_v38 }
 0xbd2   :  { %v4829_v57 = vadd.f32 %v4828_v12, %v4756_v32 }
 0xbd4   :  { %v4910_v16 = vpop.f32.mrf.mxu2 }
 0xbd5   :  { %v4869_v47 = vpop.f32.mrf.mxu1  ;;  %v4911_v37 = vadd.f32 %v4910_v16, %v4866_v53 }
 0xbd6   :  { %v4870_v1 = vadd.f32 %v4869_v47, %v4829_v57 }
 0xbd7   :  { %v5019_v5 = vpop.f32.mrf.mxu3  ;;  %v5077_v63 = vpop.f32.mrf.mxu0 }
 0xbd8   :  { %v5020_v26 = vadd.f32 %v5019_v5, %v4911_v37 }
 0xbda   :  { %v5078_v34 = vadd.f32 %v5077_v63, %v5020_v26 }
 0xbdc   :  { %v4918_v36 = vpop.f32.mrf.mxu2 }
 0xbdd   :  { %v5121_v0 = vpop.f32.mrf.mxu1  ;;  %v4919_v50 = vadd.f32 %v4918_v36, %v4870_v1  ;;  %v6878_v1 = vld [vmem:[%s10007_s10] ss:$0 sm:$0xff] }
 0xbde   :  { %v5122_v20 = vadd.f32 %v5121_v0, %v5078_v34 }
 0xbdf   :  { %v5023_v59 = vpop.f32.mrf.mxu3  ;;  %v5082_v7 = vpop.f32.mrf.mxu0 }
 0xbe0   :  { %v5024_v17 = vadd.f32 %v5023_v59, %v4919_v50 }
 0xbe2   :  { %v5083_v33 = vadd.f32 %v5082_v7, %v5024_v17 }
 0xbe4   :  { %v5196_v62 = vpop.f32.mrf.mxu2 }
 0xbe5   :  { %v5127_v35 = vpop.f32.mrf.mxu1  ;;  %v5197_v15 = vadd.f32 %v5196_v62, %v5122_v20 }
 0xbe6   :  { %v5128_v24 = vadd.f32 %v5127_v35, %v5083_v33 }
 0xbe7   :  { %v5237_v25 = vpop.f32.mrf.mxu3  ;;  %v5282_v22 = vpop.f32.mrf.mxu0 }
 0xbe8   :  { %v5238_v8 = vadd.f32 %v5237_v25, %v5197_v15 }
 0xbea   :  { %v5283_v6 = vadd.f32 %v5282_v22, %v5238_v8 }
 0xbec   :  { %v5200_v45 = vpop.f32.mrf.mxu2 }
 0xbed   :  { %v5391_v14 = vpop.f32.mrf.mxu1  ;;  %v5201_v13 = vadd.f32 %v5200_v45, %v5128_v24 }
 0xbee   :  { %v5392_v19 = vadd.f32 %v5391_v14, %v5283_v6  ;;  %v6879_v14 = vld [vmem:[%s10008_s11] ss:$0 sm:$0xff] }
 0xbef   :  { %v5241_v40 = vpop.f32.mrf.mxu3  ;;  %v5290_v28 = vpop.f32.mrf.mxu0 }
 0xbf0   :  { %v5242_v29 = vadd.f32 %v5241_v40, %v5201_v13 }
 0xbf2   :  { %v5291_v21 = vadd.f32 %v5290_v28, %v5242_v29 }
 0xbf4   :  { %v5449_v31 = vpop.f32.mrf.mxu2 }
 0xbf5   :  { %v5395_v41 = vpop.f32.mrf.mxu1  ;;  %v5450_v3 = vadd.f32 %v5449_v31, %v5392_v19 }
 0xbf6   :  { %v5396_v10 = vadd.f32 %v5395_v41, %v5291_v21 }
 0xbf7   :  { %v5493_v60 = vpop.f32.mrf.mxu3  ;;  %v5568_v27 = vpop.f32.mrf.mxu0 }
 0xbf8   :  { %v5494_v49 = vadd.f32 %v5493_v60, %v5450_v3 }
 0xbfa   :  { %v5569_v46 = vadd.f32 %v5568_v27, %v5494_v49 }
 0xbfc   :  { %v5454_v44 = vpop.f32.mrf.mxu2 }
 0xbfd   :  { %v5609_v52 = vpop.f32.mrf.mxu1  ;;  %v5455_v12 = vadd.f32 %v5454_v44, %v5396_v10 }
 0xbfe   :  { %v5610_v47 = vadd.f32 %v5609_v52, %v5569_v46 }
 0xbff   :  { %v5499_v30 = vpop.f32.mrf.mxu3  ;;  %v5572_v55 = vpop.f32.mrf.mxu0 }
 0xc00   :  { %v5500_v2 = vadd.f32 %v5499_v30, %v5455_v12 }
 0xc02   :  { %v5573_v38 = vadd.f32 %v5572_v55, %v5500_v2 }
 0xc05   :  { %v5613_v18 = vpop.f32.mrf.mxu1 }
 0xc06   :  { %v5614_v57 = vadd.f32 %v5613_v18, %v5573_v38  ;;  %v6046_v38 = vld [vmem:[%s10011_s16] sm:$0xff] }
 0xc0a   :  { %v5654_v4 = vpop.f32.mrf.mxu2 }
 0xc0b   :  { %v5655_v36 = vadd.f32 %v5654_v4, %v5610_v47  ;;  %v6048_v47 = vld [vmem:[%s10011_s16 + $0x10] sm:$0xff] }
 0xc0c   :  { %v3602_v23 = vpop.xlane.xlu2 %3601 }
 0xc0d   :  { %v3606_v58 = vmul.f32 %v3602_v23, %v9714_v42  ;;  %v5763_v51 = vpop.f32.mrf.mxu3 }
 0xc0e   :  { %v5764_v32 = vadd.f32 %v5763_v51, %v5655_v36  ;;  %v6074_v51 = vand.u32 4294901760, %v6048_v47 }
 0xc0f   :  { %v3608_v56 = vadd.f32 1e-05, %v3606_v58 }
 0xc10   :  { %v5821_v53 = vpop.f32.mrf.mxu0  ;;  %v6116_v36 = vsub.f32 %v6048_v47, %v6074_v51 }
 0xc11   :  { %6920 = vrsqrt.f32 %v3608_v56  ;;  %vm3616_vm10 = vweird.f32 %v3608_v56  ;;  %v5822_v34 = vadd.f32 %v5821_v53, %v5764_v32 }
 0xc12   :  { %v6117_v53 = vand.u32 4294901760, %v6116_v36 }
 0xc13   :  { %v5662_v62 = vpop.f32.mrf.mxu2  ;;  %v5865_v25 = vpop.f32.mrf.mxu1 }
 0xc14   :  { %v5663_v50 = vadd.f32 %v5662_v62, %v5614_v57  ;;  %v5866_v15 = vadd.f32 %v5865_v25, %v5822_v34  ;;  %v6118_v57 = vsub.f32 %v6116_v36, %v6117_v53 }
 0xc16   :  { %v3605_v43 = vpop.xlane.xlu0 %3604  ;;  %v5767_v22 = vpop.f32.mrf.mxu3 }
 0xc17   :  { %v6921_v9 = vpop.eup %6920  ;;  %v3607_v48 = vmul.f32 %v3605_v43, %v9714_v42  ;;  %v5768_v40 = vadd.f32 %v5767_v22, %v5663_v50 }
 0xc18   :  { %v3611_v16 = vmul.f32 %v6921_v9, %v3608_v56  ;;  %vm3617_vm3 = vweird.f32 %v6921_v9 }
 0xc19   :  { %v3609_v61 = vadd.f32 1e-05, %v3607_v48  ;;  %vm3618_vm11 = vmor %vm3616_vm10, %vm3617_vm3 }
 0xc1a   :  { %v3612_v5 = vmul.f32 %v6921_v9, %v3611_v16 }
 0xc1b   :  { %6922 = vrsqrt.f32 %v3609_v61  ;;  %vm3626_vm13 = vweird.f32 %v3609_v61  ;;  %v5871_v41 = vpop.f32.mrf.mxu1 }
 0xc1c   :  { %v3613_v63 = vmul.f32 0.5, %v3612_v5 }
 0xc1e   :  { %v3614_v11 = vsub.f32 1.5, %v3613_v63  ;;  %v6047_v63 = vld [vmem:[%s10011_s16 + $0x8] sm:$0xff] }
 0xc20   :  { %v3615_v0 = vmul.f32 %v6921_v9, %v3614_v11  ;;  %v6076_v11 = vand.u32 4294901760, %v6047_v63 }
 0xc21   :  { %v6923_v59 = vpop.eup %6922 }
 0xc22   :  { %v3619_v37 = vsel %vm3618_vm11, %v6921_v9, %v3615_v0  ;;  %v3621_v7 = vmul.f32 %v6923_v59, %v3609_v61  ;;  %vm3627_vm12 = vweird.f32 %v6923_v59  ;;  %v6049_v61 = vld [vmem:[%s10011_s16 + $0x18] sm:$0xff]  ;;  %v6122_v32 = vsub.f32 %v6047_v63, %v6076_v11 }
 0xc23   :  { %v3630_v35 = vmul.f32 %v3619_v37, %v9731_v39  ;;  %v5826_v39 = vpop.f32.mrf.mxu0  ;;  %vm3628_vm14 = vmor %vm3626_vm13, %vm3627_vm12  ;;  %v6072_v5 = vand.u32 4294901760, %v6049_v61  ;;  %v6078_v37 = vand.u32 4294901760, %v6046_v38 }
 0xc24   :  { %v3622_v26 = vmul.f32 %v6923_v59, %v3621_v7  ;;  %v5827_v13 = vadd.f32 %v5826_v39, %v5768_v40 }
 0xc25   :  { %v3636_v17 = vmul.f32 %v6878_v1, %v3630_v35  ;;  %v6110_v2 = vsub.f32 %v6049_v61, %v6072_v5  ;;  %6190 = vmatpush.msra.mxu3 %v6072_v5  ;;  %6073 = vmatpush.msrb.mxu0 %v6072_v5  ;;  %v6128_v25 = vsub.f32 %v6046_v38, %v6078_v37 }
 0xc26   :  { %v3623_v45 = vmul.f32 0.5, %v3622_v26  ;;  %v5872_v29 = vadd.f32 %v5871_v41, %v5827_v13  ;;  %v6123_v26 = vand.u32 4294901760, %v6122_v32  ;;  %v6880_v13 = vld [vmem:[%s10009_s14] ss:$0 sm:$0xff] }
 0xc27   :  { %v3642_v24 = vadd.f32 %v6879_v14, %v3636_v17  ;;  %v6111_v18 = vand.u32 4294901760, %v6110_v2  ;;  %6156 = vmatpush.msra.mxu2 %v6110_v2  ;;  %6192 = vmatpush.msra.mxu3 %v6074_v51  ;;  %v6129_v50 = vand.u32 4294901760, %v6128_v25 }
 0xc28   :  { %v3624_v20 = vsub.f32 1.5, %v3623_v45  ;;  %6075 = vmatpush.msrb.mxu0 %v6074_v51  ;;  %v6124_v34 = vsub.f32 %v6122_v32, %v6123_v26 }
 0xc29   :  { %6159 = vmatpush.msra.mxu2 %v6116_v36  ;;  %6194 = vmatpush.msra.mxu3 %v6076_v11  ;;  %v6130_v45 = vsub.f32 %v6128_v25, %v6129_v50 }
 0xc2a   :  { %v3625_v33 = vmul.f32 %v6923_v59, %v3624_v20  ;;  %6077 = vmatpush.msrb.mxu0 %v6076_v11  ;;  %v6125_v22 = vand.u32 4294901760, %v6124_v34 }
 0xc2b   :  { %6162 = vmatpush.msra.mxu2 %v6122_v32  ;;  %6196 = vmatpush.msra.mxu3 %v6078_v37  ;;  %v6131_v17 = vand.u32 4294901760, %v6130_v45 }
 0xc2c   :  { %v5940_v8 = vpop.f32.mrf.mxu2  ;;  %v3629_v28 = vsel %vm3628_vm14, %v6923_v59, %v3625_v33  ;;  %v6112_v59 = vsub.f32 %v6110_v2, %v6111_v18  ;;  %6079 = vmatpush.msrb.mxu0 %v6078_v37  ;;  %v6284_v2 = vld [vmem:[%s10013_s18 + $0x30] sm:$0xff] }
 0xc2d   :  { %v5941_v31 = vadd.f32 %v5940_v8, %v5866_v15  ;;  %v3631_v6 = vmul.f32 %v3629_v28, %v9758_v54  ;;  %6165 = vmatpush.msra.mxu2 %v6128_v25  ;;  %v9853_v63 = vand.u32 4294901760, %v6284_v2 }
 0xc2e   :  { %v6113_v62 = vand.u32 4294901760, %v6112_v59  ;;  %6225 = vmatpush.msra.mxu0 %v6111_v18  ;;  %v6283_v18 = vld [vmem:[%s10013_s18 + $0x28] sm:$0xff] }
 0xc2f   :  { %v5981_v60 = vpop.f32.mrf.mxu3  ;;  %v3637_v19 = vmul.f32 %v6878_v1, %v3631_v6  ;;  %v6119_v1 = vand.u32 4294901760, %v6118_v57  ;;  %v9865_v38 = vand.u32 4294901760, %v6283_v18 }
 0xc30   :  { %v5982_v23 = vadd.f32 %v5981_v60, %v5941_v31  ;;  %6114 = vmatpush.msrb.mxu1 %v6113_v62  ;;  %6229 = vmatpush.msra.mxu0 %v6117_v53 }
 0xc31   :  { %v3643_v44 = vadd.f32 %v6879_v14, %v3637_v19  ;;  %v9877_v32 = vsub.f32 %v6283_v18, %v9865_v38 }
 0xc32   :  { %v5988_v58 = vadd.f32 %v5982_v23, %v3642_v24  ;;  %6120 = vmatpush.msrb.mxu1 %v6119_v1  ;;  %6233 = vmatpush.msra.mxu0 %v6123_v26  ;;  %v6881_v23 = vld [vmem:[%s10010_s15] ss:$0 sm:$0xff]  ;;  %v6280_v1 = vld [vmem:[%s10013_s18 + $0x10] sm:$0xff] }
 0xc33   :  { %v6360_v26 = vand.u32 4294901760, %v9877_v32  ;;  %v9905_v45 = vand.u32 4294901760, %v6280_v1 }
 0xc34   :  { %v5944_v27 = vpop.f32.mrf.mxu2  ;;  %v5990_v56 = vsel %vm299_vm1, %v5988_v58, 0.0  ;;  %6126 = vmatpush.msrb.mxu1 %v6125_v22  ;;  %6237 = vmatpush.msra.mxu0 %v6129_v50 }
 0xc35   :  { %v5945_v3 = vadd.f32 %v5944_v27, %v5872_v29  ;;  %5991 = vadd.xlane.f32.xlu1 %v5990_v56  ;;  %v6361_v50 = vsub.f32 %v9877_v32, %v6360_v26 }
 0xc36   :  { %6132 = vmatpush.msrb.mxu1 %v6131_v17  ;;  %v6279_v17 = vld [vmem:[%s10013_s18 + $0x8] sm:$0xff] }
 0xc37   :  { %v5985_v21 = vpop.f32.mrf.mxu3 }
 0xc38   :  { %v5986_v52 = vadd.f32 %v5985_v21, %v5945_v3  ;;  %6260 = vmatpush.msra.mxu1 %v6072_v5  ;;  %v6285_v5 = vld [vmem:[%s10013_s18 + $0x38] sm:$0xff] }
 0xc39   :  { %v9845_v47 = vand.u32 4294901760, %v6285_v5 }
 0xc3a   :  { %v5989_v49 = vadd.f32 %v5986_v52, %v3643_v44  ;;  %6262 = vmatpush.msra.mxu1 %v6074_v51 }
 0xc3b   :  { %v9851_v51 = vsub.f32 %v6285_v5, %v9845_v47  ;;  %6306 = vmatpush.msrb.mxu2 %v9845_v47 }
 0xc3c   :  { %v5993_v30 = vsel %vm299_vm1, %v5989_v49, 0.0  ;;  %6264 = vmatpush.msra.mxu1 %v6076_v11  ;;  %v9862_v11 = vsub.f32 %v6284_v2, %v9853_v63 }
 0xc3d   :  { %5994 = vadd.xlane.f32.xlu2 %v5993_v30  ;;  %v6348_v36 = vand.u32 4294901760, %v9851_v51  ;;  %6308 = vmatpush.msrb.mxu2 %v9853_v63 }
 0xc3e   :  { %6266 = vmatpush.msra.mxu1 %v6078_v37  ;;  %v6354_v53 = vand.u32 4294901760, %v9862_v11 }
 0xc3f   :  { %v6349_v59 = vsub.f32 %v9851_v51, %v6348_v36  ;;  %6310 = vmatpush.msrb.mxu2 %v9865_v38 }
 0xc40   :  { %v6355_v57 = vsub.f32 %v9862_v11, %v6354_v53 }
 0xc41   :  { %v6350_v62 = vand.u32 4294901760, %v6349_v59 }
 0xc42   :  { %v6356_v34 = vand.u32 4294901760, %v6355_v57 }
 0xc43   :  { %6351 = vmatpush.msrb.mxu3 %v6350_v62 }
 0xc45   :  { %6357 = vmatpush.msrb.mxu3 %v6356_v34 }
 0xca8   :  { %v5992_v54 = vpop.xlane.xlu1 %5991 }
 0xca9   :  { %v5996_v10 = vmul.f32 %v5992_v54, %v9714_v42 }
 0xcab   :  { %v9801_v43 = vsub.f32 %v5988_v58, %v5996_v10 }
 0xcad   :  { %v6000_v9 = vmul.f32 %v9801_v43, %v9801_v43 }
 0xcaf   :  { %v6002_v48 = vsel %vm299_vm1, %v6000_v9, 0.0 }
 0xcb0   :  { %v5995_v46 = vpop.xlane.xlu2 %5994  ;;  %6003 = vadd.xlane.f32.xlu2 %v6002_v48 }
 0xcb1   :  { %v5997_v12 = vmul.f32 %v5995_v46, %v9714_v42 }
 0xcb3   :  { %v9807_v16 = vsub.f32 %v5989_v49, %v5997_v12 }
 0xcb5   :  { %v6001_v55 = vmul.f32 %v9807_v16, %v9807_v16 }
 0xcb7   :  { %v6005_v4 = vsel %vm299_vm1, %v6001_v55, 0.0 }
 0xcb8   :  { %6006 = vadd.xlane.f32.xlu2 %v6005_v4 }
 0xd23   :  { %v6004_v0 = vpop.xlane.xlu2 %6003 }
 0xd24   :  { %v6008_v7 = vmul.f32 %v6004_v0, %v9714_v42  ;;  %v6282_v0 = vld [vmem:[%s10013_s18 + $0x20] sm:$0xff] }
 0xd25   :  { %v9880_v37 = vand.u32 4294901760, %v6282_v0 }
 0xd26   :  { %v6010_v35 = vadd.f32 1e-05, %v6008_v7  ;;  %v6281_v7 = vld [vmem:[%s10013_s18 + $0x18] sm:$0xff] }
 0xd27   :  { %v9892_v25 = vsub.f32 %v6282_v0, %v9880_v37  ;;  %6312 = vmatpush.msrb.mxu2 %v9880_v37 }
 0xd28   :  { %6924 = vrsqrt.f32 %v6010_v35  ;;  %vm6018_vm0 = vweird.f32 %v6010_v35 }
 0xd29   :  { %v6366_v22 = vand.u32 4294901760, %v9892_v25 }
 0xd2b   :  { %v6007_v20 = vpop.xlane.xlu2 %6006 }
 0xd2c   :  { %v6009_v14 = vmul.f32 %v6007_v20, %v9714_v42 }
 0xd2e   :  { %v6925_v15 = vpop.eup %6924  ;;  %v6011_v40 = vadd.f32 1e-05, %v6009_v14  ;;  %v6362_v14 = vand.u32 4294901760, %v6361_v50 }
 0xd2f   :  { %v6013_v33 = vmul.f32 %v6925_v15, %v6010_v35  ;;  %vm6019_vm15 = vweird.f32 %v6925_v15  ;;  %v9896_v35 = vand.u32 4294901760, %v6281_v7 }
 0xd30   :  { %6926 = vrsqrt.f32 %v6011_v40  ;;  %vm6020_vm4 = vmor %vm6018_vm0, %vm6019_vm15  ;;  %vm6028_vm6 = vweird.f32 %v6011_v40  ;;  %6363 = vmatpush.msrb.mxu3 %v6362_v14  ;;  %v6883_v14 = vld [vmem:[%s10014_s19] ss:$0 sm:$0xff] }
 0xd31   :  { %v6014_v39 = vmul.f32 %v6925_v15, %v6013_v33  ;;  %v6371_v20 = vsub.f32 %v6281_v7, %v9896_v35  ;;  %6314 = vmatpush.msrb.mxu2 %v9896_v35  ;;  %v9915_v33 = vand.u32 4294901760, %v6279_v17 }
 0xd33   :  { %v6015_v8 = vmul.f32 0.5, %v6014_v39  ;;  %v6372_v39 = vand.u32 4294901760, %v6371_v20  ;;  %6316 = vmatpush.msrb.mxu2 %v9905_v45 }
 0xd35   :  { %v6016_v28 = vsub.f32 1.5, %v6015_v8  ;;  %v6278_v8 = vld [vmem:[%s10013_s18] sm:$0xff]  ;;  %6318 = vmatpush.msrb.mxu2 %v9915_v33 }
 0xd36   :  { %v6927_v31 = vpop.eup %6926 }
 0xd37   :  { %v6017_v24 = vmul.f32 %v6925_v15, %v6016_v28  ;;  %v6023_v6 = vmul.f32 %v6927_v31, %v6011_v40  ;;  %vm6029_vm5 = vweird.f32 %v6927_v31  ;;  %v6377_v40 = vsub.f32 %v6280_v1, %v9905_v45 }
 0xd38   :  { %vm6030_vm7 = vmor %vm6028_vm6, %vm6029_vm5 }
 0xd39   :  { %v6021_v60 = vsel %vm6020_vm4, %v6925_v15, %v6017_v24  ;;  %v6024_v41 = vmul.f32 %v6927_v31, %v6023_v6  ;;  %v6367_v15 = vsub.f32 %v9892_v25, %v6366_v22  ;;  %v6383_v24 = vsub.f32 %v6279_v17, %v9915_v33 }
 0xd3a   :  { %v6032_v58 = vmul.f32 %v6021_v60, %v9801_v43  ;;  %v6319_v6 = vand.u32 4294901760, %v6278_v8 }
 0xd3b   :  { %v6025_v19 = vmul.f32 0.5, %v6024_v41  ;;  %v6368_v28 = vand.u32 4294901760, %v6367_v15 }
 0xd3c   :  { %v6038_v29 = vmul.f32 %v6880_v13, %v6032_v58  ;;  %v6389_v58 = vsub.f32 %v6278_v8, %v6319_v6  ;;  %6320 = vmatpush.msrb.mxu2 %v6319_v6 }
 0xd3d   :  { %v6026_v27 = vsub.f32 1.5, %v6025_v19  ;;  %6369 = vmatpush.msrb.mxu3 %v6368_v28 }
 0xd3e   :  { %v9833_v56 = vadd.f32 %v6881_v23, %v6038_v29 }
 0xd3f   :  { %v6027_v3 = vmul.f32 %v6927_v31, %v6026_v27 }
 0xd40   :  { %v6055_v44 = vsel %vm299_vm1, %v9833_v56, 0 }
 0xd41   :  { %v6031_v21 = vsel %vm6030_vm7, %v6927_v31, %v6027_v3  ;;  %v6080_v52 = vand.u32 4294901760, %v6055_v44  ;;  %v6378_v31 = vand.u32 4294901760, %v6377_v40  ;;  %v6390_v3 = vand.u32 4294901760, %v6389_v58 }
 0xd42   :  { %v6033_v49 = vmul.f32 %v6031_v21, %v9807_v16 }
 0xd43   :  { %6134 = vmatmul.f32.vlgmr.msrb.gmra.mxu1 %v6080_v52  ;;  %v6081_v30 = vsub.f32 %v6055_v44, %v6080_v52  ;;  %v6379_v41 = vsub.f32 %v6377_v40, %v6378_v31  ;;  %v6882_v44 = vld [vmem:[%s10012_s17] ss:$0 sm:$0xff] }
 0xd44   :  { %v6039_v54 = vmul.f32 %v6880_v13, %v6033_v49  ;;  %6455 = vmatpush.msrb.mxu1 %v9845_v47  ;;  %v6373_v13 = vsub.f32 %v6371_v20, %v6372_v39  ;;  %v6391_v49 = vsub.f32 %v6389_v58, %v6390_v3 }
 0xd45   :  { %6168 = vmatmul.f32.vlgmr.msra.gmra.mxu2 %v6081_v30  ;;  %v6082_v10 = vand.u32 4294901760, %v6081_v30  ;;  %v6380_v29 = vand.u32 4294901760, %v6379_v41 }
 0xd46   :  { %v9838_v43 = vadd.f32 %v6881_v23, %v6039_v54  ;;  %6457 = vmatpush.msrb.mxu1 %v9853_v63  ;;  %v6384_v23 = vand.u32 4294901760, %v6383_v24  ;;  %v6374_v19 = vand.u32 4294901760, %v6373_v13  ;;  %6494 = vmatpush.msra.mxu2 %v6348_v36 }
 0xd47   :  { %6200 = vmatmul.f32.vlgmr.msra.gmra.mxu3 %v6082_v10  ;;  %v6083_v9 = vsub.f32 %v6081_v30, %v6082_v10  ;;  %v6392_v30 = vand.u32 4294901760, %v6391_v49 }
 0xd48   :  { %v6058_v48 = vsel %vm299_vm1, %v9838_v43, 0  ;;  %6459 = vmatpush.msrb.mxu1 %v9865_v38  ;;  %v6385_v27 = vsub.f32 %v6383_v24, %v6384_v23  ;;  %6375 = vmatpush.msrb.mxu3 %v6374_v19 }
 0xd49   :  { %v6084_v46 = vand.u32 4294901760, %v6083_v9  ;;  %v6088_v12 = vand.u32 4294901760, %v6058_v48  ;;  %6498 = vmatpush.msra.mxu2 %v6354_v53 }
 0xd4a   :  { %6461 = vmatpush.msrb.mxu1 %v9880_v37  ;;  %6381 = vmatpush.msrb.mxu3 %v6380_v29 }
 0xd4b   :  { %6085 = vmatmul.f32.vlgmr.msrb.gmra.mxu0 %v6084_v46  ;;  %6138 = vmatmul.f32.gmra.mxu1 %v6088_v12  ;;  %v6089_v55 = vsub.f32 %v6058_v48, %v6088_v12 }
 0xd4c   :  { %6413 = vmatpush.msrb.mxu0 %v9851_v51  ;;  %6463 = vmatpush.msrb.mxu1 %v9896_v35 }
 0xd4d   :  { %6173 = vmatmul.f32.gmra.mxu2 %v6089_v55  ;;  %v6090_v4 = vand.u32 4294901760, %v6089_v55 }
 0xd4e   :  { %6416 = vmatpush.msrb.mxu0 %v9862_v11  ;;  %6465 = vmatpush.msrb.mxu1 %v9905_v45 }
 0xd4f   :  { %6206 = vmatmul.f32.gmra.mxu3 %v6090_v4  ;;  %v6091_v16 = vsub.f32 %v6089_v55, %v6090_v4  ;;  %6502 = vmatpush.msra.mxu2 %v6360_v26 }
 0xd50   :  { %6419 = vmatpush.msrb.mxu0 %v9877_v32  ;;  %6467 = vmatpush.msrb.mxu1 %v9915_v33 }
 0xd51   :  { %v6092_v61 = vand.u32 4294901760, %v6091_v16  ;;  %6506 = vmatpush.msra.mxu2 %v6366_v22 }
 0xd52   :  { %6422 = vmatpush.msrb.mxu0 %v9892_v25  ;;  %6469 = vmatpush.msrb.mxu1 %v6319_v6 }
 0xd53   :  { %6093 = vmatmul.f32.gmra.mxu0 %v6092_v61  ;;  %6268 = vmatmul.f32.vlgmr.msra.gmra.mxu1 %v6080_v52 }
 0xd54   :  { %6425 = vmatpush.msrb.mxu0 %v6371_v20  ;;  %6510 = vmatpush.msra.mxu2 %v6372_v39 }
 0xd56   :  { %6428 = vmatpush.msrb.mxu0 %v6377_v40  ;;  %6514 = vmatpush.msra.mxu2 %v6378_v31 }
 0xd58   :  { %6431 = vmatpush.msrb.mxu0 %v6383_v24  ;;  %6518 = vmatpush.msra.mxu2 %v6384_v23 }
 0xd5a   :  { %6434 = vmatpush.msrb.mxu0 %v6389_v58  ;;  %6522 = vmatpush.msra.mxu2 %v6390_v3 }
 0xd5b   :  { %6239 = vmatmul.f32.vlgmr.msra.gmra.mxu0 %v6080_v52  ;;  %6272 = vmatmul.f32.gmra.mxu1 %v6088_v12  ;;  %v6386_v52 = vand.u32 4294901760, %v6385_v27 }
 0xd5d   :  { %6387 = vmatpush.msrb.mxu3 %v6386_v52 }
 0xd5f   :  { %6393 = vmatpush.msrb.mxu3 %v6392_v30 }
 0xd61   :  { %6541 = vmatpush.msra.mxu3 %v9845_v47 }
 0xd63   :  { %6243 = vmatmul.f32.gmra.mxu0 %v6088_v12  ;;  %6543 = vmatpush.msra.mxu3 %v9853_v63 }
 0xd65   :  { %6545 = vmatpush.msra.mxu3 %v9865_v38 }
 0xd67   :  { %6547 = vmatpush.msra.mxu3 %v9880_v37 }
 0xd69   :  { %6549 = vmatpush.msra.mxu3 %v9896_v35 }
 0xd6b   :  { %6551 = vmatpush.msra.mxu3 %v9905_v45 }
 0xd6d   :  { %6553 = vmatpush.msra.mxu3 %v9915_v33 }
 0xd6f   :  { %6555 = vmatpush.msra.mxu3 %v6319_v6 }
 0xdc0   :  { %v6135_v60 = vpop.f32.mrf.mxu1 }
 0xdc8   :  { %v6086_v21 = vpop.f32.mrf.mxu0  ;;  %v6139_v10 = vpop.f32.mrf.mxu1 }
 0xdc9   :  { %v6087_v54 = vadd.f32 %v6882_v44, %v6086_v21  ;;  %v6169_v48 = vpop.f32.mrf.mxu2 }
 0xdca   :  { %v6201_v4 = vpop.f32.mrf.mxu3 }
 0xdcb   :  { %v6136_v9 = vadd.f32 %v6135_v60, %v6087_v54 }
 0xdcd   :  { %v6170_v12 = vadd.f32 %v6169_v48, %v6136_v9 }
 0xdcf   :  { %v6202_v16 = vadd.f32 %v6201_v4, %v6170_v12 }
 0xdd0   :  { %v6094_v46 = vpop.f32.mrf.mxu0  ;;  %v6269_v5 = vpop.f32.mrf.mxu1 }
 0xdd1   :  { %v6095_v55 = vadd.f32 %v6882_v44, %v6094_v46  ;;  %v6174_v51 = vpop.f32.mrf.mxu2 }
 0xdd2   :  { %v6207_v11 = vpop.f32.mrf.mxu3 }
 0xdd3   :  { %v6140_v61 = vadd.f32 %v6139_v10, %v6095_v55 }
 0xdd5   :  { %v6175_v63 = vadd.f32 %v6174_v51, %v6140_v61 }
 0xdd7   :  { %v6208_v38 = vadd.f32 %v6207_v11, %v6175_v63  ;;  %v6625_v63 = vld [vmem:[%s10017_s22 + $0x10] sm:$0xff]  ;;  %v6624_v11 = vld [vmem:[%s10017_s22 + $0x8] sm:$0xff] }
 0xdd8   :  { %v6240_v47 = vpop.f32.mrf.mxu0  ;;  %v6273_v7 = vpop.f32.mrf.mxu1 }
 0xdd9   :  { %v6241_v2 = vadd.f32 %v6240_v47, %v6202_v16 }
 0xddb   :  { %v6270_v18 = vadd.f32 %v6269_v5, %v6241_v2  ;;  %v6626_v2 = vld [vmem:[%s10017_s22 + $0x18] sm:$0xff] }
 0xddc   :  { %v6647_v51 = vand.u32 4294901760, %v6626_v2 }
 0xddd   :  { %v6276_v36 = vmax.f32 %v6270_v18, 0.0 }
 0xdde   :  { %v6685_v18 = vsub.f32 %v6626_v2, %v6647_v51  ;;  %6648 = vmatpush.msra.mxu0 %v6647_v51 }
 0xddf   :  { %v6292_v0 = vsel %vm6290_vm8, %v6276_v36, 0  ;;  %v6649_v36 = vand.u32 4294901760, %v6625_v63 }
 0xde0   :  { %v6321_v59 = vand.u32 4294901760, %v6292_v0  ;;  %v6244_v53 = vpop.f32.mrf.mxu0 }
 0xde1   :  { %v6245_v32 = vadd.f32 %v6244_v53, %v6208_v38  ;;  %v6686_v38 = vand.u32 4294901760, %v6685_v18  ;;  %v6623_v53 = vld [vmem:[%s10017_s22] sm:$0xff]  ;;  %6650 = vmatpush.msra.mxu0 %v6649_v36 }
 0xde2   :  { %v6322_v37 = vsub.f32 %v6292_v0, %v6321_v59  ;;  %6395 = vmatmul.f32.vlgmr.msrb.gmra.mxu3 %v6321_v59  ;;  %v6691_v0 = vsub.f32 %v6625_v63, %v6649_v36 }
 0xde3   :  { %v6274_v62 = vadd.f32 %v6273_v7, %v6245_v32  ;;  %6765 = vmatpush.msrb.mxu3 %v6647_v51 }
 0xde4   :  { %v6323_v57 = vand.u32 4294901760, %v6322_v37  ;;  %6437 = vmatmul.f32.vlgmr.msrb.gmra.mxu0 %v6322_v37  ;;  %v6692_v7 = vand.u32 4294901760, %v6691_v0 }
 0xde5   :  { %v6277_v26 = vmax.f32 %v6274_v62, 0.0  ;;  %6767 = vmatpush.msrb.mxu3 %v6649_v36 }
 0xde6   :  { %v6324_v25 = vsub.f32 %v6322_v37, %v6323_v57  ;;  %6473 = vmatmul.f32.vlgmr.msrb.gmra.mxu1 %v6323_v57  ;;  %v6687_v37 = vsub.f32 %v6685_v18, %v6686_v38  ;;  %v6653_v57 = vand.u32 4294901760, %v6623_v53 }
 0xde7   :  { %v6295_v35 = vsel %vm6290_vm8, %v6277_v26, 0 }
 0xde8   :  { %v6325_v1 = vand.u32 4294901760, %v6324_v25  ;;  %v6329_v34 = vand.u32 4294901760, %v6295_v35  ;;  %v6688_v25 = vand.u32 4294901760, %v6687_v37 }
 0xdea   :  { %6326 = vmatmul.f32.vlgmr.msrb.gmra.mxu2 %v6325_v1  ;;  %6399 = vmatmul.f32.gmra.mxu3 %v6329_v34  ;;  %v6330_v50 = vsub.f32 %v6295_v35, %v6329_v34  ;;  %v6693_v35 = vsub.f32 %v6691_v0, %v6692_v7 }
 0xdeb   :  { %6731 = vmatpush.msrb.mxu2 %v6685_v18  ;;  %6689 = vmatpush.msra.mxu1 %v6688_v25 }
 0xdec   :  { %6442 = vmatmul.f32.gmra.mxu0 %v6330_v50  ;;  %v6331_v22 = vand.u32 4294901760, %v6330_v50 }
 0xded   :  { %6734 = vmatpush.msrb.mxu2 %v6691_v0  ;;  %v6628_v0 = vld [vmem:[%s10018_s3 + $0x8] sm:$0xff] }
 0xdee   :  { %6479 = vmatmul.f32.gmra.mxu1 %v6331_v22  ;;  %v6332_v45 = vsub.f32 %v6330_v50, %v6331_v22  ;;  %v6694_v22 = vand.u32 4294901760, %v6693_v35 }
 0xdf0   :  { %v6333_v20 = vand.u32 4294901760, %v6332_v45  ;;  %6695 = vmatpush.msra.mxu1 %v6694_v22 }
 0xdf2   :  { %6334 = vmatmul.f32.gmra.mxu2 %v6333_v20  ;;  %6557 = vmatmul.f32.vlgmr.msra.gmra.mxu3 %v6321_v59 }
 0xdfa   :  { %6524 = vmatmul.f32.vlgmr.msra.gmra.mxu2 %v6321_v59  ;;  %6561 = vmatmul.f32.gmra.mxu3 %v6329_v34  ;;  %v6651_v59 = vand.u32 4294901760, %v6624_v11 }
 0xdfc   :  { %v6697_v62 = vsub.f32 %v6624_v11, %v6651_v59  ;;  %6769 = vmatpush.msrb.mxu3 %v6651_v59  ;;  %6652 = vmatpush.msra.mxu0 %v6651_v59 }
 0xdfe   :  { %v6698_v1 = vand.u32 4294901760, %v6697_v62  ;;  %6737 = vmatpush.msrb.mxu2 %v6697_v62  ;;  %6771 = vmatpush.msrb.mxu3 %v6653_v57 }
 0xdff   :  { %6654 = vmatpush.msra.mxu0 %v6653_v57 }
 0xe00   :  { %v6699_v45 = vsub.f32 %v6697_v62, %v6698_v1 }
 0xe01   :  { %6800 = vmatpush.msrb.mxu0 %v6686_v38 }
 0xe02   :  { %6528 = vmatmul.f32.gmra.mxu2 %v6329_v34  ;;  %v6703_v34 = vsub.f32 %v6623_v53, %v6653_v57 }
 0xe03   :  { %6804 = vmatpush.msrb.mxu0 %v6692_v7 }
 0xe04   :  { %v6704_v20 = vand.u32 4294901760, %v6703_v34  ;;  %6740 = vmatpush.msrb.mxu2 %v6703_v34 }
 0xe05   :  { %6808 = vmatpush.msrb.mxu0 %v6698_v1 }
 0xe07   :  { %6812 = vmatpush.msrb.mxu0 %v6704_v20 }
 0xe61   :  { %v6438_v8 = vpop.f32.mrf.mxu0 }
 0xe63   :  { %v6474_v6 = vpop.f32.mrf.mxu1 }
 0xe65   :  { %v6396_v17 = vpop.f32.mrf.mxu3 }
 0xe69   :  { %v6443_v19 = vpop.f32.mrf.mxu0 }
 0xe6b   :  { %v6480_v44 = vpop.f32.mrf.mxu1 }
 0xe6d   :  { %v6327_v15 = vpop.f32.mrf.mxu2  ;;  %v6400_v33 = vpop.f32.mrf.mxu3 }
 0xe6e   :  { %v6328_v40 = vadd.f32 %v6883_v14, %v6327_v15 }
 0xe70   :  { %v6397_v39 = vadd.f32 %v6396_v17, %v6328_v40  ;;  %v6700_v17 = vand.u32 4294901760, %v6699_v45 }
 0xe72   :  { %v6439_v24 = vadd.f32 %v6438_v8, %v6397_v39  ;;  %6701 = vmatpush.msra.mxu1 %v6700_v17 }
 0xe74   :  { %v6475_v60 = vadd.f32 %v6474_v6, %v6439_v24 }
 0xe75   :  { %v6335_v28 = vpop.f32.mrf.mxu2  ;;  %v6558_v41 = vpop.f32.mrf.mxu3 }
 0xe76   :  { %v6336_v31 = vadd.f32 %v6883_v14, %v6335_v28  ;;  %v6705_v14 = vsub.f32 %v6703_v34, %v6704_v20 }
 0xe78   :  { %v6401_v13 = vadd.f32 %v6400_v33, %v6336_v31  ;;  %v6706_v40 = vand.u32 4294901760, %v6705_v14 }
 0xe7a   :  { %v6444_v27 = vadd.f32 %v6443_v19, %v6401_v13  ;;  %6707 = vmatpush.msra.mxu1 %v6706_v40  ;;  %v6885_v19 = vld [vmem:[%s10016_s21] ss:$0 sm:$0xff] }
 0xe7c   :  { %v6481_v21 = vadd.f32 %v6480_v44, %v6444_v27  ;;  %6835 = vmatpush.msrb.mxu1 %v6647_v51  ;;  %v6627_v51 = vld [vmem:[%s10018_s3] sm:$0xff] }
 0xe7d   :  { %v6525_v23 = vpop.f32.mrf.mxu2  ;;  %v6562_v54 = vpop.f32.mrf.mxu3 }
 0xe7e   :  { %v6526_v58 = vadd.f32 %v6525_v23, %v6475_v60  ;;  %6837 = vmatpush.msrb.mxu1 %v6649_v36 }
 0xe80   :  { %v6559_v29 = vadd.f32 %v6558_v41, %v6526_v58  ;;  %6839 = vmatpush.msrb.mxu1 %v6651_v59 }
 0xe82   :  { %v6565_v3 = vadd.f32 %v6559_v29, %v9833_v56  ;;  %6841 = vmatpush.msrb.mxu1 %v6653_v57 }
 0xe84   :  { %v6567_v52 = vsel %vm299_vm1, %v6565_v3, 0.0 }
 0xe85   :  { %v6529_v49 = vpop.f32.mrf.mxu2  ;;  %6568 = vadd.xlane.f32.xlu2 %v6567_v52 }
 0xe86   :  { %v6530_v30 = vadd.f32 %v6529_v49, %v6481_v21 }
 0xe88   :  { %v6563_v10 = vadd.f32 %v6562_v54, %v6530_v30 }
 0xe8a   :  { %v6566_v9 = vadd.f32 %v6563_v10, %v9838_v43 }
 0xe8c   :  { %v6570_v48 = vsel %vm299_vm1, %v6566_v9, 0.0 }
 0xe8d   :  { %6571 = vadd.xlane.f32.xlu2 %v6570_v48 }
 0xef8   :  { %v6569_v46 = vpop.xlane.xlu2 %6568 }
 0xef9   :  { %v6573_v12 = vmul.f32 %v6569_v46, %v9714_v42 }
 0xefb   :  { %v9949_v55 = vsub.f32 %v6565_v3, %v6573_v12 }
 0xefd   :  { %v6577_v56 = vmul.f32 %v9949_v55, %v9949_v55 }
 0xeff   :  { %v6579_v4 = vsel %vm299_vm1, %v6577_v56, 0.0 }
 0xf00   :  { %6580 = vadd.xlane.f32.xlu0 %v6579_v4  ;;  %v6572_v16 = vpop.xlane.xlu2 %6571 }
 0xf01   :  { %v6574_v61 = vmul.f32 %v6572_v16, %v9714_v42 }
 0xf03   :  { %v9955_v5 = vsub.f32 %v6566_v9, %v6574_v61 }
 0xf05   :  { %v6578_v43 = vmul.f32 %v9955_v5, %v9955_v5 }
 0xf07   :  { %v6582_v47 = vsel %vm299_vm1, %v6578_v43, 0.0 }
 0xf08   :  { %6583 = vadd.xlane.f32.xlu2 %v6582_v47 }
 0xf73   :  { %v6581_v32 = vpop.xlane.xlu0 %6580 }
 0xf74   :  { %v6585_v26 = vmul.f32 %v6581_v32, %v9714_v42 }
 0xf76   :  { %v6587_v50 = vadd.f32 1e-05, %v6585_v26 }
 0xf78   :  { %6928 = vrsqrt.f32 %v6587_v50  ;;  %vm6595_vm2 = vweird.f32 %v6587_v50 }
 0xf7b   :  { %v6584_v15 = vpop.xlane.xlu2 %6583 }
 0xf7c   :  { %v6586_v33 = vmul.f32 %v6584_v15, %v9714_v42  ;;  %v6884_v42 = vld [vmem:[%s10015_s20] ss:$0 sm:$0xff] }
 0xf7e   :  { %v6929_v39 = vpop.eup %6928  ;;  %v6588_v8 = vadd.f32 1e-05, %v6586_v33 }
 0xf7f   :  { %v6590_v28 = vmul.f32 %v6929_v39, %v6587_v50  ;;  %vm6596_vm9 = vweird.f32 %v6929_v39 }
 0xf80   :  { %6930 = vrsqrt.f32 %v6588_v8  ;;  %vm6597_vm3 = vmor %vm6595_vm2, %vm6596_vm9  ;;  %vm6605_vm11 = vweird.f32 %v6588_v8 }
 0xf81   :  { %v6591_v31 = vmul.f32 %v6929_v39, %v6590_v28 }
 0xf83   :  { %v6592_v24 = vmul.f32 0.5, %v6591_v31 }
 0xf85   :  { %v6593_v6 = vsub.f32 1.5, %v6592_v24 }
 0xf86   :  { %v6931_v13 = vpop.eup %6930 }
 0xf87   :  { %v6594_v60 = vmul.f32 %v6929_v39, %v6593_v6  ;;  %v6600_v41 = vmul.f32 %v6931_v13, %v6588_v8  ;;  %vm6606_vm10 = vweird.f32 %v6931_v13 }
 0xf88   :  { %vm6607_vm12 = vmor %vm6605_vm11, %vm6606_vm10 }
 0xf89   :  { %v6598_v23 = vsel %vm6597_vm3, %v6929_v39, %v6594_v60  ;;  %v6601_v58 = vmul.f32 %v6931_v13, %v6600_v41 }
 0xf8a   :  { %v6609_v29 = vmul.f32 %v6598_v23, %v9949_v55 }
 0xf8b   :  { %v6602_v27 = vmul.f32 0.5, %v6601_v58 }
 0xf8c   :  { %v6615_v3 = vmul.f32 %v6884_v42, %v6609_v29 }
 0xf8d   :  { %v6603_v44 = vsub.f32 1.5, %v6602_v27 }
 0xf8e   :  { %v6621_v21 = vadd.f32 %v6885_v19, %v6615_v3 }
 0xf8f   :  { %v6604_v52 = vmul.f32 %v6931_v13, %v6603_v44 }
 0xf90   :  { %v6630_v49 = vsel %vm299_vm1, %v6621_v21, 0 }
 0xf91   :  { %v6608_v30 = vsel %vm6607_vm12, %v6931_v13, %v6604_v52  ;;  %v6655_v54 = vand.u32 4294901760, %v6630_v49 }
 0xf92   :  { %v6610_v10 = vmul.f32 %v6608_v30, %v9955_v5 }
 0xf93   :  { %6709 = vmatmul.f32.vlgmr.msra.gmra.mxu1 %v6655_v54  ;;  %v6656_v9 = vsub.f32 %v6630_v49, %v6655_v54 }
 0xf94   :  { %v6616_v48 = vmul.f32 %v6884_v42, %v6610_v10 }
 0xf95   :  { %6743 = vmatmul.f32.vlgmr.msrb.gmra.mxu2 %v6656_v9  ;;  %v6657_v46 = vand.u32 4294901760, %v6656_v9 }
 0xf96   :  { %v6622_v12 = vadd.f32 %v6885_v19, %v6616_v48 }
 0xf97   :  { %6775 = vmatmul.f32.vlgmr.msrb.gmra.mxu3 %v6657_v46  ;;  %v6658_v55 = vsub.f32 %v6656_v9, %v6657_v46 }
 0xf98   :  { %v6633_v56 = vsel %vm299_vm1, %v6622_v12, 0 }
 0xf99   :  { %v6659_v4 = vand.u32 4294901760, %v6658_v55  ;;  %v6663_v16 = vand.u32 4294901760, %v6633_v56 }
 0xf9b   :  { %6660 = vmatmul.f32.vlgmr.msra.gmra.mxu0 %v6659_v4  ;;  %6713 = vmatmul.f32.gmra.mxu1 %v6663_v16  ;;  %v6664_v61 = vsub.f32 %v6633_v56, %v6663_v16 }
 0xf9d   :  { %6748 = vmatmul.f32.gmra.mxu2 %v6664_v61  ;;  %v6665_v43 = vand.u32 4294901760, %v6664_v61 }
 0xf9f   :  { %6781 = vmatmul.f32.gmra.mxu3 %v6665_v43  ;;  %v6666_v47 = vsub.f32 %v6664_v61, %v6665_v43 }
 0xfa1   :  { %v6667_v5 = vand.u32 4294901760, %v6666_v47 }
 0xfa3   :  { %6668 = vmatmul.f32.gmra.mxu0 %v6667_v5  ;;  %6843 = vmatmul.f32.vlgmr.msrb.gmra.mxu1 %v6655_v54 }
 0xfab   :  { %6814 = vmatmul.f32.vlgmr.msrb.gmra.mxu0 %v6655_v54  ;;  %6847 = vmatmul.f32.gmra.mxu1 %v6663_v16 }
 0xfb3   :  { %6818 = vmatmul.f32.gmra.mxu0 %v6663_v16 }
0x1010   :  { %v6710_v2 = vpop.f32.mrf.mxu1 }
0x1018   :  { %v6661_v63 = vpop.f32.mrf.mxu0  ;;  %v6714_v36 = vpop.f32.mrf.mxu1 }
0x1019   :  { %v6662_v18 = vadd.f32 %v6661_v63, %v6627_v51  ;;  %v6744_v38 = vpop.f32.mrf.mxu2 }
0x101a   :  { %v6776_v37 = vpop.f32.mrf.mxu3 }
0x101b   :  { %v6711_v11 = vadd.f32 %v6710_v2, %v6662_v18 }
0x101d   :  { %v6745_v53 = vadd.f32 %v6744_v38, %v6711_v11 }
0x101f   :  { %v6777_v7 = vadd.f32 %v6776_v37, %v6745_v53 }
0x1020   :  { %v6669_v59 = vpop.f32.mrf.mxu0  ;;  %v6844_v57 = vpop.f32.mrf.mxu1 }
0x1021   :  { %v6670_v32 = vadd.f32 %v6669_v59, %v6628_v0  ;;  %v6749_v35 = vpop.f32.mrf.mxu2 }
0x1022   :  { %v6782_v50 = vpop.f32.mrf.mxu3 }
0x1023   :  { %v6715_v62 = vadd.f32 %v6714_v36, %v6670_v32 }
0x1025   :  { %v6750_v1 = vadd.f32 %v6749_v35, %v6715_v62 }
0x1027   :  { %v6783_v22 = vadd.f32 %v6782_v50, %v6750_v1 }
0x1028   :  { %v6815_v26 = vpop.f32.mrf.mxu0  ;;  %v6848_v17 = vpop.f32.mrf.mxu1 }
0x1029   :  { %v6816_v25 = vadd.f32 %v6815_v26, %v6777_v7 }
0x102b   :  { %v6845_v34 = vadd.f32 %v6844_v57, %v6816_v25 }
0x102d   :  { %6851 = vst [vmem:[%s10019_s23] sm:$0xff] %v6845_v34 }
0x1030   :  { %v6819_v45 = vpop.f32.mrf.mxu0 }
0x1031   :  { %v6820_v20 = vadd.f32 %v6819_v45, %v6783_v22 }
0x1033   :  { %v6849_v14 = vadd.f32 %v6848_v17, %v6820_v20 }
0x1035   :  { %6852 = vst [vmem:[%s10019_s23 + $0x8] sm:$0xff] %v6849_v14 }

</bundles_post_ra>
